<compile_context>
chip_gen: v7x
topology: tpu7x:2x2x1
jax: 0.10.0
libtpu: 0.0.40
codegen_flags: <defaults>
</compile_context>

<pallas_src>
import functools

import jax
import jax.numpy as jnp
from jax.experimental import pallas as pl
from jax.experimental.pallas import tpu as pltpu


def _round_up(x, m):
    return (x + m - 1) // m * m


def sage_conv_kernel(a_ref, hs_ref, hd_ref, w1_ref, w2_ref, b_ref, o_ref,
                     acc_ref, *, deg_col, tk, hs_resident):
    k = pl.program_id(1)

    @pl.when(k == 0)
    def _():
        acc_ref[...] = jnp.zeros_like(acc_ref)

    # int8 (HBM/VMEM) adjacency tile -> bf16 for a single-pass MXU matmul.
    a_tile = a_ref[...].astype(jnp.bfloat16)
    if hs_resident:
        # Source features are VMEM-resident; slice the current k tile in place.
        start = pl.multiple_of(k * tk, tk)
        hs_tile = hs_ref[pl.ds(start, tk), :]
    else:
        hs_tile = hs_ref[...]

    # A @ [h | 1 | 0]: columns [0:F) accumulate the neighbor feature sums,
    # column `deg_col` accumulates the in-degree (fused, no extra reduce pass).
    acc_ref[...] += jnp.dot(a_tile, hs_tile, preferred_element_type=jnp.float32)

    @pl.when(k == pl.num_programs(1) - 1)
    def _():
        acc = acc_ref[...]                                    # (tm, Fp) f32
        deg = acc[:, deg_col:deg_col + 1]                     # fused degree column
        inv = pl.reciprocal(jnp.maximum(deg, 1.0), approx=True)   # EUP slot
        h_n = (acc * inv).astype(jnp.bfloat16)                # mean aggregation
        # cat([h, h_N]) @ W^T == h @ W1 + h_N @ W2 (padded rows of W1/W2 are 0,
        # so the degree / padding columns of h_n contribute nothing).
        out = (jnp.dot(hd_ref[...], w1_ref[...], preferred_element_type=jnp.float32)
               + jnp.dot(h_n, w2_ref[...], preferred_element_type=jnp.float32)
               + b_ref[...])
        o_ref[...] = out.astype(o_ref.dtype)


def _vmem_usage_bytes(tm, tk, hs_rows, Fp, Op):
    """Rough double-buffered VMEM footprint estimate for the tile choice."""
    a_bytes = 2 * tm * tk * 1                 # int8 adjacency tile
    hs_bytes = 2 * hs_rows * Fp * 2           # bf16 source feats (+ ones col)
    hd_bytes = 2 * tm * Fp * 2                # bf16 dest feats
    w_bytes = 2 * 2 * Fp * Op * 2             # bf16 W1 + W2
    b_bytes = 2 * 1 * Op * 4                  # f32 bias
    out_bytes = 2 * tm * Op * 4               # f32 output tile
    acc_bytes = tm * Fp * 4                   # f32 accumulator scratch
    return a_bytes + hs_bytes + hd_bytes + w_bytes + b_bytes + out_bytes + acc_bytes


def sage_conv(adj, h, weight, bias, *, tm=512, tk=1024):
    """adj: (N, N), adj[dst, src] != 0 iff edge src->dst (0/1 values); h: (N, F);
    weight: (out_feat, 2F) torch nn.Linear layout; bias: (out_feat,)."""
    N, F = h.shape
    out_feat = weight.shape[0]

    # Lane-dense padded sizes (multiples of 128); +1 column for the fused degree.
    Fp = _round_up(F + 1, 128)
    Op = _round_up(out_feat, 128)
    deg_col = F

    # VMEM budget: ~3/4 of physical capacity (~48 MiB v7x, ~96 MiB v5e/v6e).
    try:
        vmem_cap = int(pltpu.get_tpu_info().vmem_capacity_bytes)
    except Exception:
        vmem_cap = 64 * 1024 * 1024
    vmem_budget = (vmem_cap * 3) // 4

    n_min = _round_up(N, 128)
    tm = min(tm, n_min)
    tk = min(tk, n_min)
    # Keep >= 2 row tiles when possible so the "parallel" axis can shard across
    # both TensorCores on v7x (free on single-TC generations).
    if n_min // tm < 2 and n_min >= 256:
        tm = _round_up(n_min // 2, 128)

    def usage(tm_, tk_, resident_):
        hs_rows = _round_up(N, tk_) if resident_ else tk_
        return _vmem_usage_bytes(tm_, tk_, hs_rows, Fp, Op)

    # Keep the full source-feature matrix VMEM-resident when it fits the budget
    # (eliminates the per-row-tile hs re-stream); otherwise stream (tk, Fp) tiles
    # and, if still over budget, shrink the tiles.
    hs_resident = usage(tm, tk, True) <= vmem_budget
    if not hs_resident:
        while usage(tm, tk, False) > vmem_budget and tk > 128:
            tk = max(128, _round_up(tk // 2, 128))
        while usage(tm, tk, False) > vmem_budget and tm > 128:
            tm = max(128, _round_up(tm // 2, 128))

    # Rows / columns padded independently (no lcm blow-up).
    Np_r = _round_up(N, tm)
    Np_c = _round_up(N, tk)
    n_k = Np_c // tk
    if n_k == 1:
        hs_resident = False   # single k tile: the blocked spec is already minimal

    # Adjacency as int8 in HBM (exact for 0/1) -- halves the dominant stream.
    a_i8 = adj.astype(jnp.int8)
    if Np_r == N and Np_c == N:
        a_p = a_i8                                # already aligned: skip pad copy
    else:
        a_p = jnp.zeros((Np_r, Np_c), dtype=jnp.int8).at[:N, :N].set(a_i8)

    # Source-side features (bf16) with a fused ones column for the in-degree.
    hs = jnp.zeros((Np_c, Fp), dtype=jnp.bfloat16)
    hs = hs.at[:N, :F].set(h.astype(jnp.bfloat16))
    hs = hs.at[:N, deg_col].set(jnp.bfloat16(1.0))

    # Destination-side features (self term of the Linear), bf16 epilogue.
    hd = jnp.zeros((Np_r, Fp), dtype=jnp.bfloat16)
    hd = hd.at[:N, :F].set(h.astype(jnp.bfloat16))

    # Split + zero-pad the Linear weight: W^T rows [0:F) act on h, [F:2F) on h_N.
    w_t = weight.T.astype(jnp.float32)                 # (2F, out_feat)
    w1 = jnp.zeros((Fp, Op), jnp.bfloat16).at[:F, :out_feat].set(
        w_t[:F].astype(jnp.bfloat16))
    w2 = jnp.zeros((Fp, Op), jnp.bfloat16).at[:F, :out_feat].set(
        w_t[F:].astype(jnp.bfloat16))
    b2 = jnp.zeros((1, Op), jnp.float32).at[0, :out_feat].set(
        bias.astype(jnp.float32))

    grid = (Np_r // tm, n_k)

    if hs_resident:
        hs_spec = pl.BlockSpec((Np_c, Fp), lambda i, k: (0, 0))   # VMEM-resident
    else:
        hs_spec = pl.BlockSpec((tk, Fp), lambda i, k: (k, 0))     # streamed per k

    hs_reads = 1 if hs_resident else (Np_r // tm)
    cost = pl.CostEstimate(
        flops=2 * Np_r * Np_c * Fp + 4 * Np_r * Fp * Op,
        transcendentals=Np_r,
        bytes_accessed=(Np_r * Np_c * 1                  # int8 adjacency stream
                        + hs_reads * Np_c * Fp * 2       # bf16 source feats
                        + Np_r * Fp * 2                  # bf16 dest feats
                        + 2 * Fp * Op * 2                # bf16 weights
                        + Op * 4                         # bias
                        + Np_r * Op * 4),                # f32 output
    )

    usage_now = _vmem_usage_bytes(tm, tk, Np_c if hs_resident else tk, Fp, Op)
    vmem_limit = int(min(vmem_budget, max(2 * usage_now, 32 * 1024 * 1024)))

    out_p = pl.pallas_call(
        functools.partial(sage_conv_kernel, deg_col=deg_col, tk=tk,
                          hs_resident=hs_resident),
        out_shape=jax.ShapeDtypeStruct((Np_r, Op), jnp.float32),
        grid_spec=pltpu.PrefetchScalarGridSpec(
            num_scalar_prefetch=0,
            grid=grid,
            in_specs=[
                pl.BlockSpec((tm, tk), lambda i, k: (i, k)),   # A tile (dst, src)
                hs_spec,                                       # source feats (+ones)
                pl.BlockSpec((tm, Fp), lambda i, k: (i, 0)),   # dest feats (self term)
                pl.BlockSpec((Fp, Op), lambda i, k: (0, 0)),   # W1 (resident)
                pl.BlockSpec((Fp, Op), lambda i, k: (0, 0)),   # W2 (resident)
                pl.BlockSpec((1, Op), lambda i, k: (0, 0)),    # bias (resident)
            ],
            out_specs=pl.BlockSpec((tm, Op), lambda i, k: (i, 0)),
            scratch_shapes=[pltpu.VMEM((tm, Fp), jnp.float32)],
        ),
        compiler_params=pltpu.CompilerParams(
            dimension_semantics=("parallel", "arbitrary"),
            vmem_limit_bytes=vmem_limit,
        ),
        cost_estimate=cost,
    )(a_p, hs, hd, w1, w2, b2)

    return out_p[:N, :out_feat]


def sage_conv_ref(adj, h, weight, bias):
    deg = jnp.maximum(adj.sum(axis=1, keepdims=True), 1.0)
    h_n = (adj @ h) / deg
    h_total = jnp.concatenate([h, h_n], axis=1)
    return h_total @ weight.T + bias


if __name__ == "__main__":
    # N=2000 deliberately exercises row/col padding, multi-k accumulation,
    # the VMEM-resident hs path, and >=2 "parallel" row tiles.
    N, in_feat, out_feat = 2000, 16, 32

    key = jax.random.PRNGKey(0)
    k_adj, k_h, k_w, k_b = jax.random.split(key, 4)

    # Synthetic directed graph: adj[dst, src] = 1.0 with p = 0.3.
    adj = (jax.random.uniform(k_adj, (N, N)) < 0.3).astype(jnp.float32)

    # Node features.
    h = jax.random.normal(k_h, (N, in_feat), dtype=jnp.float32)

    # Deterministic nn.Linear(in_feat*2, out_feat) parameters (torch-style init).
    bound = 1.0 / jnp.sqrt(jnp.float32(in_feat * 2))
    weight = jax.random.uniform(k_w, (out_feat, in_feat * 2),
                                minval=-bound, maxval=bound, dtype=jnp.float32)
    bias = jax.random.uniform(k_b, (out_feat,),
                              minval=-bound, maxval=bound, dtype=jnp.float32)

    out = sage_conv(adj, h, weight, bias)
    out = jax.block_until_ready(out)

    ref = sage_conv_ref(adj, h, weight, bias)
    assert out.shape == (N, out_feat)
    # bf16 feature / weight streams (int8 adjacency is exact) -> small deviation
    # vs the f32 reference.
    assert jnp.allclose(out, ref, atol=2e-2, rtol=2e-2), "mismatch vs JAX reference"

    print("KERNEL_OK")
</pallas_src>

<mosaic_0001>
module attributes {stable_mosaic.version = 11 : i64} {
  func.func @sage_conv_kernel(%arg0: i32, %arg1: i32, %arg2: memref<512x1024xi8, #tpu.memory_space<vmem>>, %arg3: memref<2048x128xbf16, #tpu.memory_space<vmem>>, %arg4: memref<512x128xbf16, #tpu.memory_space<vmem>>, %arg5: memref<128x128xbf16, #tpu.memory_space<vmem>>, %arg6: memref<128x128xbf16, #tpu.memory_space<vmem>>, %arg7: memref<1x128xf32, #tpu.memory_space<vmem>>, %arg8: memref<512x128xf32, #tpu.memory_space<vmem>>, %arg9: memref<512x128xf32, #tpu.memory_space<vmem>>) attributes {dimension_semantics = [#tpu.dimension_semantics<parallel>, #tpu.dimension_semantics<arbitrary>], iteration_bounds = array<i64: 4, 2>, scalar_prefetch = 0 : i64, scratch_operands = 1 : i64, tpu.core_type = #tpu.core_type<tc>, window_params = [{transform_indices = @transform_0, window_bounds = array<i64: 512, 1024>}, {pipeline_mode = #tpu.pipeline_mode<synchronous>, transform_indices = @transform_1, window_bounds = array<i64: 2048, 128>}, {transform_indices = @transform_2, window_bounds = array<i64: 512, 128>}, {pipeline_mode = #tpu.pipeline_mode<synchronous>, transform_indices = @transform_3, window_bounds = array<i64: 128, 128>}, {pipeline_mode = #tpu.pipeline_mode<synchronous>, transform_indices = @transform_4, window_bounds = array<i64: 128, 128>}, {pipeline_mode = #tpu.pipeline_mode<synchronous>, transform_indices = @transform_5, window_bounds = array<i64: 1, 128>}, {transform_indices = @transform_6, window_bounds = array<i64: 512, 128>}]} {
    %c0_i32 = arith.constant 0 : i32
    %0 = arith.cmpi eq, %arg1, %c0_i32 : i32
    %1 = arith.extui %0 : i1 to i32
    %c0_i32_0 = arith.constant 0 : i32
    %2 = arith.cmpi ne, %1, %c0_i32_0 : i32
    scf.if %2 {
      %cst_8 = arith.constant 0.000000e+00 : f32
      %16 = vector.broadcast %cst_8 : f32 to vector<512x128xf32>
      %c0_9 = arith.constant 0 : index
      %c0_10 = arith.constant 0 : index
      %17 = vector.load %arg9[%c0_9, %c0_10] : memref<512x128xf32, #tpu.memory_space<vmem>>, vector<512x128xf32>
      tpu.vector_store %arg9[%c0_9, %c0_10], %16 {strides = array<i32>} : memref<512x128xf32, #tpu.memory_space<vmem>>, vector<512x128xf32>,
    } else {
    }
    %c0 = arith.constant 0 : index
    %c0_1 = arith.constant 0 : index
    %3 = vector.load %arg2[%c0, %c0_1] : memref<512x1024xi8, #tpu.memory_space<vmem>>, vector<512x1024xi8>
    %4 = arith.sitofp %3 : vector<512x1024xi8> to vector<512x1024xbf16>
    %c1024_i32 = arith.constant 1024 : i32
    %5 = arith.muli %arg1, %c1024_i32 : i32
    %6 = tpu.assume_multiple %5, 1024 : i32
    %7 = arith.index_cast %6 : i32 to index
    %c0_2 = arith.constant 0 : index
    %8 = vector.load %arg3[%7, %c0_2] : memref<2048x128xbf16, #tpu.memory_space<vmem>>, vector<1024x128xbf16>
    %c0_3 = arith.constant 0 : index
    %c0_4 = arith.constant 0 : index
    %9 = vector.load %arg9[%c0_3, %c0_4] : memref<512x128xf32, #tpu.memory_space<vmem>>, vector<512x128xf32>
    %cst = arith.constant dense<0.000000e+00> : vector<512x128xf32>
    %10 = tpu.matmul %4, %8, %cst {dimension_numbers = #tpu.dot_dimension_numbers<[1], [0], [0], [1], [0, 0, 1, 1], [], []>} : vector<512x1024xbf16>, vector<1024x128xbf16>, vector<512x128xf32> -> vector<512x128xf32>
    %11 = arith.addf %9, %10 : vector<512x128xf32>
    %c0_5 = arith.constant 0 : index
    %c0_6 = arith.constant 0 : index
    %12 = vector.load %arg9[%c0_5, %c0_6] : memref<512x128xf32, #tpu.memory_space<vmem>>, vector<512x128xf32>
    tpu.vector_store %arg9[%c0_5, %c0_6], %11 {strides = array<i32>} : memref<512x128xf32, #tpu.memory_space<vmem>>, vector<512x128xf32>,
    %c1_i32 = arith.constant 1 : i32
    %13 = arith.cmpi eq, %arg1, %c1_i32 : i32
    %14 = arith.extui %13 : i1 to i32
    %c0_i32_7 = arith.constant 0 : i32
    %15 = arith.cmpi ne, %14, %c0_i32_7 : i32
    scf.if %15 {
      %c0_8 = arith.constant 0 : index
      %c0_9 = arith.constant 0 : index
      %16 = vector.load %arg9[%c0_8, %c0_9] : memref<512x128xf32, #tpu.memory_space<vmem>>, vector<512x128xf32>
      %17 = vector.extract_strided_slice %16 {offsets = [0, 16], sizes = [512, 1], strides = [1, 1]} : vector<512x128xf32> to vector<512x1xf32>
      %cst_10 = arith.constant 1.000000e+00 : f32
      %18 = vector.broadcast %cst_10 : f32 to vector<512x1xf32>
      %19 = arith.maximumf %17, %18 : vector<512x1xf32>
      %20 = tpu.reciprocal %19 {approx = true} : vector<512x1xf32> -> vector<512x1xf32>
      %21 = vector.broadcast %20 : vector<512x1xf32> to vector<512x128xf32>
      %22 = arith.mulf %16, %21 : vector<512x128xf32>
      %23 = arith.truncf %22 : vector<512x128xf32> to vector<512x128xbf16>
      %c0_11 = arith.constant 0 : index
      %c0_12 = arith.constant 0 : index
      %24 = vector.load %arg4[%c0_11, %c0_12] : memref<512x128xbf16, #tpu.memory_space<vmem>>, vector<512x128xbf16>
      %c0_13 = arith.constant 0 : index
      %c0_14 = arith.constant 0 : index
      %25 = vector.load %arg5[%c0_13, %c0_14] : memref<128x128xbf16, #tpu.memory_space<vmem>>, vector<128x128xbf16>
      %cst_15 = arith.constant dense<0.000000e+00> : vector<512x128xf32>
      %26 = tpu.matmul %24, %25, %cst_15 {dimension_numbers = #tpu.dot_dimension_numbers<[1], [0], [0], [1], [0, 0, 1, 1], [], []>} : vector<512x128xbf16>, vector<128x128xbf16>, vector<512x128xf32> -> vector<512x128xf32>
      %c0_16 = arith.constant 0 : index
      %c0_17 = arith.constant 0 : index
      %27 = vector.load %arg6[%c0_16, %c0_17] : memref<128x128xbf16, #tpu.memory_space<vmem>>, vector<128x128xbf16>
      %cst_18 = arith.constant dense<0.000000e+00> : vector<512x128xf32>
      %28 = tpu.matmul %23, %27, %cst_18 {dimension_numbers = #tpu.dot_dimension_numbers<[1], [0], [0], [1], [0, 0, 1, 1], [], []>} : vector<512x128xbf16>, vector<128x128xbf16>, vector<512x128xf32> -> vector<512x128xf32>
      %29 = arith.addf %26, %28 : vector<512x128xf32>
      %c0_19 = arith.constant 0 : index
      %c0_20 = arith.constant 0 : index
      %30 = vector.load %arg7[%c0_19, %c0_20] : memref<1x128xf32, #tpu.memory_space<vmem>>, vector<1x128xf32>
      %31 = vector.broadcast %30 : vector<1x128xf32> to vector<512x128xf32>
      %32 = arith.addf %29, %31 : vector<512x128xf32>
      %c0_21 = arith.constant 0 : index
      %c0_22 = arith.constant 0 : index
      %33 = vector.load %arg8[%c0_21, %c0_22] : memref<512x128xf32, #tpu.memory_space<vmem>>, vector<512x128xf32>
      tpu.vector_store %arg8[%c0_21, %c0_22], %32 {strides = array<i32>} : memref<512x128xf32, #tpu.memory_space<vmem>>, vector<512x128xf32>,
    } else {
    }
    return
  }
  func.func @transform_0(%arg0: i32, %arg1: i32) -> (i32, i32) {
    %c0_i32 = arith.constant 0 : i32
    return %arg0, %arg1 : i32, i32
  }
  func.func @transform_1(%arg0: i32, %arg1: i32) -> (i32, i32) {
    %c0_i32 = arith.constant 0 : i32
    %c0_i32_0 = arith.constant 0 : i32
    %c0_i32_1 = arith.constant 0 : i32
    return %c0_i32, %c0_i32_0 : i32, i32
  }
  func.func @transform_2(%arg0: i32, %arg1: i32) -> (i32, i32) {
    %c0_i32 = arith.constant 0 : i32
    %c0_i32_0 = arith.constant 0 : i32
    return %arg0, %c0_i32 : i32, i32
  }
  func.func @transform_3(%arg0: i32, %arg1: i32) -> (i32, i32) {
    %c0_i32 = arith.constant 0 : i32
    %c0_i32_0 = arith.constant 0 : i32
    %c0_i32_1 = arith.constant 0 : i32
    return %c0_i32, %c0_i32_0 : i32, i32
  }
  func.func @transform_4(%arg0: i32, %arg1: i32) -> (i32, i32) {
    %c0_i32 = arith.constant 0 : i32
    %c0_i32_0 = arith.constant 0 : i32
    %c0_i32_1 = arith.constant 0 : i32
    return %c0_i32, %c0_i32_0 : i32, i32
  }
  func.func @transform_5(%arg0: i32, %arg1: i32) -> (i32, i32) {
    %c0_i32 = arith.constant 0 : i32
    %c0_i32_0 = arith.constant 0 : i32
    %c0_i32_1 = arith.constant 0 : i32
    return %c0_i32, %c0_i32_0 : i32, i32
  }
  func.func @transform_6(%arg0: i32, %arg1: i32) -> (i32, i32) {
    %c0_i32 = arith.constant 0 : i32
    %c0_i32_0 = arith.constant 0 : i32
    return %arg0, %c0_i32 : i32, i32
  }
}

</mosaic_0001>

<bundles_post_ra>
// kernel: tpu_custom_call.1
= control target key start
LH: loop header
LB: loop body
LE: loop exit
PB: predicated region body
PF: predicated region fallthrough
CT: control target
= control target key end

     0   :  { %s7311_s0 = inlined_call_operand.hbm [shape: s8[2048,2048], index: 0, kind: input, shape index: {}]   ;;  %s7312_s1 = inlined_call_operand.hbm [shape: bf16[2048,128], index: 1, kind: input, shape index: {}]   ;;  %s7313_s2 = inlined_call_operand.hbm [shape: bf16[2048,128], index: 2, kind: input, shape index: {}]   ;;  %s7314_s3 = inlined_call_operand.hbm [shape: bf16[128,128], index: 3, kind: input, shape index: {}]   ;;  %s7315_s4 = inlined_call_operand.hbm [shape: bf16[128,128], index: 4, kind: input, shape index: {}]   ;;  %s7316_s5 = inlined_call_operand.hbm [shape: f32[1,128], index: 5, kind: input, shape index: {}]   ;;  %s7317_s6 = inlined_call_operand.hbm [shape: f32[2048,128], index: 6, kind: output, shape index: {}]  }
   0x1   :  { %7348 = sst [smem:[#allocation58_spill]] %s7311_s0 }
   0x2   :  { %7349 = sst [smem:[#allocation59_spill]] %s7312_s1 }
   0x3   :  { %7350 = sst [smem:[#allocation60_spill]] %s7315_s4 }
   0x4   :  { %7351 = sst [smem:[#allocation61_spill]] %s7317_s6 }
   0x5   :  { %11 = vsyncpa [#allocation4], 0 }
   0x6   :  { %13 = vsyncpa [#allocation4 + $0x1], 0 }
   0x7   :  { %14 = vsyncpa [#allocation7], 0 }
   0x8   :  { %15 = vsyncpa [#allocation11], 0 }
   0x9   :  { %16 = vsyncpa [#allocation5], 0 }
   0xa   :  { %18 = vsyncpa [#allocation5 + $0x1], 0  ;;  %s5802_s21 = smov 0   ;;  %s5804_s22 = smov 0  }
   0xb   :  { %s5806_s23 = smov 0   ;;  %s5808_s24 = smov 0  }
   0xc   :  { %s5810_s25 = smov 0   ;;  %s5812_s26 = smov 0  }
   0xd   :  { %s5814_s27 = smov 0   ;;  %s5816_s28 = smov 0  }
   0xe   :  { %s5818_s29 = smov 0   ;;  %s5820_s30 = smov 0  }
   0xf   :  { %s5822_s7 = smov 0  }
  0x10 LB: > { %7352 = sst [smem:[#allocation20_spill]] %s5709_s21  ;;  %s5856_s8 = sadd.s32 4294967295, %s5749_s7   ;;  %s5749_s7 = sphi %s5822_s7, %s24_s7   ;;  %s5745_s30 = sphi %s5820_s30, %s7468_s30   ;;  %s5741_s29 = sphi %s5818_s29, %s7459_s29   ;;  %s5737_s28 = sphi %s5816_s28, %s7467_s28   ;;  %s5733_s27 = sphi %s5814_s27, %s7458_s27   ;;  %s5729_s26 = sphi %s5812_s26, %s7466_s26   ;;  %s5725_s25 = sphi %s5810_s25, %s7465_s25   ;;  %s5721_s24 = sphi %s5808_s24, %s7464_s24   ;;  %s5717_s23 = sphi %s5806_s23, %s7463_s23   ;;  %s5713_s22 = sphi %s5804_s22, %s7462_s22   ;;  %s5709_s21 = sphi %s5802_s21, %s7461_s21  }
  0x11   : > { %7353 = sst [smem:[#allocation21_spill]] %s5733_s27  ;;  %s4573_s9 = sadd.s32 4294967294, %s5749_s7  }
  0x12   : > { %7354 = sst [smem:[#allocation22_spill]] %s5737_s28  ;;  %p58_p0 = scmp.ne.s32.totalorder %s5725_s25, %s5721_s24 }
  0x13   : > { %7355 = sst [smem:[#allocation23_spill]] %s5741_s29  ;;  %p7320_p1 = scmp.eq.s32.totalorder %s5856_s8, 0 }
  0x14   : > { %p105_p2 = scmp.ne.s32.totalorder %s5713_s22, %s5709_s21  ;;  %p198_p4 = scmp.eq.s32.totalorder %s4573_s9, 7 }
  0x15   : > { %p5865_p3 = por %p7320_p1, %p58_p0  ;;  %p4574_p6 = scmp.ge.s32.totalorder %s5749_s7, 1 }
  0x16   : > { %p5871_p5 = por %p105_p2, %p7320_p1  ;;  %p5876_p7 = por %p198_p4, %p105_p2 }
  0x17   : > { %s7356_s10 = scalar_select %p5865_p3, 1, 0 }
  0x18   : > { %s7358_s11 = scalar_select %p5871_p5, 1, 0 }
  0x19   : > { %7357 = sst [smem:[#allocation24_spill]] %s7356_s10  ;;  %p205_p8 = scmp.lt.s32.totalorder %s5749_s7, 9 }
  0x1a   : > { %7359 = sst [smem:[#allocation25_spill]] %s7358_s11  ;;  %s5751_s14 = smov [#allocation6]  }
  0x1b   : > { %s7360_s12 = scalar_select %p5876_p7, 1, 0 }
  0x1c   : > { %p5881_p9 = pnand %p4574_p6, %p205_p8  ;;  %s217_s15 = sshll.u32 %s5751_s14, 4  ;;  %s218_s15 = int_to_ptr.vmem [resolvable:$true] %s217_s15 }
  0x1d   : > { %7361 = sst [smem:[#allocation26_spill]] %s7360_s12  ;;  %s5752_s17 = smov [#allocation10]  }
  0x1e   : > { %s7362_s13 = scalar_select %p5881_p9, 1, 0 }
  0x1f   : > { %p5047_p10 = pneg %p5881_p9  ;;  %s243_s18 = sshll.u32 %s5752_s17, 4  ;;  %s5893_s18 = int_to_ptr.vmem [resolvable:$true] %s243_s18 }
  0x20   : > { %s7364_s1 = sld [smem:[#allocation59_spill]] }
  0x21   : > { %p5889_p11 = pnand %p5047_p10, %p7320_p1 }
  0x23   : > { %s7363_s16 = scalar_select %p5889_p11, 1, 0 }
  0x24   : > { %p5903_p13 = pneg %p5889_p11 }
  0x26   : > { %s5439_s24 = scalar_lea.hbm %s7364_s1, 16384 }
  0x27   : > { %p5440_p12 = scmp.ne.s32.totalorder %s7364_s1, %s5439_s24  ;;  %p5446_p4 = scmp.lt.u32.totalorder %s5439_s24, %s7364_s1 }
  0x29   : > { %p5442_p0 = pnand %p5903_p13, %p5440_p12 }
  0x2b   : > { %p5443_p2 = pneg %p5442_p0 }
  0x2d   : > { %p5448_p6 = pnand %p5446_p4, %p5443_p2 }
  0x2f   : > { %5451 = shalt.err (!%p5448_p6)
}
  0x30   : > { %s5452_s19 = scalar_lea.vmem %s218_s15, 16384  ;;  %p5460_p7 = scmp.lt.s32.totalorder %s218_s15, %s218_s15 }
  0x31   : > { %p5453_p8 = scmp.ne.s32.totalorder %s218_s15, %s5452_s19  ;;  %p5461_p5 = scmp.lt.s32.totalorder %s5452_s19, %s5452_s19 }
  0x33   : > { %p5455_p10 = pnand %p5453_p8, %p5903_p13  ;;  %p5462_p3 = por %p5461_p5, %p5460_p7 }
  0x35   : > { %p5456_p1 = pneg %p5455_p10 }
  0x37   : > { %p5463_p9 = pnand %p5462_p3, %p5456_p1 }
  0x39   : > { %5466 = shalt.err (!%p5463_p9)
}
  0x3a   : > { %s7330_s12 = smov 64   ;;  %s7328_s20 = smov 4  }
  0x3b   : > { %5050 = dma.hbm_to_vmem [thread:$0]  (!%p5889_p11), %s7364_s1, 16384, %s218_s15, [#allocation7], %s7330_s12, %s7330_s12, %s7328_s20  }
  0x3c   : > { %s7366_s4 = sld [smem:[#allocation60_spill]] }
  0x42   : > { %s5467_s6 = scalar_lea.hbm %s7366_s4, 1024 }
  0x43   : > { %p5468_p1 = scmp.ne.s32.totalorder %s7366_s4, %s5467_s6  ;;  %p5474_p7 = scmp.lt.u32.totalorder %s5467_s6, %s7366_s4 }
  0x45   : > { %p5470_p3 = pnand %p5468_p1, %p5903_p13 }
  0x47   : > { %p5471_p5 = pneg %p5470_p3 }
  0x49   : > { %p5476_p9 = pnand %p5474_p7, %p5471_p5 }
  0x4b   : > { %5479 = shalt.err (!%p5476_p9)
}
  0x4c   : > { %s5480_s15 = scalar_lea.vmem %s5893_s18, 1024  ;;  %p5488_p4 = scmp.lt.s32.totalorder %s5893_s18, %s5893_s18 }
  0x4d   : > { %p5481_p12 = scmp.ne.s32.totalorder %s5893_s18, %s5480_s15  ;;  %p5489_p6 = scmp.lt.s32.totalorder %s5480_s15, %s5480_s15 }
  0x4f   : > { %p5483_p0 = pnand %p5481_p12, %p5903_p13  ;;  %p5490_p8 = por %p5489_p6, %p5488_p4 }
  0x51   : > { %p5484_p2 = pneg %p5483_p0 }
  0x53   : > { %p5491_p10 = pnand %p5490_p8, %p5484_p2 }
  0x55   : > { %5494 = shalt.err (!%p5491_p10)
}
  0x56   : > { %5056 = dma.hbm_to_vmem [thread:$0]  (!%p5889_p11), %s7366_s4, 1024, %s5893_s18, [#allocation11], %s7330_s12, %s7330_s12, %s7328_s20  }
  0x57   : > { %s33_s28 = sadd.s32 1, %s5741_s29  ;;  %s36_s11 = sadd.s32 1, %s5745_s30 }
  0x58   : > { %p34_p1 = scmp.ge.s32.totalorder %s33_s28, 2  ;;  %s45_s21 = sadd.s32 1, %s5729_s26 }
  0x59   : > { %p52_p3 = scmp.ne.s32.totalorder %s5729_s26, %s5725_s25  ;;  %p7337_p5 = scmp.eq.s32.totalorder %s5749_s7, 0 }
  0x5a   : > { %s7470_s28 = smov (%p34_p1, %s33_s28), 0  ;;  %s7472_s11 = smov (!%p34_p1, %s36_s11), %s5745_s30 }
  0x5b   : > { %7367 = sst [smem:[#allocation27_spill]] %s7470_s28  ;;  %s41_s24 = ssub.s32 %s5741_s29, %s7470_s28 }
  0x5c   : > { %p5961_p7 = por %p7337_p5, %p52_p3  ;;  %p38_p9 = scmp.ge.s32.totalorder %s7472_s11, 4 }
  0x5d   : > { %p7336_p12 = scmp.lt.s32.totalorder %s5749_s7, 8  ;;  %s268_s18 = sand.u32 1, %s5749_s7  }
  0x5e   : > { %s270_s17 = sand.u32 1, %s5729_s26   ;;  %s7474_s11 = smov (%p38_p9, %s7472_s11), 0 }
  0x5f   : > { %7369 = sst [smem:[#allocation28_spill]] %s7474_s11  ;;  %s4580_s19 = sshll.u32 %s270_s17, 10 }
  0x60   : > { %s5972_s15 = ssub.s32 %s5745_s30, %s7474_s11  ;;  %s4582_s27 = sshll.u32 %s5741_s29, 3 }
  0x61   : > { %s42_s6 = sor.u32 %s41_s24, %s5972_s15  ;;  %s4718_s20 = sshll.u32 %s5745_s30, 8 }
  0x62   : > { %p43_p2 = scmp.eq.s32.totalorder %s42_s6, 0  ;;  %s272_s12 = scalar_lea.vmem [#allocation3], %s4580_s19 }
  0x63   : > { %s282_s1 = sshll.u32 %s272_s12, 4  ;;  %s279_s28 = sadd.s32 %s4718_s20, %s4582_s27  ;;  %s5981_s1 = int_to_ptr.vmem [resolvable:$true] %s282_s1 }
  0x64   : > { %s5979_s4 = scalar_select %p43_p2, %s5729_s26, %s45_s21  }
  0x65   : > { %s4584_s10 = sshll.u32 %s279_s28, 7  ;;  %p5987_p4 = pnand %p7336_p12, %p5961_p7 }
  0x66   : > { %s7371_s0 = sld [smem:[#allocation58_spill]]  ;;  %s5996_s12 = scalar_lea.sflag [#allocation4], %s268_s18 }
  0x67   : > { %p5497_p8 = pneg %p5987_p4 }
  0x6c   : > { %s5994_s6 = scalar_lea.hbm %s7371_s0, %s4584_s10  ;;  %s5500_s21 = scalar_lea.hbm %s7371_s0, 131072 }
  0x6d   : > { %s5495_s20 = scalar_lea.hbm %s5994_s6, 16384  ;;  %p5501_p3 = scmp.lt.u32.totalorder %s5994_s6, %s7371_s0 }
  0x6e   : > { %p5496_p6 = scmp.ne.s32.totalorder %s5994_s6, %s5495_s20  ;;  %p5502_p7 = scmp.lt.u32.totalorder %s5500_s21, %s5495_s20 }
  0x6f   : > { %p5504_p2 = scmp.lt.u32.totalorder %s5495_s20, %s5994_s6 }
  0x70   : > { %p5498_p10 = pnand %p5497_p8, %p5496_p6  ;;  %p5503_p9 = por %p5502_p7, %p5501_p3 }
  0x72   : > { %p5499_p1 = pneg %p5498_p10  ;;  %p5505_p12 = por %p5504_p2, %p5503_p9 }
  0x74   : > { %p5506_p5 = pnand %p5505_p12, %p5499_p1 }
  0x76   : > { %5509 = shalt.err (!%p5506_p5)
}
  0x77   : > { %s5510_s18 = scalar_lea.vmem %s5981_s1, 16384  ;;  %s5755_s19 = smov [#allocation3]  }
  0x78   : > { %p5511_p6 = scmp.ne.s32.totalorder %s5981_s1, %s5510_s18  ;;  %s5515_s27 = sshll.u32 %s5755_s19, 4  ;;  %s5516_s27 = int_to_ptr.vmem [resolvable:$false] %s5515_s27 }
  0x79   : > { %s5517_s24 = scalar_lea.vmem %s5516_s27, 32768  ;;  %p5518_p11 = scmp.lt.s32.totalorder %s5981_s1, %s5516_s27 }
  0x7a   : > { %p5513_p10 = pnand %p5511_p6, %p5497_p8  ;;  %p5519_p3 = scmp.lt.s32.totalorder %s5517_s24, %s5510_s18 }
  0x7c   : > { %p5514_p0 = pneg %p5513_p10  ;;  %p5520_p7 = por %p5519_p3, %p5518_p11 }
  0x7e   : > { %p5521_p9 = pnand %p5520_p7, %p5514_p0 }
  0x80   : > { %5524 = shalt.err (!%p5521_p9)
}
  0x81   : > { %s5756_s20 = smov 2048   ;;  %s5757_s28 = smov 1024  }
  0x82   : > { %s7372_s11 = smov 64   ;;  %s5758_s21 = smov [#allocation9]  }
  0x83   : > { %5063 = dma.hbm_to_vmem [thread:$0]  (!%p5987_p4), %s5994_s6, 16384, %s5981_s1, %s5996_s12, %s5756_s20, %s5757_s28, %s7372_s11  }
  0x84   : > { %s230_s10 = sshll.u32 %s5758_s21, 4  ;;  %s5759_s9 = smov [#allocation12]   ;;  %s231_s10 = int_to_ptr.vmem [resolvable:$true] %s230_s10 }
  0x85   : > { %s257_s19 = sshll.u32 %s5759_s9, 4  ;;  %s5525_s24 = scalar_lea.hbm %s7314_s3, 1024  ;;  %s6025_s19 = int_to_ptr.vmem [resolvable:$true] %s257_s19 }
  0x86   : > { %p5526_p11 = scmp.ne.s32.totalorder %s7314_s3, %s5525_s24  ;;  %p5532_p0 = scmp.lt.u32.totalorder %s5525_s24, %s7314_s3 }
  0x88   : > { %p5528_p5 = pnand %p5526_p11, %p5903_p13 }
  0x8a   : > { %p5529_p12 = pneg %p5528_p5 }
  0x8c   : > { %p5534_p4 = pnand %p5532_p0, %p5529_p12 }
  0x8e   : > { %5537 = shalt.err (!%p5534_p4)
}
  0x8f   : > { %s5538_s6 = scalar_lea.vmem %s231_s10, 1024  ;;  %p5546_p6 = scmp.lt.s32.totalorder %s231_s10, %s231_s10 }
  0x90   : > { %p5539_p8 = scmp.ne.s32.totalorder %s231_s10, %s5538_s6  ;;  %p5547_p10 = scmp.lt.s32.totalorder %s5538_s6, %s5538_s6 }
  0x92   : > { %p5541_p1 = pnand %p5539_p8, %p5903_p13  ;;  %p5548_p3 = por %p5547_p10, %p5546_p6 }
  0x94   : > { %p5542_p2 = pneg %p5541_p1 }
  0x96   : > { %p5549_p7 = pnand %p5548_p3, %p5542_p2 }
  0x98   : > { %5552 = shalt.err (!%p5549_p7)
}
  0x99   : > { %p7373_p9 = scmp.ne.s32.totalorder %s7363_s16, 0  ;;  %s7374_s0 = smov 4  }
  0x9a   : > { %s5553_s9 = scalar_lea.hbm %s7316_s5, 16 }
  0x9b   : > { %5053 = dma.hbm_to_vmem [thread:$0]  (!%p7373_p9), %s7314_s3, 1024, %s231_s10, [#allocation7], %s7372_s11, %s7372_s11, %s7374_s0  }
  0x9c   : > { %p5554_p11 = scmp.ne.s32.totalorder %s7316_s5, %s5553_s9  ;;  %p5560_p0 = scmp.lt.u32.totalorder %s5553_s9, %s7316_s5 }
  0x9e   : > { %p5556_p5 = pnand %p5554_p11, %p5903_p13 }
  0xa0   : > { %p5557_p12 = pneg %p5556_p5 }
  0xa2   : > { %p5562_p4 = pnand %p5560_p0, %p5557_p12 }
  0xa4   : > { %5565 = shalt.err (!%p5562_p4)
}
  0xa5   : > { %s5566_s10 = scalar_lea.vmem %s6025_s19, 16  ;;  %s5573_s1 = scalar_lea.vmem %s6025_s19, 32 }
  0xa6   : > { %p5567_p8 = scmp.ne.s32.totalorder %s6025_s19, %s5566_s10  ;;  %p5574_p6 = scmp.lt.s32.totalorder %s6025_s19, %s6025_s19 }
  0xa7   : > { %p5575_p10 = scmp.lt.s32.totalorder %s5573_s1, %s5566_s10 }
  0xa8   : > { %p5569_p1 = pnand %p5567_p8, %p5903_p13 }
  0xa9   : > { %p5576_p3 = por %p5575_p10, %p5574_p6 }
  0xaa   : > { %p5570_p2 = pneg %p5569_p1 }
  0xac   : > { %p5577_p7 = pnand %p5576_p3, %p5570_p2 }
  0xae   : > { %5580 = shalt.err (!%p5577_p7)
}
  0xaf   : > { %5059 = dma.hbm_to_vmem [thread:$0]  (!%p7373_p9), %s7316_s5, 16, %s6025_s19, [#allocation11]  }
  0xb0   : > { %p192_p13 = scmp.eq.s32.totalorder %s5856_s8, 7  ;;  %s4719_s14 = sshll.u32 %s5745_s30, 12 }
  0xb1   : > { %s92_s20 = sadd.s32 1, %s5717_s23  ;;  %p99_p11 = scmp.ne.s32.totalorder %s5717_s23, %s5713_s22 }
  0xb2   : > { %p7375_p5 = scmp.eq.s32.totalorder %s5972_s15, 0  ;;  %p7376_p12 = scmp.eq.s32.totalorder %s5749_s7, 0 }
  0xb3   : > { %p6084_p4 = por %p192_p13, %p99_p11  ;;  %s294_s21 = sand.u32 1, %s5717_s23  }
  0xb4   : > { %s6080_s16 = scalar_select %p7375_p5, %s5717_s23, %s92_s20  }
  0xb5   : > { %p101_p0 = por %p99_p11, %p7376_p12  ;;  %s4585_s9 = sshll.u32 %s294_s21, 8 }
  0xb6   : > { %p7378_p8 = scmp.lt.s32.totalorder %s5749_s7, 8  ;;  %s6098_s15 = scalar_lea.hbm %s7313_s2, %s4719_s14 }
  0xb7   : > { %s296_s24 = scalar_lea.vmem [#allocation8], %s4585_s9  ;;  %s5581_s10 = scalar_lea.hbm %s6098_s15, 4096 }
  0xb8   : > { %p6091_p1 = pnand %p7378_p8, %p101_p0  ;;  %s303_s17 = sshll.u32 %s296_s24, 4  ;;  %s6100_s17 = int_to_ptr.vmem [resolvable:$true] %s303_s17 }
  0xb9   : > { %p5582_p9 = scmp.ne.s32.totalorder %s6098_s15, %s5581_s10  ;;  %s5586_s29 = scalar_lea.hbm %s7313_s2, 16384 }
  0xba   : > { %p5583_p2 = pneg %p6091_p1  ;;  %p5587_p3 = scmp.lt.u32.totalorder %s6098_s15, %s7313_s2 }
  0xbb   : > { %p5588_p7 = scmp.lt.u32.totalorder %s5586_s29, %s5581_s10  ;;  %p5590_p11 = scmp.lt.u32.totalorder %s5581_s10, %s6098_s15 }
  0xbc   : > { %p5584_p6 = pnand %p5583_p2, %p5582_p9 }
  0xbd   : > { %p5589_p13 = por %p5588_p7, %p5587_p3 }
  0xbe   : > { %p5585_p10 = pneg %p5584_p6 }
  0xbf   : > { %p5591_p5 = por %p5590_p11, %p5589_p13 }
  0xc1   : > { %p5592_p12 = pnand %p5591_p5, %p5585_p10 }
  0xc3   : > { %5595 = shalt.err (!%p5592_p12)
}
  0xc4   : > { %s5596_s21 = scalar_lea.vmem %s6100_s17, 4096  ;;  %s5760_s9 = smov [#allocation8]  }
  0xc5   : > { %p5597_p0 = scmp.ne.s32.totalorder %s6100_s17, %s5596_s21  ;;  %s5601_s19 = sshll.u32 %s5760_s9, 4  ;;  %s5602_s19 = int_to_ptr.vmem [resolvable:$false] %s5601_s19 }
  0xc6   : > { %s5603_s27 = scalar_lea.vmem %s5602_s19, 8192  ;;  %p5604_p6 = scmp.lt.s32.totalorder %s6100_s17, %s5602_s19 }
  0xc7   : > { %p5599_p8 = pnand %p5597_p0, %p5583_p2  ;;  %p5605_p3 = scmp.lt.s32.totalorder %s5603_s27, %s5596_s21 }
  0xc9   : > { %p5600_p9 = pneg %p5599_p8  ;;  %p5606_p7 = por %p5605_p3, %p5604_p6 }
  0xcb   : > { %p5607_p13 = pnand %p5606_p7, %p5600_p9 }
  0xcd   : > { %5610 = shalt.err (!%p5607_p13)
}
  0xce   : > { %5066 = dma.hbm_to_vmem [thread:$0]  (!%p6091_p1), %s6098_s15, 4096, %s6100_s17, %s5996_s12, %s7372_s11, %s7372_s11, %s7374_s0  }
  0xcf   : > { %p7380_p2 = scmp.ne.s32.totalorder %s7362_s13, 0 }
  0xd1   : > { %315 = sbr.rel (%p7380_p2) target bundleno = 1600 (0x640), region = 44 }
  0xd8   : > { %s7381_s24 = sld [smem:[#allocation24_spill]]  ;;  %s317_s10 = sand.u32 1, %s5856_s8  }
  0xd9   : > { %s319_s1 = sand.u32 1, %s5725_s25   ;;  %s318_s29 = scalar_lea.sflag [#allocation4], %s317_s10 }
  0xda   : > { %s4589_s6 = sshll.u32 %s319_s1, 10 }
  0xdb   : > { %s6135_s14 = scalar_lea.vmem [#allocation3], %s4589_s6 }
  0xde   : > { %p7382_p10 = scmp.ne.s32.totalorder %s7381_s24, 0 }
  0xe0   : > { %5684 = dma.done.wait (%p7382_p10), %s318_s29, 16384  }
  0xe1   : > { %5686 = vsyncadd (%p7382_p10), %s318_s29, 4294950912  ;;  %p7383_p11 = scmp.eq.s32.totalorder %s5856_s8, 0 }
  0xe3   : > { %5688 = dma.done.wait (%p7383_p11), [#allocation7], 16384   ;;  %p7384_p1 = pmov %p7383_p11 }
  0xe4   : > { %s7385_s13 = sld [smem:[#allocation25_spill]]  ;;  %s6146_s12 = sand.u32 1, %s5713_s22  }
  0xe5   : > { %5690 = vsyncadd (%p7384_p1), [#allocation7], 4294950912  ;;  %s4591_s11 = sshll.u32 %s6146_s12, 8 }
  0xe6   : > { %s6149_s0 = scalar_lea.vmem [#allocation8], %s4591_s11 }
  0xea   : > { %p7386_p5 = scmp.ne.s32.totalorder %s7385_s13, 0 }
  0xec   : > { %5692 = dma.done.wait (%p7386_p5), %s318_s29, 4096  }
  0xed   : > { %5694 = vsyncadd (%p7386_p5), %s318_s29, 4294963200  ;;  %p7387_p12 = pmov %p7384_p1 }
  0xee   : > { %p7388_p0 = pmov %p7384_p1 }
  0xef   : > { %5696 = dma.done.wait (%p7387_p12), [#allocation7], 1024  }
  0xf0   : > { %5698 = vsyncadd (%p7388_p0), [#allocation7], 4294966272  ;;  %p7389_p8 = pmov %p7388_p0 }
  0xf1   : > { %p7390_p9 = pmov %p7388_p0 }
  0xf2   : > { %5700 = dma.done.wait (%p7389_p8), [#allocation11], 1040  }
  0xf3   : > { %5702 = vsyncadd (%p7390_p9), [#allocation11], 4294966256  ;;  %s4595_s18 = sshll.u32 %s6146_s12, 9  ;;  %s7391_s17 = sld [smem:[#allocation21_spill]] }
  0xf4   : > { %s6164_s15 = scalar_lea.vmem [#allocation13], %s4595_s18 }
  0xf9   : > { %p4596_p6 = scmp.ne.s32.totalorder %s7391_s17, 0 }
  0xfa   : > { %v5761_v0 = vmov (!%p4596_p6), 0.0  }
  0xfb   : > { %388 = sbr.rel (%p4596_p6) target bundleno = 283 (0x11b), region = 72  ;;  %389 = vst [vmem:[#allocation2] sm:$0xff] (!%p4596_p6), %v5761_v0  ;;  %390 = vst [vmem:[#allocation2 + $0x8] sm:$0xff] (!%p4596_p6), %v5761_v0 }
  0xfc   : > { %391 = vst [vmem:[#allocation2 + $0x10] sm:$0xff] (!%p4596_p6), %v5761_v0  ;;  %392 = vst [vmem:[#allocation2 + $0x18] sm:$0xff] (!%p4596_p6), %v5761_v0 }
  0xfd   : > { %393 = vst [vmem:[#allocation2 + $0x20] sm:$0xff] (!%p4596_p6), %v5761_v0  ;;  %394 = vst [vmem:[#allocation2 + $0x28] sm:$0xff] (!%p4596_p6), %v5761_v0 }
  0xfe   : > { %395 = vst [vmem:[#allocation2 + $0x30] sm:$0xff] (!%p4596_p6), %v5761_v0  ;;  %396 = vst [vmem:[#allocation2 + $0x38] sm:$0xff] (!%p4596_p6), %v5761_v0 }
  0xff   : > { %397 = vst [vmem:[#allocation2 + $0x40] sm:$0xff] (!%p4596_p6), %v5761_v0  ;;  %398 = vst [vmem:[#allocation2 + $0x48] sm:$0xff] (!%p4596_p6), %v5761_v0 }
 0x100   : > { %399 = vst [vmem:[#allocation2 + $0x50] sm:$0xff] (!%p4596_p6), %v5761_v0  ;;  %400 = vst [vmem:[#allocation2 + $0x58] sm:$0xff] (!%p4596_p6), %v5761_v0 }
 0x101   : > { %401 = vst [vmem:[#allocation2 + $0x60] sm:$0xff] (!%p4596_p6), %v5761_v0  ;;  %402 = vst [vmem:[#allocation2 + $0x68] sm:$0xff] (!%p4596_p6), %v5761_v0 }
 0x102   : > { %403 = vst [vmem:[#allocation2 + $0x70] sm:$0xff] %v5761_v0  ;;  %404 = vst [vmem:[#allocation2 + $0x78] sm:$0xff] %v5761_v0 }
 0x103   : > { %405 = vst [vmem:[#allocation2 + $0x80] sm:$0xff] %v5761_v0  ;;  %406 = vst [vmem:[#allocation2 + $0x88] sm:$0xff] %v5761_v0 }
 0x104   : > { %407 = vst [vmem:[#allocation2 + $0x90] sm:$0xff] %v5761_v0  ;;  %408 = vst [vmem:[#allocation2 + $0x98] sm:$0xff] %v5761_v0 }
 0x105   : > { %409 = vst [vmem:[#allocation2 + $0xa0] sm:$0xff] %v5761_v0  ;;  %410 = vst [vmem:[#allocation2 + $0xa8] sm:$0xff] %v5761_v0 }
 0x106   : > { %411 = vst [vmem:[#allocation2 + $0xb0] sm:$0xff] %v5761_v0  ;;  %412 = vst [vmem:[#allocation2 + $0xb8] sm:$0xff] %v5761_v0 }
 0x107   : > { %413 = vst [vmem:[#allocation2 + $0xc0] sm:$0xff] %v5761_v0  ;;  %414 = vst [vmem:[#allocation2 + $0xc8] sm:$0xff] %v5761_v0 }
 0x108   : > { %415 = vst [vmem:[#allocation2 + $0xd0] sm:$0xff] %v5761_v0  ;;  %416 = vst [vmem:[#allocation2 + $0xd8] sm:$0xff] %v5761_v0 }
 0x109   : > { %417 = vst [vmem:[#allocation2 + $0xe0] sm:$0xff] %v5761_v0  ;;  %418 = vst [vmem:[#allocation2 + $0xe8] sm:$0xff] %v5761_v0 }
 0x10a   : > { %419 = vst [vmem:[#allocation2 + $0xf0] sm:$0xff] %v5761_v0  ;;  %420 = vst [vmem:[#allocation2 + $0xf8] sm:$0xff] %v5761_v0 }
 0x10b   : > { %421 = vst [vmem:[#allocation2 + $0x100] sm:$0xff] %v5761_v0  ;;  %422 = vst [vmem:[#allocation2 + $0x108] sm:$0xff] %v5761_v0 }
 0x10c   : > { %423 = vst [vmem:[#allocation2 + $0x110] sm:$0xff] %v5761_v0  ;;  %424 = vst [vmem:[#allocation2 + $0x118] sm:$0xff] %v5761_v0 }
 0x10d   : > { %425 = vst [vmem:[#allocation2 + $0x120] sm:$0xff] %v5761_v0  ;;  %426 = vst [vmem:[#allocation2 + $0x128] sm:$0xff] %v5761_v0 }
 0x10e   : > { %427 = vst [vmem:[#allocation2 + $0x130] sm:$0xff] %v5761_v0  ;;  %428 = vst [vmem:[#allocation2 + $0x138] sm:$0xff] %v5761_v0 }
 0x10f   : > { %429 = vst [vmem:[#allocation2 + $0x140] sm:$0xff] %v5761_v0  ;;  %430 = vst [vmem:[#allocation2 + $0x148] sm:$0xff] %v5761_v0 }
 0x110   : > { %431 = vst [vmem:[#allocation2 + $0x150] sm:$0xff] %v5761_v0  ;;  %432 = vst [vmem:[#allocation2 + $0x158] sm:$0xff] %v5761_v0 }
 0x111   : > { %433 = vst [vmem:[#allocation2 + $0x160] sm:$0xff] %v5761_v0  ;;  %434 = vst [vmem:[#allocation2 + $0x168] sm:$0xff] %v5761_v0 }
 0x112   : > { %435 = vst [vmem:[#allocation2 + $0x170] sm:$0xff] %v5761_v0  ;;  %436 = vst [vmem:[#allocation2 + $0x178] sm:$0xff] %v5761_v0 }
 0x113   : > { %437 = vst [vmem:[#allocation2 + $0x180] sm:$0xff] %v5761_v0  ;;  %438 = vst [vmem:[#allocation2 + $0x188] sm:$0xff] %v5761_v0 }
 0x114   : > { %439 = vst [vmem:[#allocation2 + $0x190] sm:$0xff] %v5761_v0  ;;  %440 = vst [vmem:[#allocation2 + $0x198] sm:$0xff] %v5761_v0 }
 0x115   : > { %441 = vst [vmem:[#allocation2 + $0x1a0] sm:$0xff] %v5761_v0  ;;  %442 = vst [vmem:[#allocation2 + $0x1a8] sm:$0xff] %v5761_v0 }
 0x116   : > { %443 = vst [vmem:[#allocation2 + $0x1b0] sm:$0xff] %v5761_v0  ;;  %444 = vst [vmem:[#allocation2 + $0x1b8] sm:$0xff] %v5761_v0 }
 0x117   : > { %445 = vst [vmem:[#allocation2 + $0x1c0] sm:$0xff] %v5761_v0  ;;  %446 = vst [vmem:[#allocation2 + $0x1c8] sm:$0xff] %v5761_v0 }
 0x118   : > { %447 = vst [vmem:[#allocation2 + $0x1d0] sm:$0xff] %v5761_v0  ;;  %448 = vst [vmem:[#allocation2 + $0x1d8] sm:$0xff] %v5761_v0 }
 0x119   : > { %449 = vst [vmem:[#allocation2 + $0x1e0] sm:$0xff] %v5761_v0  ;;  %450 = vst [vmem:[#allocation2 + $0x1e8] sm:$0xff] %v5761_v0 }
 0x11a   : > { %451 = vst [vmem:[#allocation2 + $0x1f0] sm:$0xff] %v5761_v0  ;;  %452 = vst [vmem:[#allocation2 + $0x1f8] sm:$0xff] %v5761_v0 }
 0x11b PF: > { %s7392_s8 = sld [smem:[#allocation21_spill]]  ;;  %v6233_v1 = vld [vmem:[%s6135_s14 + $0x8] sm:$0xff]  ;;  %v6236_v2 = vld [vmem:[%s6135_s14 + $0x18] sm:$0xff]  ;;  %v5762_v3 = vmov 0   ;;  %v453_v36 = vld [vmem:[%s6135_s14] sm:$0xff] }
 0x11c   : > { %1418 = vmatprep.subr.bf16.mxu0 %v5762_v3  ;;  %1707 = vmatprep.subr.bf16.mxu1 %v5762_v3  ;;  %v582_v4 = vunpack.c.l.s8.bf16 %v6233_v1  ;;  %v584_v5 = vunpack.c.l.s8.bf16 %v6236_v2  ;;  %v455_v38 = vld [vmem:[%s6135_s14 + $0x10] sm:$0xff]  ;;  %v581_v41 = vunpack.c.l.s8.bf16 %v453_v36  ;;  %v590_v43 = vunpack.c.h.s8.bf16 %v6233_v1  ;;  %v462_v47 = vld [vmem:[%s6135_s14 + $0x48] sm:$0xff]  ;;  %v464_v49 = vld [vmem:[%s6135_s14 + $0x58] sm:$0xff] }
 0x11d   : > { %v583_v42 = vunpack.c.l.s8.bf16 %v455_v38  ;;  %v592_v45 = vunpack.c.h.s8.bf16 %v6236_v2  ;;  %v589_v50 = vunpack.c.h.s8.bf16 %v453_v36  ;;  %v591_v51 = vunpack.c.h.s8.bf16 %v455_v38  ;;  %v461_v56 = vld [vmem:[%s6135_s14 + $0x40] sm:$0xff]  ;;  %v463_v57 = vld [vmem:[%s6135_s14 + $0x50] sm:$0xff]  ;;  %v470_v2 = vld [vmem:[%s6135_s14 + $0x88] sm:$0xff] }
 0x11e   : > { %1450 = vmatprep.mubr.bf16.mxu0 %v582_v4  ;;  %1739 = vmatprep.mubr.bf16.mxu1 %v584_v5  ;;  %v598_v52 = vunpack.c.l.s8.bf16 %v462_v47  ;;  %v600_v53 = vunpack.c.l.s8.bf16 %v464_v49  ;;  %v597_v60 = vunpack.c.l.s8.bf16 %v461_v56  ;;  %v599_v61 = vunpack.c.l.s8.bf16 %v463_v57  ;;  %v472_v5 = vld [vmem:[%s6135_s14 + $0x98] sm:$0xff] }
 0x11f   : > { %v606_v62 = vunpack.c.h.s8.bf16 %v462_v47  ;;  %v608_v63 = vunpack.c.h.s8.bf16 %v464_v49  ;;  %v485_v47 = vld [vmem:[%s6135_s14 + $0x100] sm:$0xff] }
 0x120   : > { %v645_v49 = vunpack.c.l.s8.bf16 %v485_v47 }
 0x121   : > { %s4597_s20 = sshll.u32 %s7392_s8, 10  ;;  %p4663_p3 = scmp.ne.s32.totalorder %s7392_s8, 1 }
 0x122   : > { %s838_s21 = sshra.s32 %s4597_s20, 3 }
 0x123   : > { %s4598_s9 = sshll.u32 %s838_s21, 2 }
 0x124   : > { %s6242_s19 = scalar_lea.vmem [#allocation6], %s4598_s9 }
 0x125   : > { %v5182_v6 = vld [vmem:[%s6242_s19] sm:$0xff]   ;;  %v5184_v8 = vld [vmem:[%s6242_s19 + $0x8] sm:$0xff]   ;;  %v5186_v10 = vld [vmem:[%s6242_s19 + $0x10] sm:$0xff]  }
 0x126   : > { %v5183_v7 = vld [vmem:[%s6242_s19 + $0x80] sm:$0xff]   ;;  %1419 = vmatpush1.bf16.msra.mxu0 %v5182_v6  ;;  %v5185_v9 = vld [vmem:[%s6242_s19 + $0x88] sm:$0xff]   ;;  %v5187_v11 = vld [vmem:[%s6242_s19 + $0x90] sm:$0xff]  }
 0x127   : > { %1708 = vmatpush1.bf16.msra.mxu1 %v5183_v7  ;;  %1420 = vmatprep.subr.bf16.mxu0 %v5762_v3  ;;  %v5188_v12 = vld [vmem:[%s6242_s19 + $0x18] sm:$0xff]   ;;  %v5190_v14 = vld [vmem:[%s6242_s19 + $0x20] sm:$0xff]   ;;  %v5192_v16 = vld [vmem:[%s6242_s19 + $0x28] sm:$0xff]   ;;  %v605_v7 = vunpack.c.h.s8.bf16 %v461_v56 }
 0x128   : > { %1709 = vmatprep.subr.bf16.mxu1 %v5762_v3  ;;  %v5189_v13 = vld [vmem:[%s6242_s19 + $0x98] sm:$0xff]   ;;  %v5191_v15 = vld [vmem:[%s6242_s19 + $0xa0] sm:$0xff]   ;;  %v5193_v17 = vld [vmem:[%s6242_s19 + $0xa8] sm:$0xff]  }
 0x129   : > { %v5194_v18 = vld [vmem:[%s6242_s19 + $0x30] sm:$0xff]   ;;  %v5196_v20 = vld [vmem:[%s6242_s19 + $0x38] sm:$0xff]   ;;  %v5198_v22 = vld [vmem:[%s6242_s19 + $0x40] sm:$0xff]  }
 0x12a   : > { %1421 = vmatpush1.bf16.msra.mxu0 %v5184_v8  ;;  %v5195_v19 = vld [vmem:[%s6242_s19 + $0xb0] sm:$0xff]   ;;  %v5197_v21 = vld [vmem:[%s6242_s19 + $0xb8] sm:$0xff]   ;;  %v5199_v23 = vld [vmem:[%s6242_s19 + $0xc0] sm:$0xff]   ;;  %v607_v8 = vunpack.c.h.s8.bf16 %v463_v57  ;;  %v653_v57 = vunpack.c.h.s8.bf16 %v485_v47 }
 0x12b   : > { %1710 = vmatpush1.bf16.msra.mxu1 %v5185_v9  ;;  %1422 = vmatprep.subr.bf16.mxu0 %v5762_v3  ;;  %v5200_v24 = vld [vmem:[%s6242_s19 + $0x48] sm:$0xff]   ;;  %v5202_v26 = vld [vmem:[%s6242_s19 + $0x50] sm:$0xff]   ;;  %v5204_v28 = vld [vmem:[%s6242_s19 + $0x58] sm:$0xff]   ;;  %v614_v9 = vunpack.c.l.s8.bf16 %v470_v2 }
 0x12c   : > { %1711 = vmatprep.subr.bf16.mxu1 %v5762_v3  ;;  %v5201_v25 = vld [vmem:[%s6242_s19 + $0xc8] sm:$0xff]   ;;  %v5203_v27 = vld [vmem:[%s6242_s19 + $0xd0] sm:$0xff]   ;;  %v5205_v29 = vld [vmem:[%s6242_s19 + $0xd8] sm:$0xff]  }
 0x12d   : > { %v5206_v30 = vld [vmem:[%s6242_s19 + $0x60] sm:$0xff]   ;;  %v5208_v32 = vld [vmem:[%s6242_s19 + $0x68] sm:$0xff]   ;;  %v5210_v34 = vld [vmem:[%s6242_s19 + $0x70] sm:$0xff]  }
 0x12e   : > { %1423 = vmatpush1.bf16.msra.mxu0 %v5186_v10  ;;  %v5207_v31 = vld [vmem:[%s6242_s19 + $0xe0] sm:$0xff]   ;;  %v5209_v33 = vld [vmem:[%s6242_s19 + $0xe8] sm:$0xff]   ;;  %v5211_v35 = vld [vmem:[%s6242_s19 + $0xf0] sm:$0xff]   ;;  %v616_v10 = vunpack.c.l.s8.bf16 %v472_v5 }
 0x12f   : > { %1712 = vmatpush1.bf16.msra.mxu1 %v5187_v11  ;;  %1424 = vmatprep.subr.bf16.mxu0 %v5762_v3  ;;  %v5212_v37 = vld [vmem:[%s6242_s19 + $0x78] sm:$0xff]   ;;  %v5214_v40 = vld [vmem:[%s6242_s19 + $0x100] sm:$0xff]   ;;  %v5216_v46 = vld [vmem:[%s6242_s19 + $0x108] sm:$0xff]  }
 0x130   : > { %1713 = vmatprep.subr.bf16.mxu1 %v5762_v3  ;;  %v5213_v39 = vld [vmem:[%s6242_s19 + $0xf8] sm:$0xff]   ;;  %v5215_v44 = vld [vmem:[%s6242_s19 + $0x180] sm:$0xff]   ;;  %v5217_v48 = vld [vmem:[%s6242_s19 + $0x188] sm:$0xff]  }
 0x131   : > { %v5218_v54 = vld [vmem:[%s6242_s19 + $0x110] sm:$0xff]   ;;  %v5220_v58 = vld [vmem:[%s6242_s19 + $0x118] sm:$0xff]   ;;  %v5222_v0 = vld [vmem:[%s6242_s19 + $0x120] sm:$0xff]  }
 0x132   : > { %1425 = vmatpush1.bf16.msra.mxu0 %v5188_v12  ;;  %v5219_v55 = vld [vmem:[%s6242_s19 + $0x190] sm:$0xff]   ;;  %v5221_v59 = vld [vmem:[%s6242_s19 + $0x198] sm:$0xff]   ;;  %v5223_v1 = vld [vmem:[%s6242_s19 + $0x1a0] sm:$0xff]  }
 0x133   : > { %1714 = vmatpush1.bf16.msra.mxu1 %v5189_v13  ;;  %1426 = vmatprep.subr.bf16.mxu0 %v5762_v3  ;;  %v5224_v4 = vld [vmem:[%s6242_s19 + $0x128] sm:$0xff]   ;;  %v5226_v11 = vld [vmem:[%s6242_s19 + $0x130] sm:$0xff]   ;;  %v469_v13 = vld [vmem:[%s6135_s14 + $0x80] sm:$0xff] }
 0x134   : > { %1715 = vmatprep.subr.bf16.mxu1 %v5762_v3  ;;  %v5225_v6 = vld [vmem:[%s6242_s19 + $0x1a8] sm:$0xff]   ;;  %v5227_v12 = vld [vmem:[%s6242_s19 + $0x1b0] sm:$0xff]   ;;  %v496_v56 = vld [vmem:[%s6135_s14 + $0x158] sm:$0xff] }
 0x136   : > { %1427 = vmatpush1.bf16.msra.mxu0 %v5190_v14  ;;  %v471_v14 = vld [vmem:[%s6135_s14 + $0x90] sm:$0xff] }
 0x137   : > { %1716 = vmatpush1.bf16.msra.mxu1 %v5191_v15  ;;  %1428 = vmatprep.subr.bf16.mxu0 %v5762_v3  ;;  %v5228_v15 = vld [vmem:[%s6242_s19 + $0x138] sm:$0xff]  }
 0x138   : > { %1717 = vmatprep.subr.bf16.mxu1 %v5762_v3 }
 0x13a   : > { %1429 = vmatpush1.bf16.msra.mxu0 %v5192_v16  ;;  %v5229_v16 = vld [vmem:[%s6242_s19 + $0x1b8] sm:$0xff]  }
 0x13b   : > { %1718 = vmatpush1.bf16.msra.mxu1 %v5193_v17  ;;  %1430 = vmatprep.subr.bf16.mxu0 %v5762_v3  ;;  %v613_v17 = vunpack.c.l.s8.bf16 %v469_v13 }
 0x13c   : > { %1719 = vmatprep.subr.bf16.mxu1 %v5762_v3 }
 0x13e   : > { %1431 = vmatpush1.bf16.msra.mxu0 %v5194_v18  ;;  %v615_v18 = vunpack.c.l.s8.bf16 %v471_v14 }
 0x13f   : > { %1720 = vmatpush1.bf16.msra.mxu1 %v5195_v19  ;;  %1432 = vmatprep.subr.bf16.mxu0 %v5762_v3  ;;  %v622_v19 = vunpack.c.h.s8.bf16 %v470_v2  ;;  %v672_v2 = vunpack.c.h.s8.bf16 %v496_v56 }
 0x140   : > { %1721 = vmatprep.subr.bf16.mxu1 %v5762_v3 }
 0x142   : > { %1433 = vmatpush1.bf16.msra.mxu0 %v5196_v20  ;;  %v624_v20 = vunpack.c.h.s8.bf16 %v472_v5  ;;  %v502_v5 = vld [vmem:[%s6135_s14 + $0x188] sm:$0xff] }
 0x143   : > { %1722 = vmatpush1.bf16.msra.mxu1 %v5197_v21  ;;  %1434 = vmatprep.subr.bf16.mxu0 %v5762_v3  ;;  %v5230_v21 = vld [vmem:[%s6242_s19 + $0x140] sm:$0xff]  }
 0x144   : > { %1723 = vmatprep.subr.bf16.mxu1 %v5762_v3 }
 0x146   : > { %1435 = vmatpush1.bf16.msra.mxu0 %v5198_v22  ;;  %v5231_v22 = vld [vmem:[%s6242_s19 + $0x1c0] sm:$0xff]  }
 0x147   : > { %1724 = vmatpush1.bf16.msra.mxu1 %v5199_v23  ;;  %1436 = vmatprep.subr.bf16.mxu0 %v5762_v3  ;;  %v478_v23 = vld [vmem:[%s6135_s14 + $0xc8] sm:$0xff] }
 0x148   : > { %1725 = vmatprep.subr.bf16.mxu1 %v5762_v3 }
 0x14a   : > { %1437 = vmatpush1.bf16.msra.mxu0 %v5200_v24  ;;  %v5232_v24 = vld [vmem:[%s6242_s19 + $0x148] sm:$0xff]  }
 0x14b   : > { %1726 = vmatpush1.bf16.msra.mxu1 %v5201_v25  ;;  %1438 = vmatprep.subr.bf16.mxu0 %v5762_v3  ;;  %v480_v25 = vld [vmem:[%s6135_s14 + $0xd8] sm:$0xff] }
 0x14c   : > { %1727 = vmatprep.subr.bf16.mxu1 %v5762_v3  ;;  %v640_v38 = vunpack.c.h.s8.bf16 %v480_v25 }
 0x14e   : > { %1439 = vmatpush1.bf16.msra.mxu0 %v5202_v26  ;;  %v5233_v26 = vld [vmem:[%s6242_s19 + $0x1c8] sm:$0xff]  }
 0x14f   : > { %1728 = vmatpush1.bf16.msra.mxu1 %v5203_v27  ;;  %1440 = vmatprep.subr.bf16.mxu0 %v5762_v3  ;;  %v621_v27 = vunpack.c.h.s8.bf16 %v469_v13  ;;  %v503_v13 = vld [vmem:[%s6135_s14 + $0x190] sm:$0xff] }
 0x150   : > { %1729 = vmatprep.subr.bf16.mxu1 %v5762_v3 }
 0x152   : > { %1441 = vmatpush1.bf16.msra.mxu0 %v5204_v28  ;;  %v623_v28 = vunpack.c.h.s8.bf16 %v471_v14 }
 0x153   : > { %1730 = vmatpush1.bf16.msra.mxu1 %v5205_v29  ;;  %1442 = vmatprep.subr.bf16.mxu0 %v5762_v3  ;;  %v630_v29 = vunpack.c.l.s8.bf16 %v478_v23 }
 0x154   : > { %1731 = vmatprep.subr.bf16.mxu1 %v5762_v3 }
 0x156   : > { %1443 = vmatpush1.bf16.msra.mxu0 %v5206_v30  ;;  %v632_v30 = vunpack.c.l.s8.bf16 %v480_v25 }
 0x157   : > { %1732 = vmatpush1.bf16.msra.mxu1 %v5207_v31  ;;  %1444 = vmatprep.subr.bf16.mxu0 %v5762_v3  ;;  %v5234_v31 = vld [vmem:[%s6242_s19 + $0x150] sm:$0xff]  }
 0x158   : > { %1733 = vmatprep.subr.bf16.mxu1 %v5762_v3 }
 0x15a   : > { %1445 = vmatpush1.bf16.msra.mxu0 %v5208_v32  ;;  %v5235_v32 = vld [vmem:[%s6242_s19 + $0x1d0] sm:$0xff]  }
 0x15b   : > { %1734 = vmatpush1.bf16.msra.mxu1 %v5209_v33  ;;  %1446 = vmatprep.subr.bf16.mxu0 %v5762_v3  ;;  %v477_v33 = vld [vmem:[%s6135_s14 + $0xc0] sm:$0xff] }
 0x15c   : > { %1735 = vmatprep.subr.bf16.mxu1 %v5762_v3 }
 0x15e   : > { %1447 = vmatpush1.bf16.msra.mxu0 %v5210_v34  ;;  %v479_v34 = vld [vmem:[%s6135_s14 + $0xd0] sm:$0xff] }
 0x15f   : > { %1736 = vmatpush1.bf16.msra.mxu1 %v5211_v35  ;;  %1448 = vmatprep.subr.bf16.mxu0 %v5762_v3  ;;  %v629_v35 = vunpack.c.l.s8.bf16 %v477_v33  ;;  %v631_v36 = vunpack.c.l.s8.bf16 %v479_v34 }
 0x160   : > { %1737 = vmatprep.subr.bf16.mxu1 %v5762_v3 }
 0x162   : > { %1449 = vmatpush1.bf16.msra.mxu0 %v5212_v37  ;;  %v638_v37 = vunpack.c.h.s8.bf16 %v478_v23 }
 0x163   : > { %1738 = vmatpush1.bf16.msra.mxu1 %v5213_v39  ;;  %1996 = vmatprep.subr.bf16.mxu0 %v5762_v3  ;;  %v5236_v39 = vld [vmem:[%s6242_s19 + $0x158] sm:$0xff]  }
 0x164   : > { %2285 = vmatprep.subr.bf16.mxu1 %v5762_v3 }
 0x165   : > { %1451 = vmatmul.mubr.bf16.vlgmr.msra.gmra.mrb[0].mxu0 %v581_v41  ;;  %v486_v41 = vld [vmem:[%s6135_s14 + $0x108] sm:$0xff] }
 0x166   : > { %1740 = vmatmul.mubr.bf16.vlgmr.msra.gmra.mrb[0].mxu1 %v583_v42  ;;  %1997 = vmatpush1.bf16.msra.mxu0 %v5214_v40  ;;  %v5237_v40 = vld [vmem:[%s6242_s19 + $0x1d8] sm:$0xff]  }
 0x167   : > { %2286 = vmatpush1.bf16.msra.mxu1 %v5215_v44  ;;  %1458 = vmatprep.mubr.bf16.mxu0 %v590_v43  ;;  %v488_v42 = vld [vmem:[%s6135_s14 + $0x118] sm:$0xff]  ;;  %v637_v43 = vunpack.c.h.s8.bf16 %v477_v33  ;;  %v639_v44 = vunpack.c.h.s8.bf16 %v479_v34  ;;  %v518_v33 = vld [vmem:[%s6135_s14 + $0x208] sm:$0xff] }
 0x168   : > { %1747 = vmatprep.mubr.bf16.mxu1 %v592_v45  ;;  %1998 = vmatprep.subr.bf16.mxu0 %v5762_v3  ;;  %v646_v45 = vunpack.c.l.s8.bf16 %v486_v41 }
 0x169   : > { %2287 = vmatprep.subr.bf16.mxu1 %v5762_v3 }
 0x16a   : > { %1999 = vmatpush1.bf16.msra.mxu0 %v5216_v46  ;;  %v648_v46 = vunpack.c.l.s8.bf16 %v488_v42 }
 0x16b   : > { %2288 = vmatpush1.bf16.msra.mxu1 %v5217_v48  ;;  %2000 = vmatprep.subr.bf16.mxu0 %v5762_v3  ;;  %v487_v48 = vld [vmem:[%s6135_s14 + $0x110] sm:$0xff] }
 0x16c   : > { %2289 = vmatprep.subr.bf16.mxu1 %v5762_v3 }
 0x16d   : > { %1459 = vmatmul.mubr.bf16.gmra.mrb[4].mxu0 %v589_v50  ;;  %v647_v50 = vunpack.c.l.s8.bf16 %v487_v48 }
 0x16e   : > { %1748 = vmatmul.mubr.bf16.gmra.mrb[4].mxu1 %v591_v51  ;;  %1466 = vmatprep.mubr.bf16.mxu0 %v598_v52  ;;  %v654_v51 = vunpack.c.h.s8.bf16 %v486_v41  ;;  %v656_v52 = vunpack.c.h.s8.bf16 %v488_v42 }
 0x16f   : > { %1755 = vmatprep.mubr.bf16.mxu1 %v600_v53  ;;  %2001 = vmatpush1.bf16.msra.mxu0 %v5218_v54  ;;  %v5238_v53 = vld [vmem:[%s6242_s19 + $0x160] sm:$0xff]  }
 0x170   : > { %2290 = vmatpush1.bf16.msra.mxu1 %v5219_v55  ;;  %2002 = vmatprep.subr.bf16.mxu0 %v5762_v3  ;;  %v5239_v54 = vld [vmem:[%s6242_s19 + $0x1e0] sm:$0xff]   ;;  %v494_v55 = vld [vmem:[%s6135_s14 + $0x148] sm:$0xff] }
 0x171   : > { %2291 = vmatprep.subr.bf16.mxu1 %v5762_v3 }
 0x173   : > { %2003 = vmatpush1.bf16.msra.mxu0 %v5220_v58  ;;  %v655_v58 = vunpack.c.h.s8.bf16 %v487_v48 }
 0x174   : > { %2292 = vmatpush1.bf16.msra.mxu1 %v5221_v59  ;;  %2004 = vmatprep.subr.bf16.mxu0 %v5762_v3  ;;  %v662_v59 = vunpack.c.l.s8.bf16 %v494_v55 }
 0x175   : > { %1467 = vmatmul.mubr.bf16.gmra.mrb[8].mxu0 %v597_v60  ;;  %2293 = vmatprep.subr.bf16.mxu1 %v5762_v3  ;;  %v664_v60 = vunpack.c.l.s8.bf16 %v496_v56 }
 0x176   : > { %1756 = vmatmul.mubr.bf16.gmra.mrb[8].mxu1 %v599_v61  ;;  %1474 = vmatprep.mubr.bf16.mxu0 %v606_v62  ;;  %v493_v61 = vld [vmem:[%s6135_s14 + $0x140] sm:$0xff]  ;;  %v495_v62 = vld [vmem:[%s6135_s14 + $0x150] sm:$0xff] }
 0x177   : > { %1763 = vmatprep.mubr.bf16.mxu1 %v608_v63  ;;  %2005 = vmatpush1.bf16.msra.mxu0 %v5222_v0  ;;  %v661_v63 = vunpack.c.l.s8.bf16 %v493_v61  ;;  %v663_v0 = vunpack.c.l.s8.bf16 %v495_v62 }
 0x178   : > { %2294 = vmatpush1.bf16.msra.mxu1 %v5223_v1  ;;  %2006 = vmatprep.subr.bf16.mxu0 %v5762_v3  ;;  %v670_v1 = vunpack.c.h.s8.bf16 %v494_v55 }
 0x179   : > { %2295 = vmatprep.subr.bf16.mxu1 %v5762_v3 }
 0x17b   : > { %2007 = vmatpush1.bf16.msra.mxu0 %v5224_v4  ;;  %v5240_v4 = vld [vmem:[%s6242_s19 + $0x168] sm:$0xff]  }
 0x17c   : > { %2296 = vmatpush1.bf16.msra.mxu1 %v5225_v6  ;;  %2008 = vmatprep.subr.bf16.mxu0 %v5762_v3  ;;  %v504_v6 = vld [vmem:[%s6135_s14 + $0x198] sm:$0xff] }
 0x17d   : > { %1475 = vmatmul.mubr.bf16.gmra.mrb[12].mxu0 %v605_v7  ;;  %2297 = vmatprep.subr.bf16.mxu1 %v5762_v3  ;;  %v669_v7 = vunpack.c.h.s8.bf16 %v493_v61 }
 0x17e   : > { %1764 = vmatmul.mubr.bf16.gmra.mrb[12].mxu1 %v607_v8  ;;  %1482 = vmatprep.mubr.bf16.mxu0 %v614_v9  ;;  %v671_v8 = vunpack.c.h.s8.bf16 %v495_v62  ;;  %v678_v9 = vunpack.c.l.s8.bf16 %v502_v5 }
 0x17f   : > { %1771 = vmatprep.mubr.bf16.mxu1 %v616_v10  ;;  %2009 = vmatpush1.bf16.msra.mxu0 %v5226_v11  ;;  %v5241_v10 = vld [vmem:[%s6242_s19 + $0x1e8] sm:$0xff]   ;;  %v680_v11 = vunpack.c.l.s8.bf16 %v504_v6 }
 0x180   : > { %2298 = vmatpush1.bf16.msra.mxu1 %v5227_v12  ;;  %2010 = vmatprep.subr.bf16.mxu0 %v5762_v3  ;;  %v501_v12 = vld [vmem:[%s6135_s14 + $0x180] sm:$0xff] }
 0x181   : > { %2299 = vmatprep.subr.bf16.mxu1 %v5762_v3  ;;  %v677_v14 = vunpack.c.l.s8.bf16 %v501_v12 }
 0x183   : > { %2011 = vmatpush1.bf16.msra.mxu0 %v5228_v15  ;;  %v679_v15 = vunpack.c.l.s8.bf16 %v503_v13 }
 0x184   : > { %2300 = vmatpush1.bf16.msra.mxu1 %v5229_v16  ;;  %2012 = vmatprep.subr.bf16.mxu0 %v5762_v3  ;;  %v686_v16 = vunpack.c.h.s8.bf16 %v502_v5 }
 0x185   : > { %1483 = vmatmul.mubr.bf16.gmra.mrb[16].mxu0 %v613_v17  ;;  %2301 = vmatprep.subr.bf16.mxu1 %v5762_v3  ;;  %v688_v17 = vunpack.c.h.s8.bf16 %v504_v6  ;;  %v542_v6 = vld [vmem:[%s6135_s14 + $0x2c8] sm:$0xff] }
 0x186   : > { %1772 = vmatmul.mubr.bf16.gmra.mrb[16].mxu1 %v615_v18  ;;  %1490 = vmatprep.mubr.bf16.mxu0 %v622_v19  ;;  %v5242_v18 = vld [vmem:[%s6242_s19 + $0x170] sm:$0xff]   ;;  %v510_v19 = vld [vmem:[%s6135_s14 + $0x1c8] sm:$0xff] }
 0x187   : > { %1779 = vmatprep.mubr.bf16.mxu1 %v624_v20  ;;  %2013 = vmatpush1.bf16.msra.mxu0 %v5230_v21  ;;  %v512_v20 = vld [vmem:[%s6135_s14 + $0x1d8] sm:$0xff]  ;;  %v685_v21 = vunpack.c.h.s8.bf16 %v501_v12  ;;  %v694_v23 = vunpack.c.l.s8.bf16 %v510_v19  ;;  %v541_v12 = vld [vmem:[%s6135_s14 + $0x2c0] sm:$0xff] }
 0x188   : > { %2302 = vmatpush1.bf16.msra.mxu1 %v5231_v22  ;;  %2014 = vmatprep.subr.bf16.mxu0 %v5762_v3  ;;  %v687_v22 = vunpack.c.h.s8.bf16 %v503_v13  ;;  %v696_v25 = vunpack.c.l.s8.bf16 %v512_v20  ;;  %v543_v13 = vld [vmem:[%s6135_s14 + $0x2d0] sm:$0xff] }
 0x189   : > { %2303 = vmatprep.subr.bf16.mxu1 %v5762_v3 }
 0x18b   : > { %2015 = vmatpush1.bf16.msra.mxu0 %v5232_v24  ;;  %v5243_v24 = vld [vmem:[%s6242_s19 + $0x1f0] sm:$0xff]  }
 0x18c   : > { %2304 = vmatpush1.bf16.msra.mxu1 %v5233_v26  ;;  %2016 = vmatprep.subr.bf16.mxu0 %v5762_v3  ;;  %v509_v26 = vld [vmem:[%s6135_s14 + $0x1c0] sm:$0xff] }
 0x18d   : > { %1491 = vmatmul.mubr.bf16.gmra.mrb[20].mxu0 %v621_v27  ;;  %2305 = vmatprep.subr.bf16.mxu1 %v5762_v3  ;;  %v511_v27 = vld [vmem:[%s6135_s14 + $0x1d0] sm:$0xff]  ;;  %v701_v34 = vunpack.c.h.s8.bf16 %v509_v26 }
 0x18e   : > { %1780 = vmatmul.mubr.bf16.gmra.mrb[20].mxu1 %v623_v28  ;;  %1498 = vmatprep.mubr.bf16.mxu0 %v630_v29  ;;  %v693_v28 = vunpack.c.l.s8.bf16 %v509_v26  ;;  %v695_v29 = vunpack.c.l.s8.bf16 %v511_v27 }
 0x18f   : > { %1787 = vmatprep.mubr.bf16.mxu1 %v632_v30  ;;  %2017 = vmatpush1.bf16.msra.mxu0 %v5234_v31  ;;  %v702_v30 = vunpack.c.h.s8.bf16 %v510_v19  ;;  %v704_v31 = vunpack.c.h.s8.bf16 %v512_v20  ;;  %v552_v19 = vld [vmem:[%s6135_s14 + $0x318] sm:$0xff]  ;;  %v765_v20 = vunpack.c.h.s8.bf16 %v541_v12 }
 0x190   : > { %2306 = vmatpush1.bf16.msra.mxu1 %v5235_v32  ;;  %2018 = vmatprep.subr.bf16.mxu0 %v5762_v3  ;;  %v5244_v32 = vld [vmem:[%s6242_s19 + $0x178] sm:$0xff]  }
 0x191   : > { %2307 = vmatprep.subr.bf16.mxu1 %v5762_v3 }
 0x193   : > { %2019 = vmatpush1.bf16.msra.mxu0 %v5236_v39  ;;  %v517_v39 = vld [vmem:[%s6135_s14 + $0x200] sm:$0xff] }
 0x194   : > { %2308 = vmatpush1.bf16.msra.mxu1 %v5237_v40  ;;  %2020 = vmatprep.subr.bf16.mxu0 %v5762_v3  ;;  %v519_v40 = vld [vmem:[%s6135_s14 + $0x210] sm:$0xff]  ;;  %v709_v41 = vunpack.c.l.s8.bf16 %v517_v39  ;;  %v717_v47 = vunpack.c.h.s8.bf16 %v517_v39 }
 0x195   : > { %1499 = vmatmul.mubr.bf16.gmra.mrb[24].mxu0 %v629_v35  ;;  %2309 = vmatprep.subr.bf16.mxu1 %v5762_v3  ;;  %v703_v35 = vunpack.c.h.s8.bf16 %v511_v27  ;;  %v711_v42 = vunpack.c.l.s8.bf16 %v519_v40  ;;  %v719_v48 = vunpack.c.h.s8.bf16 %v519_v40 }
 0x196   : > { %1788 = vmatmul.mubr.bf16.gmra.mrb[24].mxu1 %v631_v36  ;;  %1506 = vmatprep.mubr.bf16.mxu0 %v638_v37  ;;  %v710_v36 = vunpack.c.l.s8.bf16 %v518_v33  ;;  %v5245_v37 = vld [vmem:[%s6242_s19 + $0x1f8] sm:$0xff]  }
 0x197   : > { %1795 = vmatprep.mubr.bf16.mxu1 %v640_v38  ;;  %2021 = vmatpush1.bf16.msra.mxu0 %v5238_v53 }
 0x198   : > { %2310 = vmatpush1.bf16.msra.mxu1 %v5239_v54  ;;  %2022 = vmatprep.subr.bf16.mxu0 %v5762_v3 }
 0x199   : > { %2311 = vmatprep.subr.bf16.mxu1 %v5762_v3 }
 0x19b   : > { %2023 = vmatpush1.bf16.msra.mxu0 %v5240_v4 }
 0x19c   : > { %2024 = vmatprep.subr.bf16.mxu0 %v5762_v3  ;;  %2312 = vmatpush1.bf16.msra.mxu1 %v5241_v10  ;;  %v758_v10 = vunpack.c.l.s8.bf16 %v542_v6 }
 0x19d   : > { %1507 = vmatmul.mubr.bf16.gmra.mrb[28].mxu0 %v637_v43  ;;  %2313 = vmatprep.subr.bf16.mxu1 %v5762_v3  ;;  %v718_v43 = vunpack.c.h.s8.bf16 %v518_v33 }
 0x19e   : > { %1796 = vmatmul.mubr.bf16.gmra.mrb[28].mxu1 %v639_v44  ;;  %1514 = vmatprep.mubr.bf16.mxu0 %v646_v45  ;;  %v526_v45 = vld [vmem:[%s6135_s14 + $0x248] sm:$0xff] }
 0x19f   : > { %1803 = vmatprep.mubr.bf16.mxu1 %v648_v46  ;;  %2025 = vmatpush1.bf16.msra.mxu0 %v5242_v18  ;;  %v528_v46 = vld [vmem:[%s6135_s14 + $0x258] sm:$0xff]  ;;  %v734_v55 = vunpack.c.h.s8.bf16 %v526_v45  ;;  %v550_v18 = vld [vmem:[%s6135_s14 + $0x308] sm:$0xff] }
 0x1a0   : > { %2026 = vmatprep.subr.bf16.mxu0 %v5762_v3  ;;  %2314 = vmatpush1.bf16.msra.mxu1 %v5243_v24  ;;  %v736_v56 = vunpack.c.h.s8.bf16 %v528_v46  ;;  %v549_v24 = vld [vmem:[%s6135_s14 + $0x300] sm:$0xff] }
 0x1a1   : > { %2315 = vmatprep.subr.bf16.mxu1 %v5762_v3  ;;  %v520_v3 = vld [vmem:[%s6135_s14 + $0x218] sm:$0xff]  ;;  %v773_v26 = vunpack.c.l.s8.bf16 %v549_v24 }
 0x1a2   : > { %v712_v38 = vunpack.c.l.s8.bf16 %v520_v3  ;;  %v720_v44 = vunpack.c.h.s8.bf16 %v520_v3 }
 0x1a3   : > { %2027 = vmatpush1.bf16.msra.mxu0 %v5244_v32  ;;  %v781_v32 = vunpack.c.h.s8.bf16 %v549_v24 }
 0x1a4   : > { %2316 = vmatpush1.bf16.msra.mxu1 %v5245_v37 }
 0x1a5   : > { %1515 = vmatmul.mubr.bf16.gmra.mrb[32].mxu0 %v645_v49  ;;  %v726_v49 = vunpack.c.l.s8.bf16 %v526_v45 }
 0x1a6   : > { %1804 = vmatmul.mubr.bf16.gmra.mrb[32].mxu1 %v647_v50  ;;  %1522 = vmatprep.mubr.bf16.mxu0 %v654_v51  ;;  %v728_v50 = vunpack.c.l.s8.bf16 %v528_v46  ;;  %v525_v51 = vld [vmem:[%s6135_s14 + $0x240] sm:$0xff] }
 0x1a7   : > { %1811 = vmatprep.mubr.bf16.mxu1 %v656_v52  ;;  %v527_v52 = vld [vmem:[%s6135_s14 + $0x250] sm:$0xff]  ;;  %v725_v53 = vunpack.c.l.s8.bf16 %v525_v51 }
 0x1a8   : > { %v727_v54 = vunpack.c.l.s8.bf16 %v527_v52 }
 0x1ad   : > { %1523 = vmatmul.mubr.bf16.gmra.mrb[36].mxu0 %v653_v57  ;;  %v534_v57 = vld [vmem:[%s6135_s14 + $0x288] sm:$0xff] }
 0x1ae   : > { %1812 = vmatmul.mubr.bf16.gmra.mrb[36].mxu1 %v655_v58  ;;  %1530 = vmatprep.mubr.bf16.mxu0 %v662_v59  ;;  %v536_v58 = vld [vmem:[%s6135_s14 + $0x298] sm:$0xff]  ;;  %v733_v59 = vunpack.c.h.s8.bf16 %v525_v51  ;;  %v742_v61 = vunpack.c.l.s8.bf16 %v534_v57  ;;  %v750_v4 = vunpack.c.h.s8.bf16 %v534_v57  ;;  %v565_v57 = vld [vmem:[%s6135_s14 + $0x380] sm:$0xff] }
 0x1af   : > { %1819 = vmatprep.mubr.bf16.mxu1 %v664_v60  ;;  %v735_v60 = vunpack.c.h.s8.bf16 %v527_v52  ;;  %v744_v62 = vunpack.c.l.s8.bf16 %v536_v58  ;;  %v752_v5 = vunpack.c.h.s8.bf16 %v536_v58  ;;  %v567_v58 = vld [vmem:[%s6135_s14 + $0x390] sm:$0xff] }
 0x1b5   : > { %1531 = vmatmul.mubr.bf16.gmra.mrb[40].mxu0 %v661_v63  ;;  %v533_v63 = vld [vmem:[%s6135_s14 + $0x280] sm:$0xff] }
 0x1b6   : > { %1820 = vmatmul.mubr.bf16.gmra.mrb[40].mxu1 %v663_v0  ;;  %1538 = vmatprep.mubr.bf16.mxu0 %v670_v1  ;;  %v535_v0 = vld [vmem:[%s6135_s14 + $0x290] sm:$0xff]  ;;  %v741_v1 = vunpack.c.l.s8.bf16 %v533_v63 }
 0x1b7   : > { %1827 = vmatprep.mubr.bf16.mxu1 %v672_v2  ;;  %v743_v2 = vunpack.c.l.s8.bf16 %v535_v0 }
 0x1bd   : > { %1539 = vmatmul.mubr.bf16.gmra.mrb[44].mxu0 %v669_v7  ;;  %v544_v7 = vld [vmem:[%s6135_s14 + $0x2d8] sm:$0xff] }
 0x1be   : > { %1828 = vmatmul.mubr.bf16.gmra.mrb[44].mxu1 %v671_v8  ;;  %1546 = vmatprep.mubr.bf16.mxu0 %v678_v9  ;;  %v749_v8 = vunpack.c.h.s8.bf16 %v533_v63  ;;  %v751_v9 = vunpack.c.h.s8.bf16 %v535_v0 }
 0x1bf   : > { %1835 = vmatprep.mubr.bf16.mxu1 %v680_v11  ;;  %v760_v11 = vunpack.c.l.s8.bf16 %v544_v7 }
 0x1c5   : > { %1547 = vmatmul.mubr.bf16.gmra.mrb[48].mxu0 %v677_v14  ;;  %v757_v14 = vunpack.c.l.s8.bf16 %v541_v12  ;;  %v576_v12 = vld [vmem:[%s6135_s14 + $0x3d8] sm:$0xff] }
 0x1c6   : > { %1836 = vmatmul.mubr.bf16.gmra.mrb[48].mxu1 %v679_v15  ;;  %1554 = vmatprep.mubr.bf16.mxu0 %v686_v16  ;;  %v759_v15 = vunpack.c.l.s8.bf16 %v543_v13  ;;  %v766_v16 = vunpack.c.h.s8.bf16 %v542_v6 }
 0x1c7   : > { %1843 = vmatprep.mubr.bf16.mxu1 %v688_v17  ;;  %v768_v17 = vunpack.c.h.s8.bf16 %v544_v7 }
 0x1cd   : > { %1555 = vmatmul.mubr.bf16.gmra.mrb[52].mxu0 %v685_v21  ;;  %v767_v21 = vunpack.c.h.s8.bf16 %v543_v13 }
 0x1ce   : > { %1844 = vmatmul.mubr.bf16.gmra.mrb[52].mxu1 %v687_v22  ;;  %1562 = vmatprep.mubr.bf16.mxu0 %v694_v23  ;;  %v774_v22 = vunpack.c.l.s8.bf16 %v550_v18  ;;  %v776_v23 = vunpack.c.l.s8.bf16 %v552_v19 }
 0x1cf   : > { %1851 = vmatprep.mubr.bf16.mxu1 %v696_v25  ;;  %v551_v25 = vld [vmem:[%s6135_s14 + $0x310] sm:$0xff] }
 0x1d0   : > { %v775_v27 = vunpack.c.l.s8.bf16 %v551_v25  ;;  %v783_v33 = vunpack.c.h.s8.bf16 %v551_v25 }
 0x1d5   : > { %1563 = vmatmul.mubr.bf16.gmra.mrb[56].mxu0 %v693_v28  ;;  %v782_v28 = vunpack.c.h.s8.bf16 %v550_v18 }
 0x1d6   : > { %1852 = vmatmul.mubr.bf16.gmra.mrb[56].mxu1 %v695_v29  ;;  %1570 = vmatprep.mubr.bf16.mxu0 %v702_v30  ;;  %v784_v29 = vunpack.c.h.s8.bf16 %v552_v19  ;;  %v558_v30 = vld [vmem:[%s6135_s14 + $0x348] sm:$0xff]  ;;  %v815_v19 = vunpack.c.h.s8.bf16 %v567_v58 }
 0x1d7   : > { %1859 = vmatprep.mubr.bf16.mxu1 %v704_v31  ;;  %v560_v31 = vld [vmem:[%s6135_s14 + $0x358] sm:$0xff]  ;;  %v790_v3 = vunpack.c.l.s8.bf16 %v558_v30  ;;  %v798_v39 = vunpack.c.h.s8.bf16 %v558_v30 }
 0x1d8   : > { %v800_v40 = vunpack.c.h.s8.bf16 %v560_v31 }
 0x1dd   : > { %1571 = vmatmul.mubr.bf16.gmra.mrb[60].mxu0 %v701_v34  ;;  %v792_v34 = vunpack.c.l.s8.bf16 %v560_v31 }
 0x1de   : > { %1860 = vmatmul.mubr.bf16.gmra.mrb[60].mxu1 %v703_v35  ;;  %1578 = vmatprep.mubr.bf16.mxu0 %v710_v36  ;;  %v557_v35 = vld [vmem:[%s6135_s14 + $0x340] sm:$0xff]  ;;  %v559_v36 = vld [vmem:[%s6135_s14 + $0x350] sm:$0xff] }
 0x1df   : > { %1867 = vmatprep.mubr.bf16.mxu1 %v712_v38  ;;  %v789_v37 = vunpack.c.l.s8.bf16 %v557_v35  ;;  %v791_v38 = vunpack.c.l.s8.bf16 %v559_v36  ;;  %v797_v46 = vunpack.c.h.s8.bf16 %v557_v35 }
 0x1e5   : > { %1579 = vmatmul.mubr.bf16.gmra.mrb[64].mxu0 %v709_v41  ;;  %v566_v41 = vld [vmem:[%s6135_s14 + $0x388] sm:$0xff] }
 0x1e6   : > { %1868 = vmatmul.mubr.bf16.gmra.mrb[64].mxu1 %v711_v42  ;;  %1586 = vmatprep.mubr.bf16.mxu0 %v718_v43  ;;  %v568_v43 = vld [vmem:[%s6135_s14 + $0x398] sm:$0xff]  ;;  %v806_v51 = vunpack.c.l.s8.bf16 %v566_v41 }
 0x1e7   : > { %1875 = vmatprep.mubr.bf16.mxu1 %v720_v44  ;;  %v816_v7 = vunpack.c.h.s8.bf16 %v568_v43 }
 0x1ed   : > { %1587 = vmatmul.mubr.bf16.gmra.mrb[68].mxu0 %v717_v47 }
 0x1ee   : > { %1876 = vmatmul.mubr.bf16.gmra.mrb[68].mxu1 %v719_v48  ;;  %1594 = vmatprep.mubr.bf16.mxu0 %v726_v49 }
 0x1ef   : > { %1883 = vmatprep.mubr.bf16.mxu1 %v728_v50  ;;  %v799_v50 = vunpack.c.h.s8.bf16 %v559_v36 }
 0x1f5   : > { %1595 = vmatmul.mubr.bf16.gmra.mrb[72].mxu0 %v725_v53 }
 0x1f6   : > { %1884 = vmatmul.mubr.bf16.gmra.mrb[72].mxu1 %v727_v54  ;;  %1602 = vmatprep.mubr.bf16.mxu0 %v734_v55  ;;  %v808_v54 = vunpack.c.l.s8.bf16 %v568_v43  ;;  %v460_v43 = vld [vmem:[%s6135_s14 + $0x38] sm:$0xff] }
 0x1f7   : > { %1891 = vmatprep.mubr.bf16.mxu1 %v736_v56 }
 0x1fd   : > { %1603 = vmatmul.mubr.bf16.gmra.mrb[76].mxu0 %v733_v59 }
 0x1fe   : > { %1892 = vmatmul.mubr.bf16.gmra.mrb[76].mxu1 %v735_v60  ;;  %1610 = vmatprep.mubr.bf16.mxu0 %v742_v61 }
 0x1ff   : > { %1899 = vmatprep.mubr.bf16.mxu1 %v744_v62  ;;  %v805_v62 = vunpack.c.l.s8.bf16 %v565_v57 }
 0x205   : > { %1611 = vmatmul.mubr.bf16.gmra.mrb[80].mxu0 %v741_v1 }
 0x206   : > { %1900 = vmatmul.mubr.bf16.gmra.mrb[80].mxu1 %v743_v2  ;;  %1618 = vmatprep.mubr.bf16.mxu0 %v750_v4  ;;  %v807_v2 = vunpack.c.l.s8.bf16 %v567_v58  ;;  %v814_v4 = vunpack.c.h.s8.bf16 %v566_v41  ;;  %v458_v41 = vld [vmem:[%s6135_s14 + $0x28] sm:$0xff] }
 0x207   : > { %1907 = vmatprep.mubr.bf16.mxu1 %v752_v5 }
 0x20d   : > { %1619 = vmatmul.mubr.bf16.gmra.mrb[84].mxu0 %v749_v8 }
 0x20e   : > { %1908 = vmatmul.mubr.bf16.gmra.mrb[84].mxu1 %v751_v9  ;;  %1626 = vmatprep.mubr.bf16.mxu0 %v758_v10  ;;  %v574_v10 = vld [vmem:[%s6135_s14 + $0x3c8] sm:$0xff] }
 0x20f   : > { %1915 = vmatprep.mubr.bf16.mxu1 %v760_v11  ;;  %v830_v35 = vunpack.c.h.s8.bf16 %v574_v10 }
 0x215   : > { %1627 = vmatmul.mubr.bf16.gmra.mrb[88].mxu0 %v757_v14 }
 0x216   : > { %1916 = vmatmul.mubr.bf16.gmra.mrb[88].mxu1 %v759_v15  ;;  %1634 = vmatprep.mubr.bf16.mxu0 %v766_v16  ;;  %v813_v15 = vunpack.c.h.s8.bf16 %v565_v57 }
 0x217   : > { %1923 = vmatprep.mubr.bf16.mxu1 %v768_v17 }
 0x21d   : > { %1635 = vmatmul.mubr.bf16.gmra.mrb[92].mxu0 %v765_v20  ;;  %v822_v20 = vunpack.c.l.s8.bf16 %v574_v10 }
 0x21e   : > { %1924 = vmatmul.mubr.bf16.gmra.mrb[92].mxu1 %v767_v21  ;;  %1642 = vmatprep.mubr.bf16.mxu0 %v774_v22 }
 0x21f   : > { %1931 = vmatprep.mubr.bf16.mxu1 %v776_v23  ;;  %v824_v23 = vunpack.c.l.s8.bf16 %v576_v12 }
 0x225   : > { %1643 = vmatmul.mubr.bf16.gmra.mrb[96].mxu0 %v773_v26  ;;  %v573_v26 = vld [vmem:[%s6135_s14 + $0x3c0] sm:$0xff] }
 0x226   : > { %1932 = vmatmul.mubr.bf16.gmra.mrb[96].mxu1 %v775_v27  ;;  %1650 = vmatprep.mubr.bf16.mxu0 %v782_v28  ;;  %v575_v27 = vld [vmem:[%s6135_s14 + $0x3d0] sm:$0xff]  ;;  %v821_v31 = vunpack.c.l.s8.bf16 %v573_v26 }
 0x227   : > { %1939 = vmatprep.mubr.bf16.mxu1 %v784_v29 }
 0x22d   : > { %1651 = vmatmul.mubr.bf16.gmra.mrb[100].mxu0 %v781_v32 }
 0x22e   : > { %1940 = vmatmul.mubr.bf16.gmra.mrb[100].mxu1 %v783_v33  ;;  %1658 = vmatprep.mubr.bf16.mxu0 %v790_v3 }
 0x22f   : > { %1947 = vmatprep.mubr.bf16.mxu1 %v792_v34  ;;  %v823_v34 = vunpack.c.l.s8.bf16 %v575_v27 }
 0x235   : > { %1659 = vmatmul.mubr.bf16.gmra.mrb[104].mxu0 %v789_v37 }
 0x236   : > { %1948 = vmatmul.mubr.bf16.gmra.mrb[104].mxu1 %v791_v38  ;;  %1666 = vmatprep.mubr.bf16.mxu0 %v798_v39  ;;  %v832_v38 = vunpack.c.h.s8.bf16 %v576_v12 }
 0x237   : > { %1955 = vmatprep.mubr.bf16.mxu1 %v800_v40 }
 0x238   : > { %v1452_v42 = vpop.f32.mrb[0].mxu0 }
 0x239   : > { %v1741_v44 = vpop.f32.mrb[0].mxu1  ;;  %v1454_v45 = vpop.f32.mrb[1].mxu0 }
 0x23a   : > { %v6428_v47 = vadd.f32 %v1741_v44, %v1452_v42  ;;  %v1743_v48 = vpop.f32.mrb[1].mxu1  ;;  %v1455_v49 = vpop.f32.mrb[2].mxu0 }
 0x23b   : > { %v1744_v52 = vpop.f32.mrb[2].mxu1  ;;  %v1457_v53 = vpop.f32.mrb[3].mxu0 }
 0x23c   : > { %v6430_v55 = vadd.f32 %v1744_v52, %v1455_v49  ;;  %v1746_v56 = vpop.f32.mrb[3].mxu1  ;;  %v586_v52 = vunpack.c.l.s8.bf16 %v458_v41 }
 0x23d   : > { %1667 = vmatmul.mubr.bf16.gmra.mrb[108].mxu0 %v797_v46  ;;  %v829_v46 = vunpack.c.h.s8.bf16 %v573_v26  ;;  %v588_v56 = vunpack.c.l.s8.bf16 %v460_v43 }
 0x23e   : > { %1956 = vmatmul.mubr.bf16.gmra.mrb[108].mxu1 %v799_v50  ;;  %1674 = vmatprep.mubr.bf16.mxu0 %v806_v51  ;;  %v831_v51 = vunpack.c.h.s8.bf16 %v575_v27 }
 0x23f   : > { %1963 = vmatprep.mubr.bf16.mxu1 %v808_v54 }
 0x240   : > { %v1460_v59 = vpop.f32.mrb[4].mxu0 }
 0x241   : > { %v1749_v60 = vpop.f32.mrb[4].mxu1  ;;  %v1462_v61 = vpop.f32.mrb[5].mxu0 }
 0x242   : > { %v6434_v63 = vadd.f32 %v1749_v60, %v1460_v59  ;;  %v1751_v0 = vpop.f32.mrb[5].mxu1  ;;  %v1463_v1 = vpop.f32.mrb[6].mxu0  ;;  %v457_v59 = vld [vmem:[%s6135_s14 + $0x20] sm:$0xff]  ;;  %v459_v60 = vld [vmem:[%s6135_s14 + $0x30] sm:$0xff] }
 0x243   : > { %v1752_v5 = vpop.f32.mrb[6].mxu1  ;;  %v1465_v6 = vpop.f32.mrb[7].mxu0 }
 0x244   : > { %v6436_v8 = vadd.f32 %v1752_v5, %v1463_v1  ;;  %v1754_v9 = vpop.f32.mrb[7].mxu1  ;;  %v585_v1 = vunpack.c.l.s8.bf16 %v457_v59  ;;  %v587_v6 = vunpack.c.l.s8.bf16 %v459_v60 }
 0x245   : > { %1675 = vmatmul.mubr.bf16.gmra.mrb[112].mxu0 %v805_v62 }
 0x246   : > { %1964 = vmatmul.mubr.bf16.gmra.mrb[112].mxu1 %v807_v2  ;;  %1682 = vmatprep.mubr.bf16.mxu0 %v814_v4 }
 0x247   : > { %1971 = vmatprep.mubr.bf16.mxu1 %v816_v7  ;;  %v594_v7 = vunpack.c.h.s8.bf16 %v458_v41 }
 0x248   : > { %v1468_v11 = vpop.f32.mrb[8].mxu0 }
 0x249   : > { %v1757_v13 = vpop.f32.mrb[8].mxu1  ;;  %v1470_v14 = vpop.f32.mrb[9].mxu0 }
 0x24a   : > { %v6440_v16 = vadd.f32 %v1757_v13, %v1468_v11  ;;  %v1759_v17 = vpop.f32.mrb[9].mxu1  ;;  %v1471_v18 = vpop.f32.mrb[10].mxu0  ;;  %v596_v11 = vunpack.c.h.s8.bf16 %v460_v43  ;;  %v466_v14 = vld [vmem:[%s6135_s14 + $0x68] sm:$0xff] }
 0x24b   : > { %v1760_v21 = vpop.f32.mrb[10].mxu1  ;;  %v1473_v22 = vpop.f32.mrb[11].mxu0  ;;  %v468_v17 = vld [vmem:[%s6135_s14 + $0x78] sm:$0xff]  ;;  %v602_v26 = vunpack.c.l.s8.bf16 %v466_v14  ;;  %v610_v43 = vunpack.c.h.s8.bf16 %v466_v14 }
 0x24c   : > { %v6442_v24 = vadd.f32 %v1760_v21, %v1471_v18  ;;  %v1762_v25 = vpop.f32.mrb[11].mxu1 }
 0x24d   : > { %1683 = vmatmul.mubr.bf16.gmra.mrb[116].mxu0 %v813_v15  ;;  %v595_v25 = vunpack.c.h.s8.bf16 %v459_v60 }
 0x24e   : > { %1972 = vmatmul.mubr.bf16.gmra.mrb[116].mxu1 %v815_v19  ;;  %1690 = vmatprep.mubr.bf16.mxu0 %v822_v20  ;;  %v593_v20 = vunpack.c.h.s8.bf16 %v457_v59 }
 0x24f   : > { %1979 = vmatprep.mubr.bf16.mxu1 %v824_v23 }
 0x250   : > { %v1476_v28 = vpop.f32.mrb[12].mxu0 }
 0x251   : > { %v1765_v29 = vpop.f32.mrb[12].mxu1  ;;  %v1478_v30 = vpop.f32.mrb[13].mxu0 }
 0x252   : > { %v6446_v32 = vadd.f32 %v1765_v29, %v1476_v28  ;;  %v1767_v33 = vpop.f32.mrb[13].mxu1  ;;  %v1479_v3 = vpop.f32.mrb[14].mxu0  ;;  %v604_v29 = vunpack.c.l.s8.bf16 %v468_v17 }
 0x253   : > { %v1768_v36 = vpop.f32.mrb[14].mxu1  ;;  %v1481_v37 = vpop.f32.mrb[15].mxu0  ;;  %v465_v33 = vld [vmem:[%s6135_s14 + $0x60] sm:$0xff] }
 0x254   : > { %v6448_v39 = vadd.f32 %v1768_v36, %v1479_v3  ;;  %v1770_v40 = vpop.f32.mrb[15].mxu1  ;;  %v467_v3 = vld [vmem:[%s6135_s14 + $0x70] sm:$0xff]  ;;  %v601_v37 = vunpack.c.l.s8.bf16 %v465_v33 }
 0x255   : > { %1691 = vmatmul.mubr.bf16.gmra.mrb[120].mxu0 %v821_v31 }
 0x256   : > { %1980 = vmatmul.mubr.bf16.gmra.mrb[120].mxu1 %v823_v34  ;;  %1698 = vmatprep.mubr.bf16.mxu0 %v830_v35 }
 0x257   : > { %1987 = vmatprep.mubr.bf16.mxu1 %v832_v38 }
 0x258   : > { %v1484_v42 = vpop.f32.mrb[16].mxu0 }
 0x259   : > { %v1773_v44 = vpop.f32.mrb[16].mxu1  ;;  %v1486_v45 = vpop.f32.mrb[17].mxu0 }
 0x25a   : > { %v6452_v48 = vadd.f32 %v1773_v44, %v1484_v42  ;;  %v1775_v49 = vpop.f32.mrb[17].mxu1  ;;  %v1487_v50 = vpop.f32.mrb[18].mxu0  ;;  %v603_v42 = vunpack.c.l.s8.bf16 %v467_v3 }
 0x25b   : > { %v1776_v53 = vpop.f32.mrb[18].mxu1  ;;  %v1489_v54 = vpop.f32.mrb[19].mxu0 }
 0x25c   : > { %v6454_v57 = vadd.f32 %v1776_v53, %v1487_v50  ;;  %v1778_v58 = vpop.f32.mrb[19].mxu1  ;;  %v476_v53 = vld [vmem:[%s6135_s14 + $0xb8] sm:$0xff] }
 0x25d   : > { %1699 = vmatmul.mubr.bf16.gmra.mrb[124].mxu0 %v829_v46  ;;  %v612_v46 = vunpack.c.h.s8.bf16 %v468_v17  ;;  %v609_v58 = vunpack.c.h.s8.bf16 %v465_v33  ;;  %v484_v33 = vld [vmem:[%s6135_s14 + $0xf8] sm:$0xff] }
 0x25e   : > { %1988 = vmatmul.mubr.bf16.gmra.mrb[124].mxu1 %v831_v51  ;;  %2028 = vmatprep.mubr.bf16.mxu0 %v586_v52  ;;  %v474_v51 = vld [vmem:[%s6135_s14 + $0xa8] sm:$0xff] }
 0x25f   : > { %2317 = vmatprep.mubr.bf16.mxu1 %v588_v56 }
 0x260   : > { %v1492_v61 = vpop.f32.mrb[20].mxu0 }
 0x261   : > { %v1781_v62 = vpop.f32.mrb[20].mxu1  ;;  %v1494_v0 = vpop.f32.mrb[21].mxu0 }
 0x262   : > { %v6458_v2 = vadd.f32 %v1781_v62, %v1492_v61  ;;  %v1783_v4 = vpop.f32.mrb[21].mxu1  ;;  %v1495_v5 = vpop.f32.mrb[22].mxu0  ;;  %v611_v62 = vunpack.c.h.s8.bf16 %v467_v3  ;;  %v618_v0 = vunpack.c.l.s8.bf16 %v474_v51 }
 0x263   : > { %v1784_v9 = vpop.f32.mrb[22].mxu1  ;;  %v1497_v10 = vpop.f32.mrb[23].mxu0 }
 0x264   : > { %v6460_v12 = vadd.f32 %v1784_v9, %v1495_v5  ;;  %v1786_v13 = vpop.f32.mrb[23].mxu1  ;;  %v620_v5 = vunpack.c.l.s8.bf16 %v476_v53  ;;  %v473_v9 = vld [vmem:[%s6135_s14 + $0xa0] sm:$0xff]  ;;  %v475_v10 = vld [vmem:[%s6135_s14 + $0xb0] sm:$0xff] }
 0x265   : > { %2029 = vmatmul.mubr.bf16.vlgmr.msra.gmra.mrb[128].mxu0 %v585_v1 }
 0x266   : > { %2318 = vmatmul.mubr.bf16.vlgmr.msra.gmra.mrb[128].mxu1 %v587_v6  ;;  %2036 = vmatprep.mubr.bf16.mxu0 %v594_v7 }
 0x267   : > { %2325 = vmatprep.mubr.bf16.mxu1 %v596_v11 }
 0x268   : > { %v1500_v15 = vpop.f32.mrb[24].mxu0 }
 0x269   : > { %v1789_v18 = vpop.f32.mrb[24].mxu1  ;;  %v1502_v19 = vpop.f32.mrb[25].mxu0 }
 0x26a   : > { %v6464_v21 = vadd.f32 %v1789_v18, %v1500_v15  ;;  %v1791_v22 = vpop.f32.mrb[25].mxu1  ;;  %v1503_v23 = vpop.f32.mrb[26].mxu0  ;;  %v617_v15 = vunpack.c.l.s8.bf16 %v473_v9 }
 0x26b   : > { %v1792_v27 = vpop.f32.mrb[26].mxu1  ;;  %v1505_v28 = vpop.f32.mrb[27].mxu0  ;;  %v626_v22 = vunpack.c.h.s8.bf16 %v474_v51  ;;  %v481_v51 = vld [vmem:[%s6135_s14 + $0xe0] sm:$0xff] }
 0x26c   : > { %v6466_v30 = vadd.f32 %v1792_v27, %v1503_v23  ;;  %v1794_v31 = vpop.f32.mrb[27].mxu1 }
 0x26d   : > { %2037 = vmatmul.mubr.bf16.gmra.mrb[132].mxu0 %v593_v20  ;;  %v619_v20 = vunpack.c.l.s8.bf16 %v475_v10 }
 0x26e   : > { %2326 = vmatmul.mubr.bf16.gmra.mrb[132].mxu1 %v595_v25  ;;  %2044 = vmatprep.mubr.bf16.mxu0 %v602_v26  ;;  %v628_v26 = vunpack.c.h.s8.bf16 %v476_v53 }
 0x26f   : > { %2333 = vmatprep.mubr.bf16.mxu1 %v604_v29  ;;  %v482_v29 = vld [vmem:[%s6135_s14 + $0xe8] sm:$0xff] }
 0x270   : > { %v1508_v34 = vpop.f32.mrb[28].mxu0 }
 0x271   : > { %v1797_v35 = vpop.f32.mrb[28].mxu1  ;;  %v1510_v36 = vpop.f32.mrb[29].mxu0 }
 0x272   : > { %v6470_v38 = vadd.f32 %v1797_v35, %v1508_v34  ;;  %v1799_v40 = vpop.f32.mrb[29].mxu1  ;;  %v1511_v41 = vpop.f32.mrb[30].mxu0  ;;  %v625_v35 = vunpack.c.h.s8.bf16 %v473_v9 }
 0x273   : > { %v1800_v44 = vpop.f32.mrb[30].mxu1  ;;  %v1513_v45 = vpop.f32.mrb[31].mxu0 }
 0x274   : > { %v6472_v49 = vadd.f32 %v1800_v44, %v1511_v41  ;;  %v1802_v50 = vpop.f32.mrb[31].mxu1  ;;  %v627_v41 = vunpack.c.h.s8.bf16 %v475_v10  ;;  %v636_v45 = vunpack.c.l.s8.bf16 %v484_v33 }
 0x275   : > { %2045 = vmatmul.mubr.bf16.gmra.mrb[136].mxu0 %v601_v37 }
 0x276   : > { %2334 = vmatmul.mubr.bf16.gmra.mrb[136].mxu1 %v603_v42  ;;  %2052 = vmatprep.mubr.bf16.mxu0 %v610_v43  ;;  %v634_v42 = vunpack.c.l.s8.bf16 %v482_v29 }
 0x277   : > { %2341 = vmatprep.mubr.bf16.mxu1 %v612_v46 }
 0x278   : > { %v1516_v52 = vpop.f32.mrb[32].mxu0 }
 0x279   : > { %v1805_v54 = vpop.f32.mrb[32].mxu1  ;;  %v1518_v56 = vpop.f32.mrb[33].mxu0 }
 0x27a   : > { %v6476_v59 = vadd.f32 %v1805_v54, %v1516_v52  ;;  %v1807_v60 = vpop.f32.mrb[33].mxu1  ;;  %v1519_v61 = vpop.f32.mrb[34].mxu0  ;;  %v483_v52 = vld [vmem:[%s6135_s14 + $0xf0] sm:$0xff] }
 0x27b   : > { %v1808_v1 = vpop.f32.mrb[34].mxu1  ;;  %v1521_v4 = vpop.f32.mrb[35].mxu0 }
 0x27c   : > { %v6478_v6 = vadd.f32 %v1808_v1, %v1519_v61  ;;  %v1810_v7 = vpop.f32.mrb[35].mxu1  ;;  %v642_v1 = vunpack.c.h.s8.bf16 %v482_v29 }
 0x27d   : > { %2053 = vmatmul.mubr.bf16.gmra.mrb[140].mxu0 %v609_v58  ;;  %v633_v58 = vunpack.c.l.s8.bf16 %v481_v51  ;;  %v644_v7 = vunpack.c.h.s8.bf16 %v484_v33 }
 0x27e   : > { %2342 = vmatmul.mubr.bf16.gmra.mrb[140].mxu1 %v611_v62  ;;  %2060 = vmatprep.mubr.bf16.mxu0 %v618_v0  ;;  %v635_v0 = vunpack.c.l.s8.bf16 %v483_v52 }
 0x27f   : > { %2349 = vmatprep.mubr.bf16.mxu1 %v620_v5 }
 0x280   : > { %v1524_v11 = vpop.f32.mrb[36].mxu0 }
 0x281   : > { %v1813_v13 = vpop.f32.mrb[36].mxu1  ;;  %v1526_v14 = vpop.f32.mrb[37].mxu0 }
 0x282   : > { %v6482_v17 = vadd.f32 %v1813_v13, %v1524_v11  ;;  %v1815_v18 = vpop.f32.mrb[37].mxu1  ;;  %v1527_v19 = vpop.f32.mrb[38].mxu0  ;;  %v490_v11 = vld [vmem:[%s6135_s14 + $0x128] sm:$0xff]  ;;  %v492_v14 = vld [vmem:[%s6135_s14 + $0x138] sm:$0xff] }
 0x283   : > { %v1816_v23 = vpop.f32.mrb[38].mxu1  ;;  %v1529_v25 = vpop.f32.mrb[39].mxu0 }
 0x284   : > { %v6484_v27 = vadd.f32 %v1816_v23, %v1527_v19  ;;  %v1818_v28 = vpop.f32.mrb[39].mxu1  ;;  %v641_v19 = vunpack.c.h.s8.bf16 %v481_v51  ;;  %v643_v25 = vunpack.c.h.s8.bf16 %v483_v52  ;;  %v658_v51 = vunpack.c.h.s8.bf16 %v490_v11 }
 0x285   : > { %2061 = vmatmul.mubr.bf16.gmra.mrb[144].mxu0 %v617_v15 }
 0x286   : > { %2350 = vmatmul.mubr.bf16.gmra.mrb[144].mxu1 %v619_v20  ;;  %2068 = vmatprep.mubr.bf16.mxu0 %v626_v22 }
 0x287   : > { %2357 = vmatprep.mubr.bf16.mxu1 %v628_v26  ;;  %v650_v26 = vunpack.c.l.s8.bf16 %v490_v11 }
 0x288   : > { %v1532_v31 = vpop.f32.mrb[40].mxu0 }
 0x289   : > { %v1821_v3 = vpop.f32.mrb[40].mxu1  ;;  %v1534_v34 = vpop.f32.mrb[41].mxu0 }
 0x28a   : > { %v6488_v36 = vadd.f32 %v1821_v3, %v1532_v31  ;;  %v1823_v37 = vpop.f32.mrb[41].mxu1  ;;  %v1535_v40 = vpop.f32.mrb[42].mxu0  ;;  %v652_v31 = vunpack.c.l.s8.bf16 %v492_v14  ;;  %v489_v34 = vld [vmem:[%s6135_s14 + $0x120] sm:$0xff] }
 0x28b   : > { %v1824_v43 = vpop.f32.mrb[42].mxu1  ;;  %v1537_v44 = vpop.f32.mrb[43].mxu0 }
 0x28c   : > { %v6490_v46 = vadd.f32 %v1824_v43, %v1535_v40  ;;  %v1826_v50 = vpop.f32.mrb[43].mxu1 }
 0x28d   : > { %2069 = vmatmul.mubr.bf16.gmra.mrb[148].mxu0 %v625_v35  ;;  %v491_v35 = vld [vmem:[%s6135_s14 + $0x130] sm:$0xff] }
 0x28e   : > { %2358 = vmatmul.mubr.bf16.gmra.mrb[148].mxu1 %v627_v41  ;;  %2076 = vmatprep.mubr.bf16.mxu0 %v634_v42  ;;  %v649_v42 = vunpack.c.l.s8.bf16 %v489_v34  ;;  %v651_v50 = vunpack.c.l.s8.bf16 %v491_v35 }
 0x28f   : > { %2365 = vmatprep.mubr.bf16.mxu1 %v636_v45 }
 0x290   : > { %v1540_v53 = vpop.f32.mrb[44].mxu0 }
 0x291   : > { %v1829_v54 = vpop.f32.mrb[44].mxu1  ;;  %v1542_v56 = vpop.f32.mrb[45].mxu0 }
 0x292   : > { %v6494_v60 = vadd.f32 %v1829_v54, %v1540_v53  ;;  %v1831_v61 = vpop.f32.mrb[45].mxu1  ;;  %v1543_v62 = vpop.f32.mrb[46].mxu0  ;;  %v660_v54 = vunpack.c.h.s8.bf16 %v492_v14 }
 0x293   : > { %v1832_v4 = vpop.f32.mrb[46].mxu1  ;;  %v1545_v5 = vpop.f32.mrb[47].mxu0  ;;  %v498_v61 = vld [vmem:[%s6135_s14 + $0x168] sm:$0xff] }
 0x294   : > { %v6496_v9 = vadd.f32 %v1832_v4, %v1543_v62  ;;  %v1834_v10 = vpop.f32.mrb[47].mxu1  ;;  %v657_v5 = vunpack.c.h.s8.bf16 %v489_v34  ;;  %v666_v14 = vunpack.c.l.s8.bf16 %v498_v61 }
 0x295   : > { %2077 = vmatmul.mubr.bf16.gmra.mrb[152].mxu0 %v633_v58 }
 0x296   : > { %2366 = vmatmul.mubr.bf16.gmra.mrb[152].mxu1 %v635_v0  ;;  %2084 = vmatprep.mubr.bf16.mxu0 %v642_v1  ;;  %v500_v0 = vld [vmem:[%s6135_s14 + $0x178] sm:$0xff] }
 0x297   : > { %2373 = vmatprep.mubr.bf16.mxu1 %v644_v7 }
 0x298   : > { %v1548_v13 = vpop.f32.mrb[48].mxu0 }
 0x299   : > { %v1837_v15 = vpop.f32.mrb[48].mxu1  ;;  %v1550_v18 = vpop.f32.mrb[49].mxu0 }
 0x29a   : > { %v6500_v20 = vadd.f32 %v1837_v15, %v1548_v13  ;;  %v1839_v22 = vpop.f32.mrb[49].mxu1  ;;  %v1551_v23 = vpop.f32.mrb[50].mxu0  ;;  %v659_v13 = vunpack.c.h.s8.bf16 %v491_v35 }
 0x29b   : > { %v1840_v28 = vpop.f32.mrb[50].mxu1  ;;  %v1553_v29 = vpop.f32.mrb[51].mxu0 }
 0x29c   : > { %v6502_v33 = vadd.f32 %v1840_v28, %v1551_v23  ;;  %v1842_v3 = vpop.f32.mrb[51].mxu1 }
 0x29d   : > { %2085 = vmatmul.mubr.bf16.gmra.mrb[156].mxu0 %v641_v19  ;;  %v668_v19 = vunpack.c.l.s8.bf16 %v500_v0 }
 0x29e   : > { %2374 = vmatmul.mubr.bf16.gmra.mrb[156].mxu1 %v643_v25  ;;  %2092 = vmatprep.mubr.bf16.mxu0 %v650_v26  ;;  %v497_v25 = vld [vmem:[%s6135_s14 + $0x160] sm:$0xff]  ;;  %v499_v26 = vld [vmem:[%s6135_s14 + $0x170] sm:$0xff] }
 0x29f   : > { %2381 = vmatprep.mubr.bf16.mxu1 %v652_v31  ;;  %v665_v3 = vunpack.c.l.s8.bf16 %v497_v25 }
 0x2a0   : > { %v1556_v37 = vpop.f32.mrb[52].mxu0 }
 0x2a1   : > { %v1845_v40 = vpop.f32.mrb[52].mxu1  ;;  %v1558_v41 = vpop.f32.mrb[53].mxu0 }
 0x2a2   : > { %v6506_v43 = vadd.f32 %v1845_v40, %v1556_v37  ;;  %v1847_v44 = vpop.f32.mrb[53].mxu1  ;;  %v1559_v45 = vpop.f32.mrb[54].mxu0  ;;  %v667_v40 = vunpack.c.l.s8.bf16 %v499_v26  ;;  %v674_v41 = vunpack.c.h.s8.bf16 %v498_v61 }
 0x2a3   : > { %v1848_v52 = vpop.f32.mrb[54].mxu1  ;;  %v1561_v53 = vpop.f32.mrb[55].mxu0 }
 0x2a4   : > { %v6508_v56 = vadd.f32 %v1848_v52, %v1559_v45  ;;  %v1850_v58 = vpop.f32.mrb[55].mxu1  ;;  %v676_v45 = vunpack.c.h.s8.bf16 %v500_v0  ;;  %v506_v52 = vld [vmem:[%s6135_s14 + $0x1a8] sm:$0xff]  ;;  %v675_v0 = vunpack.c.h.s8.bf16 %v499_v26 }
 0x2a5   : > { %2093 = vmatmul.mubr.bf16.gmra.mrb[160].mxu0 %v649_v42 }
 0x2a6   : > { %2382 = vmatmul.mubr.bf16.gmra.mrb[160].mxu1 %v651_v50  ;;  %2100 = vmatprep.mubr.bf16.mxu0 %v658_v51 }
 0x2a7   : > { %2389 = vmatprep.mubr.bf16.mxu1 %v660_v54  ;;  %v508_v54 = vld [vmem:[%s6135_s14 + $0x1b8] sm:$0xff] }
 0x2a8   : > { %v1564_v62 = vpop.f32.mrb[56].mxu0 }
 0x2a9   : > { %v1853_v1 = vpop.f32.mrb[56].mxu1  ;;  %v1566_v4 = vpop.f32.mrb[57].mxu0 }
 0x2aa   : > { %v6512_v7 = vadd.f32 %v1853_v1, %v1564_v62  ;;  %v1855_v10 = vpop.f32.mrb[57].mxu1  ;;  %v1567_v11 = vpop.f32.mrb[58].mxu0  ;;  %v673_v1 = vunpack.c.h.s8.bf16 %v497_v25 }
 0x2ab   : > { %v1856_v15 = vpop.f32.mrb[58].mxu1  ;;  %v1569_v18 = vpop.f32.mrb[59].mxu0  ;;  %v682_v10 = vunpack.c.l.s8.bf16 %v506_v52 }
 0x2ac   : > { %v6514_v22 = vadd.f32 %v1856_v15, %v1567_v11  ;;  %v1858_v23 = vpop.f32.mrb[59].mxu1 }
 0x2ad   : > { %2101 = vmatmul.mubr.bf16.gmra.mrb[164].mxu0 %v657_v5  ;;  %v507_v23 = vld [vmem:[%s6135_s14 + $0x1b0] sm:$0xff] }
 0x2ae   : > { %2390 = vmatmul.mubr.bf16.gmra.mrb[164].mxu1 %v659_v13  ;;  %2108 = vmatprep.mubr.bf16.mxu0 %v666_v14  ;;  %v684_v14 = vunpack.c.l.s8.bf16 %v508_v54 }
 0x2af   : > { %2397 = vmatprep.mubr.bf16.mxu1 %v668_v19  ;;  %v505_v19 = vld [vmem:[%s6135_s14 + $0x1a0] sm:$0xff] }
 0x2b0   : > { %v1572_v28 = vpop.f32.mrb[60].mxu0 }
 0x2b1   : > { %v1861_v29 = vpop.f32.mrb[60].mxu1  ;;  %v1574_v31 = vpop.f32.mrb[61].mxu0 }
 0x2b2   : > { %v6518_v34 = vadd.f32 %v1861_v29, %v1572_v28  ;;  %v1863_v35 = vpop.f32.mrb[61].mxu1  ;;  %v1575_v37 = vpop.f32.mrb[62].mxu0  ;;  %v681_v31 = vunpack.c.l.s8.bf16 %v505_v19 }
 0x2b3   : > { %v1864_v42 = vpop.f32.mrb[62].mxu1  ;;  %v1577_v44 = vpop.f32.mrb[63].mxu0 }
 0x2b4   : > { %v6520_v50 = vadd.f32 %v1864_v42, %v1575_v37  ;;  %v1866_v51 = vpop.f32.mrb[63].mxu1  ;;  %v683_v37 = vunpack.c.l.s8.bf16 %v507_v23  ;;  %v692_v44 = vunpack.c.h.s8.bf16 %v508_v54  ;;  %v691_v54 = vunpack.c.h.s8.bf16 %v507_v23 }
 0x2b5   : > { %2109 = vmatmul.mubr.bf16.gmra.mrb[168].mxu0 %v665_v3 }
 0x2b6   : > { %2398 = vmatmul.mubr.bf16.gmra.mrb[168].mxu1 %v667_v40  ;;  %2116 = vmatprep.mubr.bf16.mxu0 %v674_v41  ;;  %v690_v40 = vunpack.c.h.s8.bf16 %v506_v52 }
 0x2b7   : > { %2405 = vmatprep.mubr.bf16.mxu1 %v676_v45 }
 0x2b8   : > { %v1580_v53 = vpop.f32.mrb[64].mxu0 }
 0x2b9   : > { %v1869_v58 = vpop.f32.mrb[64].mxu1  ;;  %v1582_v62 = vpop.f32.mrb[65].mxu0 }
 0x2ba   : > { %v6524_v4 = vadd.f32 %v1869_v58, %v1580_v53  ;;  %v1871_v61 = vpop.f32.mrb[65].mxu1  ;;  %v1583_v5 = vpop.f32.mrb[66].mxu0  ;;  %v514_v53 = vld [vmem:[%s6135_s14 + $0x1e8] sm:$0xff]  ;;  %v516_v62 = vld [vmem:[%s6135_s14 + $0x1f8] sm:$0xff] }
 0x2bb   : > { %v1872_v11 = vpop.f32.mrb[66].mxu1  ;;  %v1585_v13 = vpop.f32.mrb[67].mxu0 }
 0x2bc   : > { %v6526_v15 = vadd.f32 %v1872_v11, %v1583_v5  ;;  %v1874_v18 = vpop.f32.mrb[67].mxu1  ;;  %v689_v5 = vunpack.c.h.s8.bf16 %v505_v19  ;;  %v698_v11 = vunpack.c.l.s8.bf16 %v514_v53 }
 0x2bd   : > { %2117 = vmatmul.mubr.bf16.gmra.mrb[172].mxu0 %v673_v1  ;;  %v700_v18 = vunpack.c.l.s8.bf16 %v516_v62 }
 0x2be   : > { %2406 = vmatmul.mubr.bf16.gmra.mrb[172].mxu1 %v675_v0  ;;  %2124 = vmatprep.mubr.bf16.mxu0 %v682_v10 }
 0x2bf   : > { %2413 = vmatprep.mubr.bf16.mxu1 %v684_v14 }
 0x2c0   : > { %v1588_v25 = vpop.f32.mrb[68].mxu0 }
 0x2c1   : > { %v1877_v28 = vpop.f32.mrb[68].mxu1  ;;  %v1590_v29 = vpop.f32.mrb[69].mxu0 }
 0x2c2   : > { %v6530_v3 = vadd.f32 %v1877_v28, %v1588_v25  ;;  %v1879_v26 = vpop.f32.mrb[69].mxu1  ;;  %v1591_v35 = vpop.f32.mrb[70].mxu0  ;;  %v513_v29 = vld [vmem:[%s6135_s14 + $0x1e0] sm:$0xff] }
 0x2c3   : > { %v1880_v41 = vpop.f32.mrb[70].mxu1  ;;  %v1593_v42 = vpop.f32.mrb[71].mxu0 }
 0x2c4   : > { %v6532_v45 = vadd.f32 %v1880_v41, %v1591_v35  ;;  %v1882_v51 = vpop.f32.mrb[71].mxu1 }
 0x2c5   : > { %2125 = vmatmul.mubr.bf16.gmra.mrb[176].mxu0 %v681_v31  ;;  %v515_v31 = vld [vmem:[%s6135_s14 + $0x1f0] sm:$0xff] }
 0x2c6   : > { %2414 = vmatmul.mubr.bf16.gmra.mrb[176].mxu1 %v683_v37  ;;  %2132 = vmatprep.mubr.bf16.mxu0 %v690_v40  ;;  %v697_v37 = vunpack.c.l.s8.bf16 %v513_v29  ;;  %v699_v42 = vunpack.c.l.s8.bf16 %v515_v31 }
 0x2c7   : > { %2421 = vmatprep.mubr.bf16.mxu1 %v692_v44  ;;  %v706_v44 = vunpack.c.h.s8.bf16 %v514_v53 }
 0x2c8   : > { %v1596_v58 = vpop.f32.mrb[72].mxu0 }
 0x2c9   : > { %v1885_v1 = vpop.f32.mrb[72].mxu1  ;;  %v1598_v61 = vpop.f32.mrb[73].mxu0 }
 0x2ca   : > { %v6536_v0 = vadd.f32 %v1885_v1, %v1596_v58  ;;  %v1887_v52 = vpop.f32.mrb[73].mxu1  ;;  %v1599_v10 = vpop.f32.mrb[74].mxu0  ;;  %v708_v1 = vunpack.c.h.s8.bf16 %v516_v62  ;;  %v707_v62 = vunpack.c.h.s8.bf16 %v515_v31 }
 0x2cb   : > { %v1888_v13 = vpop.f32.mrb[74].mxu1  ;;  %v1601_v14 = vpop.f32.mrb[75].mxu0  ;;  %v522_v52 = vld [vmem:[%s6135_s14 + $0x228] sm:$0xff] }
 0x2cc   : > { %v6538_v25 = vadd.f32 %v1888_v13, %v1599_v10  ;;  %v1890_v28 = vpop.f32.mrb[75].mxu1  ;;  %v705_v14 = vunpack.c.h.s8.bf16 %v513_v29 }
 0x2cd   : > { %2133 = vmatmul.mubr.bf16.gmra.mrb[180].mxu0 %v689_v5 }
 0x2ce   : > { %2422 = vmatmul.mubr.bf16.gmra.mrb[180].mxu1 %v691_v54  ;;  %2140 = vmatprep.mubr.bf16.mxu0 %v698_v11  ;;  %v524_v54 = vld [vmem:[%s6135_s14 + $0x238] sm:$0xff] }
 0x2cf   : > { %2429 = vmatprep.mubr.bf16.mxu1 %v700_v18 }
 0x2d0   : > { %v1604_v19 = vpop.f32.mrb[76].mxu0 }
 0x2d1   : > { %v1893_v26 = vpop.f32.mrb[76].mxu1  ;;  %v1606_v35 = vpop.f32.mrb[77].mxu0 }
 0x2d2   : > { %v6542_v40 = vadd.f32 %v1893_v26, %v1604_v19  ;;  %v1895_v23 = vpop.f32.mrb[77].mxu1  ;;  %v1607_v41 = vpop.f32.mrb[78].mxu0  ;;  %v714_v19 = vunpack.c.l.s8.bf16 %v522_v52 }
 0x2d3   : > { %v1896_v51 = vpop.f32.mrb[78].mxu1  ;;  %v1609_v58 = vpop.f32.mrb[79].mxu0 }
 0x2d4   : > { %v6544_v61 = vadd.f32 %v1896_v51, %v1607_v41  ;;  %v1898_v5 = vpop.f32.mrb[79].mxu1 }
 0x2d5   : > { %2141 = vmatmul.mubr.bf16.gmra.mrb[184].mxu0 %v697_v37  ;;  %v716_v37 = vunpack.c.l.s8.bf16 %v524_v54 }
 0x2d6   : > { %2430 = vmatmul.mubr.bf16.gmra.mrb[184].mxu1 %v699_v42  ;;  %2148 = vmatprep.mubr.bf16.mxu0 %v706_v44  ;;  %v521_v42 = vld [vmem:[%s6135_s14 + $0x220] sm:$0xff]  ;;  %v523_v44 = vld [vmem:[%s6135_s14 + $0x230] sm:$0xff] }
 0x2d7   : > { %2437 = vmatprep.mubr.bf16.mxu1 %v708_v1  ;;  %v713_v1 = vunpack.c.l.s8.bf16 %v521_v42 }
 0x2d8   : > { %v1612_v10 = vpop.f32.mrb[80].mxu0 }
 0x2d9   : > { %v1901_v11 = vpop.f32.mrb[80].mxu1  ;;  %v1614_v13 = vpop.f32.mrb[81].mxu0 }
 0x2da   : > { %v6548_v18 = vadd.f32 %v1901_v11, %v1612_v10  ;;  %v1903_v53 = vpop.f32.mrb[81].mxu1  ;;  %v1615_v28 = vpop.f32.mrb[82].mxu0  ;;  %v715_v11 = vunpack.c.l.s8.bf16 %v523_v44  ;;  %v722_v13 = vunpack.c.h.s8.bf16 %v522_v52 }
 0x2db   : > { %v1904_v26 = vpop.f32.mrb[82].mxu1  ;;  %v1617_v35 = vpop.f32.mrb[83].mxu0 }
 0x2dc   : > { %v6550_v23 = vadd.f32 %v1904_v26, %v1615_v28  ;;  %v1906_v41 = vpop.f32.mrb[83].mxu1  ;;  %v530_v26 = vld [vmem:[%s6135_s14 + $0x268] sm:$0xff] }
 0x2dd   : > { %2149 = vmatmul.mubr.bf16.gmra.mrb[188].mxu0 %v705_v14  ;;  %v724_v14 = vunpack.c.h.s8.bf16 %v524_v54  ;;  %v723_v54 = vunpack.c.h.s8.bf16 %v523_v44 }
 0x2de   : > { %2438 = vmatmul.mubr.bf16.gmra.mrb[188].mxu1 %v707_v62  ;;  %2156 = vmatprep.mubr.bf16.mxu0 %v714_v19 }
 0x2df   : > { %2445 = vmatprep.mubr.bf16.mxu1 %v716_v37  ;;  %v532_v37 = vld [vmem:[%s6135_s14 + $0x278] sm:$0xff] }
 0x2e0   : > { %v1620_v29 = vpop.f32.mrb[84].mxu0 }
 0x2e1   : > { %v1909_v51 = vpop.f32.mrb[84].mxu1  ;;  %v1622_v58 = vpop.f32.mrb[85].mxu0 }
 0x2e2   : > { %v6554_v5 = vadd.f32 %v1909_v51, %v1620_v29  ;;  %v1911_v31 = vpop.f32.mrb[85].mxu1  ;;  %v1623_v10 = vpop.f32.mrb[86].mxu0  ;;  %v721_v51 = vunpack.c.h.s8.bf16 %v521_v42 }
 0x2e3   : > { %v1912_v53 = vpop.f32.mrb[86].mxu1  ;;  %v1625_v28 = vpop.f32.mrb[87].mxu0 }
 0x2e4   : > { %7393 = vst [vmem:[#allocation29_spill] sm:$0xff] %v6554_v5  ;;  %v6556_v62 = vadd.f32 %v1912_v53, %v1623_v10  ;;  %v1914_v19 = vpop.f32.mrb[87].mxu1  ;;  %v730_v10 = vunpack.c.l.s8.bf16 %v530_v26 }
 0x2e5   : > { %2157 = vmatmul.mubr.bf16.gmra.mrb[192].mxu0 %v713_v1  ;;  %v732_v1 = vunpack.c.l.s8.bf16 %v532_v37  ;;  %v531_v19 = vld [vmem:[%s6135_s14 + $0x270] sm:$0xff] }
 0x2e6   : > { %7394 = vst [vmem:[#allocation30_spill] sm:$0xff] %v6556_v62  ;;  %2446 = vmatmul.mubr.bf16.gmra.mrb[192].mxu1 %v715_v11  ;;  %2164 = vmatprep.mubr.bf16.mxu0 %v722_v13  ;;  %v970_v62 = vld [vmem:[#allocation2] sm:$0xff] }
 0x2e7   : > { %2453 = vmatprep.mubr.bf16.mxu1 %v724_v14  ;;  %v529_v14 = vld [vmem:[%s6135_s14 + $0x260] sm:$0xff] }
 0x2e8   : > { %v1628_v35 = vpop.f32.mrb[88].mxu0 }
 0x2e9   : > { %v1917_v41 = vpop.f32.mrb[88].mxu1  ;;  %v1630_v29 = vpop.f32.mrb[89].mxu0 }
 0x2ea   : > { %v6560_v58 = vadd.f32 %v1917_v41, %v1628_v35  ;;  %v1919_v52 = vpop.f32.mrb[89].mxu1  ;;  %v1631_v31 = vpop.f32.mrb[90].mxu0  ;;  %v729_v41 = vunpack.c.l.s8.bf16 %v529_v14 }
 0x2eb   : > { %v1920_v53 = vpop.f32.mrb[90].mxu1  ;;  %v1633_v28 = vpop.f32.mrb[91].mxu0 }
 0x2ec   : > { %7395 = vst [vmem:[#allocation31_spill] sm:$0xff] %v6560_v58  ;;  %v6562_v11 = vadd.f32 %v1920_v53, %v1631_v31  ;;  %v1922_v13 = vpop.f32.mrb[91].mxu1  ;;  %v731_v58 = vunpack.c.l.s8.bf16 %v531_v19  ;;  %v738_v31 = vunpack.c.h.s8.bf16 %v530_v26 }
 0x2ed   : > { %2165 = vmatmul.mubr.bf16.gmra.mrb[196].mxu0 %v721_v51  ;;  %v740_v51 = vunpack.c.h.s8.bf16 %v532_v37  ;;  %v739_v37 = vunpack.c.h.s8.bf16 %v531_v19 }
 0x2ee   : > { %7396 = vst [vmem:[#allocation32_spill] sm:$0xff] %v6562_v11  ;;  %2454 = vmatmul.mubr.bf16.gmra.mrb[196].mxu1 %v723_v54  ;;  %2172 = vmatprep.mubr.bf16.mxu0 %v730_v10  ;;  %v540_v11 = vld [vmem:[%s6135_s14 + $0x2b8] sm:$0xff] }
 0x2ef   : > { %2461 = vmatprep.mubr.bf16.mxu1 %v732_v1  ;;  %v538_v1 = vld [vmem:[%s6135_s14 + $0x2a8] sm:$0xff] }
 0x2f0   : > { %v1636_v42 = vpop.f32.mrb[92].mxu0 }
 0x2f1   : > { %v1925_v29 = vpop.f32.mrb[92].mxu1  ;;  %v1638_v35 = vpop.f32.mrb[93].mxu0 }
 0x2f2   : > { %v6566_v52 = vadd.f32 %v1925_v29, %v1636_v42  ;;  %v1927_v44 = vpop.f32.mrb[93].mxu1  ;;  %v1639_v28 = vpop.f32.mrb[94].mxu0 }
 0x2f3   : > { %v1928_v53 = vpop.f32.mrb[94].mxu1  ;;  %v1641_v13 = vpop.f32.mrb[95].mxu0  ;;  %v737_v44 = vunpack.c.h.s8.bf16 %v529_v14 }
 0x2f4   : > { %7397 = vst [vmem:[#allocation33_spill] sm:$0xff] %v6566_v52  ;;  %v6568_v54 = vadd.f32 %v1928_v53, %v1639_v28  ;;  %v1930_v10 = vpop.f32.mrb[95].mxu1  ;;  %v746_v28 = vunpack.c.l.s8.bf16 %v538_v1 }
 0x2f5   : > { %2173 = vmatmul.mubr.bf16.gmra.mrb[200].mxu0 %v729_v41  ;;  %v748_v41 = vunpack.c.l.s8.bf16 %v540_v11 }
 0x2f6   : > { %7398 = vst [vmem:[#allocation34_spill] sm:$0xff] %v6568_v54  ;;  %2462 = vmatmul.mubr.bf16.gmra.mrb[200].mxu1 %v731_v58  ;;  %2180 = vmatprep.mubr.bf16.mxu0 %v738_v31 }
 0x2f7   : > { %2469 = vmatprep.mubr.bf16.mxu1 %v740_v51  ;;  %v537_v51 = vld [vmem:[%s6135_s14 + $0x2a0] sm:$0xff] }
 0x2f8   : > { %v1644_v35 = vpop.f32.mrb[96].mxu0 }
 0x2f9   : > { %v1933_v42 = vpop.f32.mrb[96].mxu1  ;;  %v1646_v29 = vpop.f32.mrb[97].mxu0 }
 0x2fa   : > { %v6572_v52 = vadd.f32 %v1933_v42, %v1644_v35  ;;  %v1935_v26 = vpop.f32.mrb[97].mxu1  ;;  %v1647_v13 = vpop.f32.mrb[98].mxu0  ;;  %v539_v29 = vld [vmem:[%s6135_s14 + $0x2b0] sm:$0xff]  ;;  %v745_v42 = vunpack.c.l.s8.bf16 %v537_v51 }
 0x2fb   : > { %v1936_v53 = vpop.f32.mrb[98].mxu1  ;;  %v1649_v10 = vpop.f32.mrb[99].mxu0 }
 0x2fc   : > { %7399 = vst [vmem:[#allocation35_spill] sm:$0xff] %v6572_v52  ;;  %v6574_v58 = vadd.f32 %v1936_v53, %v1647_v13  ;;  %v1938_v31 = vpop.f32.mrb[99].mxu1  ;;  %v747_v52 = vunpack.c.l.s8.bf16 %v539_v29  ;;  %v754_v13 = vunpack.c.h.s8.bf16 %v538_v1 }
 0x2fd   : > { %2181 = vmatmul.mubr.bf16.gmra.mrb[204].mxu0 %v737_v44  ;;  %v756_v44 = vunpack.c.h.s8.bf16 %v540_v11  ;;  %v755_v11 = vunpack.c.h.s8.bf16 %v539_v29 }
 0x2fe   : > { %7400 = vst [vmem:[#allocation36_spill] sm:$0xff] %v6574_v58  ;;  %2470 = vmatmul.mubr.bf16.gmra.mrb[204].mxu1 %v739_v37  ;;  %2188 = vmatprep.mubr.bf16.mxu0 %v746_v28  ;;  %v548_v58 = vld [vmem:[%s6135_s14 + $0x2f8] sm:$0xff] }
 0x2ff   : > { %2477 = vmatprep.mubr.bf16.mxu1 %v748_v41  ;;  %v546_v41 = vld [vmem:[%s6135_s14 + $0x2e8] sm:$0xff] }
 0x300   : > { %v1652_v14 = vpop.f32.mrb[100].mxu0 }
 0x301   : > { %v1941_v54 = vpop.f32.mrb[100].mxu1  ;;  %v1654_v35 = vpop.f32.mrb[101].mxu0 }
 0x302   : > { %v6578_v26 = vadd.f32 %v1941_v54, %v1652_v14  ;;  %v1943_v19 = vpop.f32.mrb[101].mxu1  ;;  %v1655_v10 = vpop.f32.mrb[102].mxu0 }
 0x303   : > { %v1944_v53 = vpop.f32.mrb[102].mxu1  ;;  %v1657_v31 = vpop.f32.mrb[103].mxu0  ;;  %v753_v19 = vunpack.c.h.s8.bf16 %v537_v51 }
 0x304   : > { %7401 = vst [vmem:[#allocation37_spill] sm:$0xff] %v6578_v26  ;;  %v6580_v37 = vadd.f32 %v1944_v53, %v1655_v10  ;;  %v1946_v28 = vpop.f32.mrb[103].mxu1  ;;  %v762_v10 = vunpack.c.l.s8.bf16 %v546_v41 }
 0x305   : > { %2189 = vmatmul.mubr.bf16.gmra.mrb[208].mxu0 %v745_v42  ;;  %v764_v42 = vunpack.c.l.s8.bf16 %v548_v58 }
 0x306   : > { %7402 = vst [vmem:[#allocation38_spill] sm:$0xff] %v6580_v37  ;;  %2478 = vmatmul.mubr.bf16.gmra.mrb[208].mxu1 %v747_v52  ;;  %2196 = vmatprep.mubr.bf16.mxu0 %v754_v13 }
 0x307   : > { %2485 = vmatprep.mubr.bf16.mxu1 %v756_v44  ;;  %v545_v44 = vld [vmem:[%s6135_s14 + $0x2e0] sm:$0xff] }
 0x308   : > { %v1660_v35 = vpop.f32.mrb[104].mxu0 }
 0x309   : > { %v1949_v54 = vpop.f32.mrb[104].mxu1  ;;  %v1662_v14 = vpop.f32.mrb[105].mxu0 }
 0x30a   : > { %v6584_v26 = vadd.f32 %v1949_v54, %v1660_v35  ;;  %v1951_v1 = vpop.f32.mrb[105].mxu1  ;;  %v1663_v31 = vpop.f32.mrb[106].mxu0  ;;  %v547_v14 = vld [vmem:[%s6135_s14 + $0x2f0] sm:$0xff]  ;;  %v761_v54 = vunpack.c.l.s8.bf16 %v545_v44 }
 0x30b   : > { %v1952_v53 = vpop.f32.mrb[106].mxu1  ;;  %v1665_v28 = vpop.f32.mrb[107].mxu0 }
 0x30c   : > { %7403 = vst [vmem:[#allocation39_spill] sm:$0xff] %v6584_v26  ;;  %v6586_v52 = vadd.f32 %v1952_v53, %v1663_v31  ;;  %v1954_v13 = vpop.f32.mrb[107].mxu1  ;;  %v763_v26 = vunpack.c.l.s8.bf16 %v547_v14  ;;  %v770_v31 = vunpack.c.h.s8.bf16 %v546_v41 }
 0x30d   : > { %2197 = vmatmul.mubr.bf16.gmra.mrb[212].mxu0 %v753_v19  ;;  %v772_v19 = vunpack.c.h.s8.bf16 %v548_v58  ;;  %v771_v58 = vunpack.c.h.s8.bf16 %v547_v14 }
 0x30e   : > { %7404 = vst [vmem:[#allocation40_spill] sm:$0xff] %v6586_v52  ;;  %2486 = vmatmul.mubr.bf16.gmra.mrb[212].mxu1 %v755_v11  ;;  %2204 = vmatprep.mubr.bf16.mxu0 %v762_v10  ;;  %v556_v52 = vld [vmem:[%s6135_s14 + $0x338] sm:$0xff] }
 0x30f   : > { %2493 = vmatprep.mubr.bf16.mxu1 %v764_v42  ;;  %v554_v42 = vld [vmem:[%s6135_s14 + $0x328] sm:$0xff] }
 0x310   : > { %v1668_v51 = vpop.f32.mrb[108].mxu0 }
 0x311   : > { %v1957_v37 = vpop.f32.mrb[108].mxu1  ;;  %v1670_v35 = vpop.f32.mrb[109].mxu0 }
 0x312   : > { %v6590_v1 = vadd.f32 %v1957_v37, %v1668_v51  ;;  %v1959_v29 = vpop.f32.mrb[109].mxu1  ;;  %v1671_v28 = vpop.f32.mrb[110].mxu0 }
 0x313   : > { %v1960_v53 = vpop.f32.mrb[110].mxu1  ;;  %v1673_v13 = vpop.f32.mrb[111].mxu0  ;;  %v769_v29 = vunpack.c.h.s8.bf16 %v545_v44 }
 0x314   : > { %7405 = vst [vmem:[#allocation41_spill] sm:$0xff] %v6590_v1  ;;  %v6592_v11 = vadd.f32 %v1960_v53, %v1671_v28  ;;  %v1962_v10 = vpop.f32.mrb[111].mxu1  ;;  %v778_v28 = vunpack.c.l.s8.bf16 %v554_v42 }
 0x315   : > { %2205 = vmatmul.mubr.bf16.gmra.mrb[216].mxu0 %v761_v54  ;;  %v780_v54 = vunpack.c.l.s8.bf16 %v556_v52 }
 0x316   : > { %7406 = vst [vmem:[#allocation42_spill] sm:$0xff] %v6592_v11  ;;  %2494 = vmatmul.mubr.bf16.gmra.mrb[216].mxu1 %v763_v26  ;;  %2212 = vmatprep.mubr.bf16.mxu0 %v770_v31 }
 0x317   : > { %2501 = vmatprep.mubr.bf16.mxu1 %v772_v19  ;;  %v553_v19 = vld [vmem:[%s6135_s14 + $0x320] sm:$0xff] }
 0x318   : > { %v1676_v35 = vpop.f32.mrb[112].mxu0 }
 0x319   : > { %v1965_v37 = vpop.f32.mrb[112].mxu1  ;;  %v1678_v51 = vpop.f32.mrb[113].mxu0 }
 0x31a   : > { %v6596_v1 = vadd.f32 %v1965_v37, %v1676_v35  ;;  %v1967_v41 = vpop.f32.mrb[113].mxu1  ;;  %v1679_v13 = vpop.f32.mrb[114].mxu0  ;;  %v555_v51 = vld [vmem:[%s6135_s14 + $0x330] sm:$0xff]  ;;  %v777_v37 = vunpack.c.l.s8.bf16 %v553_v19 }
 0x31b   : > { %v1968_v53 = vpop.f32.mrb[114].mxu1  ;;  %v1681_v10 = vpop.f32.mrb[115].mxu0 }
 0x31c   : > { %7407 = vst [vmem:[#allocation43_spill] sm:$0xff] %v6596_v1  ;;  %v6598_v26 = vadd.f32 %v1968_v53, %v1679_v13  ;;  %v1970_v31 = vpop.f32.mrb[115].mxu1  ;;  %v779_v1 = vunpack.c.l.s8.bf16 %v555_v51  ;;  %v786_v13 = vunpack.c.h.s8.bf16 %v554_v42 }
 0x31d   : > { %2213 = vmatmul.mubr.bf16.gmra.mrb[220].mxu0 %v769_v29  ;;  %v788_v29 = vunpack.c.h.s8.bf16 %v556_v52  ;;  %v787_v52 = vunpack.c.h.s8.bf16 %v555_v51 }
 0x31e   : > { %7408 = vst [vmem:[#allocation44_spill] sm:$0xff] %v6598_v26  ;;  %2502 = vmatmul.mubr.bf16.gmra.mrb[220].mxu1 %v771_v58  ;;  %2220 = vmatprep.mubr.bf16.mxu0 %v778_v28  ;;  %v564_v26 = vld [vmem:[%s6135_s14 + $0x378] sm:$0xff] }
 0x31f   : > { %2509 = vmatprep.mubr.bf16.mxu1 %v780_v54  ;;  %v562_v54 = vld [vmem:[%s6135_s14 + $0x368] sm:$0xff] }
 0x320   : > { %v1684_v44 = vpop.f32.mrb[116].mxu0 }
 0x321   : > { %v1973_v11 = vpop.f32.mrb[116].mxu1  ;;  %v1686_v35 = vpop.f32.mrb[117].mxu0 }
 0x322   : > { %v6602_v41 = vadd.f32 %v1973_v11, %v1684_v44  ;;  %v1975_v14 = vpop.f32.mrb[117].mxu1  ;;  %v1687_v10 = vpop.f32.mrb[118].mxu0 }
 0x323   : > { %v1976_v53 = vpop.f32.mrb[118].mxu1  ;;  %v1689_v31 = vpop.f32.mrb[119].mxu0  ;;  %v785_v14 = vunpack.c.h.s8.bf16 %v553_v19 }
 0x324   : > { %7409 = vst [vmem:[#allocation45_spill] sm:$0xff] %v6602_v41  ;;  %v6604_v58 = vadd.f32 %v1976_v53, %v1687_v10  ;;  %v1978_v28 = vpop.f32.mrb[119].mxu1  ;;  %v794_v10 = vunpack.c.l.s8.bf16 %v562_v54 }
 0x325   : > { %2221 = vmatmul.mubr.bf16.gmra.mrb[224].mxu0 %v777_v37  ;;  %v796_v37 = vunpack.c.l.s8.bf16 %v564_v26 }
 0x326   : > { %7410 = vst [vmem:[#allocation46_spill] sm:$0xff] %v6604_v58  ;;  %2510 = vmatmul.mubr.bf16.gmra.mrb[224].mxu1 %v779_v1  ;;  %2228 = vmatprep.mubr.bf16.mxu0 %v786_v13 }
 0x327   : > { %2517 = vmatprep.mubr.bf16.mxu1 %v788_v29  ;;  %v561_v29 = vld [vmem:[%s6135_s14 + $0x360] sm:$0xff] }
 0x328   : > { %v1692_v35 = vpop.f32.mrb[120].mxu0 }
 0x329   : > { %v1981_v11 = vpop.f32.mrb[120].mxu1  ;;  %v1694_v44 = vpop.f32.mrb[121].mxu0 }
 0x32a   : > { %v6608_v41 = vadd.f32 %v1981_v11, %v1692_v35  ;;  %v1983_v42 = vpop.f32.mrb[121].mxu1  ;;  %v1695_v31 = vpop.f32.mrb[122].mxu0  ;;  %v563_v44 = vld [vmem:[%s6135_s14 + $0x370] sm:$0xff]  ;;  %v793_v11 = vunpack.c.l.s8.bf16 %v561_v29 }
 0x32b   : > { %v1984_v53 = vpop.f32.mrb[122].mxu1  ;;  %v1697_v28 = vpop.f32.mrb[123].mxu0 }
 0x32c   : > { %7411 = vst [vmem:[#allocation47_spill] sm:$0xff] %v6608_v41  ;;  %v6610_v1 = vadd.f32 %v1984_v53, %v1695_v31  ;;  %v1986_v13 = vpop.f32.mrb[123].mxu1  ;;  %v795_v41 = vunpack.c.l.s8.bf16 %v563_v44  ;;  %v802_v31 = vunpack.c.h.s8.bf16 %v562_v54 }
 0x32d   : > { %2229 = vmatmul.mubr.bf16.gmra.mrb[228].mxu0 %v785_v14  ;;  %v804_v14 = vunpack.c.h.s8.bf16 %v564_v26  ;;  %v803_v26 = vunpack.c.h.s8.bf16 %v563_v44  ;;  %v571_v44 = vld [vmem:[%s6135_s14 + $0x3b0] sm:$0xff] }
 0x32e   : > { %7412 = vst [vmem:[#allocation48_spill] sm:$0xff] %v6610_v1  ;;  %2518 = vmatmul.mubr.bf16.gmra.mrb[228].mxu1 %v787_v52  ;;  %2236 = vmatprep.mubr.bf16.mxu0 %v794_v10  ;;  %v572_v1 = vld [vmem:[%s6135_s14 + $0x3b8] sm:$0xff] }
 0x32f   : > { %2525 = vmatprep.mubr.bf16.mxu1 %v796_v37  ;;  %v570_v37 = vld [vmem:[%s6135_s14 + $0x3a8] sm:$0xff] }
 0x330   : > { %v1700_v19 = vpop.f32.mrb[124].mxu0 }
 0x331   : > { %v1989_v58 = vpop.f32.mrb[124].mxu1  ;;  %v1702_v35 = vpop.f32.mrb[125].mxu0 }
 0x332   : > { %v6614_v42 = vadd.f32 %v1989_v58, %v1700_v19  ;;  %v1991_v51 = vpop.f32.mrb[125].mxu1  ;;  %v1703_v28 = vpop.f32.mrb[126].mxu0 }
 0x333   : > { %v1992_v53 = vpop.f32.mrb[126].mxu1  ;;  %v1705_v13 = vpop.f32.mrb[127].mxu0 }
 0x334   : > { %7413 = vst [vmem:[#allocation49_spill] sm:$0xff] %v6614_v42  ;;  %v6616_v52 = vadd.f32 %v1992_v53, %v1703_v28  ;;  %v1994_v10 = vpop.f32.mrb[127].mxu1  ;;  %v801_v42 = vunpack.c.h.s8.bf16 %v561_v29  ;;  %v810_v28 = vunpack.c.l.s8.bf16 %v570_v37  ;;  %v569_v29 = vld [vmem:[%s6135_s14 + $0x3a0] sm:$0xff] }
 0x335   : > { %2237 = vmatmul.mubr.bf16.gmra.mrb[232].mxu0 %v793_v11  ;;  %v971_v10 = vld [vmem:[#allocation2 + $0x8] sm:$0xff] }
 0x336   : > { %7414 = vst [vmem:[#allocation50_spill] sm:$0xff] %v6616_v52  ;;  %2526 = vmatmul.mubr.bf16.gmra.mrb[232].mxu1 %v795_v41  ;;  %2244 = vmatprep.mubr.bf16.mxu0 %v802_v31 }
 0x337   : > { %2533 = vmatprep.mubr.bf16.mxu1 %v804_v14  ;;  %v812_v14 = vunpack.c.l.s8.bf16 %v572_v1 }
 0x338   : > { %v2030_v35 = vpop.f32.mrb[128].mxu0 }
 0x339   : > { %v2031_v58 = vadd.f32 %v2030_v35, %v6428_v47  ;;  %v2319_v19 = vpop.f32.mrb[128].mxu1  ;;  %v2032_v51 = vpop.f32.mrb[129].mxu0 }
 0x33a   : > { %v2321_v54 = vpop.f32.mrb[129].mxu1  ;;  %v2033_v13 = vpop.f32.mrb[130].mxu0 }
 0x33b   : > { %v2320_v53 = vadd.f32 %v2319_v19, %v2031_v58  ;;  %v2034_v41 = vadd.f32 %v2033_v13, %v6430_v55  ;;  %v2322_v11 = vpop.f32.mrb[130].mxu1  ;;  %v2035_v31 = vpop.f32.mrb[131].mxu0  ;;  %v809_v54 = vunpack.c.l.s8.bf16 %v569_v29  ;;  %v972_v13 = vld [vmem:[#allocation2 + $0x10] sm:$0xff] }
 0x33c   : > { %v2324_v52 = vpop.f32.mrb[131].mxu1 }
 0x33d   : > { %v2574_v5 = vadd.f32 %v2320_v53, %v970_v62  ;;  %v2323_v47 = vadd.f32 %v2322_v11, %v2034_v41  ;;  %2245 = vmatmul.mubr.bf16.gmra.mrb[236].mxu0 %v801_v42  ;;  %v811_v62 = vunpack.c.l.s8.bf16 %v571_v44  ;;  %v818_v53 = vunpack.c.h.s8.bf16 %v570_v37  ;;  %v973_v11 = vld [vmem:[#allocation2 + $0x18] sm:$0xff] }
 0x33e   : > { %2534 = vmatmul.mubr.bf16.gmra.mrb[236].mxu1 %v803_v26  ;;  %2252 = vmatprep.mubr.bf16.mxu0 %v810_v28  ;;  %v820_v41 = vunpack.c.h.s8.bf16 %v572_v1  ;;  %v974_v1 = vld [vmem:[#allocation2 + $0x20] sm:$0xff] }
 0x33f   : > { %2638 = vst [vmem:[#allocation2] sm:$0xff] %v2574_v5  ;;  %v2575_v35 = vadd.f32 %v2323_v47, %v971_v10  ;;  %2541 = vmatprep.mubr.bf16.mxu1 %v812_v14 }
 0x340   : > { %v2038_v51 = vpop.f32.mrb[132].mxu0 }
 0x341   : > { %2639 = vst [vmem:[#allocation2 + $0x8] sm:$0xff] %v2575_v35  ;;  %v2039_v58 = vadd.f32 %v2038_v51, %v6434_v63  ;;  %v2327_v55 = vpop.f32.mrb[132].mxu1  ;;  %v2040_v19 = vpop.f32.mrb[133].mxu0  ;;  %v578_v35 = vld [vmem:[%s6135_s14 + $0x3e8] sm:$0xff]  ;;  %v580_v51 = vld [vmem:[%s6135_s14 + $0x3f8] sm:$0xff] }
 0x342   : > { %v2329_v31 = vpop.f32.mrb[133].mxu1  ;;  %v2041_v52 = vpop.f32.mrb[134].mxu0  ;;  %v817_v19 = vunpack.c.h.s8.bf16 %v569_v29  ;;  %v577_v29 = vld [vmem:[%s6135_s14 + $0x3e0] sm:$0xff] }
 0x343   : > { %v2328_v42 = vadd.f32 %v2327_v55, %v2039_v58  ;;  %v2042_v26 = vadd.f32 %v2041_v52, %v6436_v8  ;;  %v2330_v5 = vpop.f32.mrb[134].mxu1  ;;  %v2043_v28 = vpop.f32.mrb[135].mxu0  ;;  %v819_v52 = vunpack.c.h.s8.bf16 %v571_v44  ;;  %v579_v44 = vld [vmem:[%s6135_s14 + $0x3f0] sm:$0xff] }
 0x344   : > { %v2332_v14 = vpop.f32.mrb[135].mxu1  ;;  %v975_v28 = vld [vmem:[#allocation2 + $0x28] sm:$0xff] }
 0x345   : > { %v2576_v10 = vadd.f32 %v2328_v42, %v972_v13  ;;  %v2331_v63 = vadd.f32 %v2330_v5, %v2042_v26  ;;  %2253 = vmatmul.mubr.bf16.gmra.mrb[240].mxu0 %v809_v54  ;;  %v826_v54 = vunpack.c.l.s8.bf16 %v578_v35  ;;  %v828_v5 = vunpack.c.l.s8.bf16 %v580_v51 }
 0x346   : > { %2542 = vmatmul.mubr.bf16.gmra.mrb[240].mxu1 %v811_v62  ;;  %2260 = vmatprep.mubr.bf16.mxu0 %v818_v53 }
 0x347   : > { %2640 = vst [vmem:[#allocation2 + $0x10] sm:$0xff] %v2576_v10  ;;  %v2577_v47 = vadd.f32 %v2331_v63, %v973_v11  ;;  %2549 = vmatprep.mubr.bf16.mxu1 %v820_v41 }
 0x348   : > { %v2046_v37 = vpop.f32.mrb[136].mxu0 }
 0x349   : > { %2641 = vst [vmem:[#allocation2 + $0x18] sm:$0xff] %v2577_v47  ;;  %v2047_v8 = vadd.f32 %v2046_v37, %v6440_v16  ;;  %v2335_v58 = vpop.f32.mrb[136].mxu1  ;;  %v2048_v55 = vpop.f32.mrb[137].mxu0  ;;  %v825_v37 = vunpack.c.l.s8.bf16 %v577_v29 }
 0x34a   : > { %v2337_v31 = vpop.f32.mrb[137].mxu1  ;;  %v2049_v13 = vpop.f32.mrb[138].mxu0 }
 0x34b   : > { %v2336_v62 = vadd.f32 %v2335_v58, %v2047_v8  ;;  %v2050_v53 = vadd.f32 %v2049_v13, %v6442_v24  ;;  %v2338_v42 = vpop.f32.mrb[138].mxu1  ;;  %v2051_v26 = vpop.f32.mrb[139].mxu0  ;;  %v976_v8 = vld [vmem:[#allocation2 + $0x30] sm:$0xff]  ;;  %v834_v31 = vunpack.c.h.s8.bf16 %v578_v35 }
 0x34c   : > { %v2340_v41 = vpop.f32.mrb[139].mxu1 }
 0x34d   : > { %v2578_v11 = vadd.f32 %v2336_v62, %v974_v1  ;;  %v2339_v16 = vadd.f32 %v2338_v42, %v2050_v53  ;;  %2261 = vmatmul.mubr.bf16.gmra.mrb[244].mxu0 %v817_v19  ;;  %v827_v1 = vunpack.c.l.s8.bf16 %v579_v44  ;;  %v836_v62 = vunpack.c.h.s8.bf16 %v580_v51  ;;  %v977_v53 = vld [vmem:[#allocation2 + $0x38] sm:$0xff] }
 0x34e   : > { %2550 = vmatmul.mubr.bf16.gmra.mrb[244].mxu1 %v819_v52  ;;  %2268 = vmatprep.mubr.bf16.mxu0 %v826_v54 }
 0x34f   : > { %2642 = vst [vmem:[#allocation2 + $0x20] sm:$0xff] %v2578_v11  ;;  %v2579_v14 = vadd.f32 %v2339_v16, %v975_v28  ;;  %2557 = vmatprep.mubr.bf16.mxu1 %v828_v5  ;;  %v978_v16 = vld [vmem:[#allocation2 + $0x40] sm:$0xff] }
 0x350   : > { %v2054_v10 = vpop.f32.mrb[140].mxu0 }
 0x351   : > { %2643 = vst [vmem:[#allocation2 + $0x28] sm:$0xff] %v2579_v14  ;;  %v2055_v63 = vadd.f32 %v2054_v10, %v6446_v32  ;;  %v2343_v24 = vpop.f32.mrb[140].mxu1  ;;  %v2056_v47 = vpop.f32.mrb[141].mxu0  ;;  %v835_v10 = vunpack.c.h.s8.bf16 %v579_v44  ;;  %v980_v44 = vld [vmem:[#allocation2 + $0x50] sm:$0xff] }
 0x352   : > { %v2345_v58 = vpop.f32.mrb[141].mxu1  ;;  %v2057_v55 = vpop.f32.mrb[142].mxu0 }
 0x353   : > { %v2344_v19 = vadd.f32 %v2343_v24, %v2055_v63  ;;  %v2058_v13 = vadd.f32 %v2057_v55, %v6448_v39  ;;  %v2346_v52 = vpop.f32.mrb[142].mxu1  ;;  %v2059_v54 = vpop.f32.mrb[143].mxu0  ;;  %v833_v39 = vunpack.c.h.s8.bf16 %v577_v29 }
 0x354   : > { %v2348_v42 = vpop.f32.mrb[143].mxu1 }
 0x355   : > { %v2580_v26 = vadd.f32 %v2344_v19, %v976_v8  ;;  %v2347_v5 = vadd.f32 %v2346_v52, %v2058_v13  ;;  %2269 = vmatmul.mubr.bf16.gmra.mrb[248].mxu0 %v825_v37  ;;  %v979_v8 = vld [vmem:[#allocation2 + $0x48] sm:$0xff] }
 0x356   : > { %2558 = vmatmul.mubr.bf16.gmra.mrb[248].mxu1 %v827_v1  ;;  %2276 = vmatprep.mubr.bf16.mxu0 %v834_v31 }
 0x357   : > { %2644 = vst [vmem:[#allocation2 + $0x30] sm:$0xff] %v2580_v26  ;;  %v2581_v32 = vadd.f32 %v2347_v5, %v977_v53  ;;  %2565 = vmatprep.mubr.bf16.mxu1 %v836_v62  ;;  %v981_v26 = vld [vmem:[#allocation2 + $0x58] sm:$0xff] }
 0x358   : > { %v2062_v28 = vpop.f32.mrb[144].mxu0 }
 0x359   : > { %2645 = vst [vmem:[#allocation2 + $0x38] sm:$0xff] %v2581_v32  ;;  %v2063_v35 = vadd.f32 %v2062_v28, %v6452_v48  ;;  %v2351_v41 = vpop.f32.mrb[144].mxu1  ;;  %v2064_v11 = vpop.f32.mrb[145].mxu0 }
 0x35a   : > { %v2353_v14 = vpop.f32.mrb[145].mxu1  ;;  %v2065_v51 = vpop.f32.mrb[146].mxu0 }
 0x35b   : > { %v2352_v63 = vadd.f32 %v2351_v41, %v2063_v35  ;;  %v2066_v24 = vadd.f32 %v2065_v51, %v6454_v57  ;;  %v2354_v47 = vpop.f32.mrb[146].mxu1  ;;  %v2067_v37 = vpop.f32.mrb[147].mxu0 }
 0x35c   : > { %v2356_v58 = vpop.f32.mrb[147].mxu1 }
 0x35d   : > { %v2582_v55 = vadd.f32 %v2352_v63, %v978_v16  ;;  %v2355_v1 = vadd.f32 %v2354_v47, %v2066_v24  ;;  %2277 = vmatmul.mubr.bf16.gmra.mrb[252].mxu0 %v833_v39  ;;  %v982_v16 = vld [vmem:[#allocation2 + $0x60] sm:$0xff]  ;;  %v983_v47 = vld [vmem:[#allocation2 + $0x68] sm:$0xff] }
 0x35e   : > { %2566 = vmatmul.mubr.bf16.gmra.mrb[252].mxu1 %v835_v10 }
 0x35f   : > { %2646 = vst [vmem:[#allocation2 + $0x40] sm:$0xff] %v2582_v55  ;;  %v2583_v48 = vadd.f32 %v2355_v1, %v979_v8 }
 0x360   : > { %v2070_v31 = vpop.f32.mrb[148].mxu0 }
 0x361   : > { %2647 = vst [vmem:[#allocation2 + $0x48] sm:$0xff] %v2583_v48  ;;  %v2071_v29 = vadd.f32 %v2070_v31, %v6458_v2  ;;  %v2359_v19 = vpop.f32.mrb[148].mxu1  ;;  %v2072_v13 = vpop.f32.mrb[149].mxu0 }
 0x362   : > { %v2361_v52 = vpop.f32.mrb[149].mxu1  ;;  %v2073_v54 = vpop.f32.mrb[150].mxu0 }
 0x363   : > { %v2360_v57 = vadd.f32 %v2359_v19, %v2071_v29  ;;  %v2074_v62 = vadd.f32 %v2073_v54, %v6460_v12  ;;  %v2362_v53 = vpop.f32.mrb[150].mxu1  ;;  %v2075_v42 = vpop.f32.mrb[151].mxu0  ;;  %v984_v29 = vld [vmem:[#allocation2 + $0x70] sm:$0xff] }
 0x364   : > { %v2364_v5 = vpop.f32.mrb[151].mxu1 }
 0x365   : > { %v2584_v32 = vadd.f32 %v2360_v57, %v980_v44  ;;  %v2363_v28 = vadd.f32 %v2362_v53, %v2074_v62  ;;  %v985_v57 = vld [vmem:[#allocation2 + $0x78] sm:$0xff] }
 0x367   : > { %2648 = vst [vmem:[#allocation2 + $0x50] sm:$0xff] %v2584_v32  ;;  %v2585_v35 = vadd.f32 %v2363_v28, %v981_v26 }
 0x368   : > { %v2078_v41 = vpop.f32.mrb[152].mxu0 }
 0x369   : > { %2649 = vst [vmem:[#allocation2 + $0x58] sm:$0xff] %v2585_v35  ;;  %v2079_v2 = vadd.f32 %v2078_v41, %v6464_v21  ;;  %v2367_v11 = vpop.f32.mrb[152].mxu1  ;;  %v2080_v39 = vpop.f32.mrb[153].mxu0  ;;  %v986_v35 = vld [vmem:[#allocation2 + $0x80] sm:$0xff] }
 0x36a   : > { %v2369_v14 = vpop.f32.mrb[153].mxu1  ;;  %v2081_v51 = vpop.f32.mrb[154].mxu0 }
 0x36b   : > { %v2368_v10 = vadd.f32 %v2367_v11, %v2079_v2  ;;  %v2082_v12 = vadd.f32 %v2081_v51, %v6466_v30  ;;  %v2370_v63 = vpop.f32.mrb[154].mxu1  ;;  %v2083_v24 = vpop.f32.mrb[155].mxu0  ;;  %v987_v14 = vld [vmem:[#allocation2 + $0x88] sm:$0xff] }
 0x36c   : > { %v2372_v37 = vpop.f32.mrb[155].mxu1 }
 0x36d   : > { %v2586_v8 = vadd.f32 %v2368_v10, %v982_v16  ;;  %v2371_v58 = vadd.f32 %v2370_v63, %v2082_v12 }
 0x36f   : > { %2650 = vst [vmem:[#allocation2 + $0x60] sm:$0xff] %v2586_v8  ;;  %v2587_v55 = vadd.f32 %v2371_v58, %v983_v47  ;;  %v988_v8 = vld [vmem:[#allocation2 + $0x90] sm:$0xff] }
 0x370   : > { %v2086_v1 = vpop.f32.mrb[156].mxu0 }
 0x371   : > { %2651 = vst [vmem:[#allocation2 + $0x68] sm:$0xff] %v2587_v55  ;;  %v2087_v21 = vadd.f32 %v2086_v1, %v6470_v38  ;;  %v2375_v48 = vpop.f32.mrb[156].mxu1  ;;  %v2088_v31 = vpop.f32.mrb[157].mxu0 }
 0x372   : > { %v2377_v19 = vpop.f32.mrb[157].mxu1  ;;  %v2089_v13 = vpop.f32.mrb[158].mxu0  ;;  %v989_v31 = vld [vmem:[#allocation2 + $0x98] sm:$0xff] }
 0x373   : > { %v2376_v44 = vadd.f32 %v2375_v48, %v2087_v21  ;;  %v2090_v30 = vadd.f32 %v2089_v13, %v6472_v49  ;;  %v2378_v52 = vpop.f32.mrb[158].mxu1  ;;  %v2091_v54 = vpop.f32.mrb[159].mxu0 }
 0x374   : > { %v2380_v62 = vpop.f32.mrb[159].mxu1 }
 0x375   : > { %v2588_v53 = vadd.f32 %v2376_v44, %v984_v29  ;;  %v2379_v42 = vadd.f32 %v2378_v52, %v2090_v30 }
 0x377   : > { %2652 = vst [vmem:[#allocation2 + $0x70] sm:$0xff] %v2588_v53  ;;  %v2589_v26 = vadd.f32 %v2379_v42, %v985_v57  ;;  %v990_v57 = vld [vmem:[#allocation2 + $0xa0] sm:$0xff] }
 0x378   : > { %v2094_v5 = vpop.f32.mrb[160].mxu0 }
 0x379   : > { %2653 = vst [vmem:[#allocation2 + $0x78] sm:$0xff] %v2589_v26  ;;  %v2095_v38 = vadd.f32 %v2094_v5, %v6476_v59  ;;  %v2383_v32 = vpop.f32.mrb[160].mxu1  ;;  %v2096_v28 = vpop.f32.mrb[161].mxu0 }
 0x37a   : > { %v2385_v41 = vpop.f32.mrb[161].mxu1  ;;  %v2097_v2 = vpop.f32.mrb[162].mxu0 }
 0x37b   : > { %v2384_v11 = vadd.f32 %v2383_v32, %v2095_v38  ;;  %v2098_v49 = vadd.f32 %v2097_v2, %v6478_v6  ;;  %v2386_v39 = vpop.f32.mrb[162].mxu1  ;;  %v2099_v16 = vpop.f32.mrb[163].mxu0  ;;  %v991_v38 = vld [vmem:[#allocation2 + $0xa8] sm:$0xff] }
 0x37c   : > { %v2388_v51 = vpop.f32.mrb[163].mxu1 }
 0x37d   : > { %v2590_v10 = vadd.f32 %v2384_v11, %v986_v35  ;;  %v2387_v12 = vadd.f32 %v2386_v39, %v2098_v49  ;;  %v992_v39 = vld [vmem:[#allocation2 + $0xb0] sm:$0xff] }
 0x37f   : > { %2654 = vst [vmem:[#allocation2 + $0x80] sm:$0xff] %v2590_v10  ;;  %v2591_v63 = vadd.f32 %v2387_v12, %v987_v14 }
 0x380   : > { %v2102_v24 = vpop.f32.mrb[164].mxu0 }
 0x381   : > { %2655 = vst [vmem:[#allocation2 + $0x88] sm:$0xff] %v2591_v63  ;;  %v2103_v59 = vadd.f32 %v2102_v24, %v6482_v17  ;;  %v2391_v47 = vpop.f32.mrb[164].mxu1  ;;  %v2104_v37 = vpop.f32.mrb[165].mxu0  ;;  %v993_v63 = vld [vmem:[#allocation2 + $0xb8] sm:$0xff] }
 0x382   : > { %v2393_v58 = vpop.f32.mrb[165].mxu1  ;;  %v2105_v55 = vpop.f32.mrb[166].mxu0 }
 0x383   : > { %v2392_v1 = vadd.f32 %v2391_v47, %v2103_v59  ;;  %v2106_v6 = vadd.f32 %v2105_v55, %v6484_v27  ;;  %v2394_v21 = vpop.f32.mrb[166].mxu1  ;;  %v2107_v48 = vpop.f32.mrb[167].mxu0 }
 0x384   : > { %v2396_v29 = vpop.f32.mrb[167].mxu1 }
 0x385   : > { %v2592_v19 = vadd.f32 %v2392_v1, %v988_v8  ;;  %v2395_v13 = vadd.f32 %v2394_v21, %v2106_v6  ;;  %v994_v1 = vld [vmem:[#allocation2 + $0xc0] sm:$0xff] }
 0x387   : > { %2656 = vst [vmem:[#allocation2 + $0x90] sm:$0xff] %v2592_v19  ;;  %v2593_v44 = vadd.f32 %v2395_v13, %v989_v31  ;;  %v995_v19 = vld [vmem:[#allocation2 + $0xc8] sm:$0xff] }
 0x388   : > { %v2110_v30 = vpop.f32.mrb[168].mxu0 }
 0x389   : > { %2657 = vst [vmem:[#allocation2 + $0x98] sm:$0xff] %v2593_v44  ;;  %v2111_v17 = vadd.f32 %v2110_v30, %v6488_v36  ;;  %v2399_v52 = vpop.f32.mrb[168].mxu1  ;;  %v2112_v54 = vpop.f32.mrb[169].mxu0 }
 0x38a   : > { %v2401_v62 = vpop.f32.mrb[169].mxu1  ;;  %v2113_v53 = vpop.f32.mrb[170].mxu0 }
 0x38b   : > { %v2400_v42 = vadd.f32 %v2399_v52, %v2111_v17  ;;  %v2114_v27 = vadd.f32 %v2113_v53, %v6490_v46  ;;  %v2402_v26 = vpop.f32.mrb[170].mxu1  ;;  %v2115_v5 = vpop.f32.mrb[171].mxu0  ;;  %v996_v62 = vld [vmem:[#allocation2 + $0xd0] sm:$0xff] }
 0x38c   : > { %v2404_v32 = vpop.f32.mrb[171].mxu1 }
 0x38d   : > { %v2594_v28 = vadd.f32 %v2400_v42, %v990_v57  ;;  %v2403_v35 = vadd.f32 %v2402_v26, %v2114_v27 }
 0x38f   : > { %2658 = vst [vmem:[#allocation2 + $0xa0] sm:$0xff] %v2594_v28  ;;  %v2595_v41 = vadd.f32 %v2403_v35, %v991_v38  ;;  %v997_v38 = vld [vmem:[#allocation2 + $0xd8] sm:$0xff] }
 0x390   : > { %v2118_v2 = vpop.f32.mrb[172].mxu0 }
 0x391   : > { %2659 = vst [vmem:[#allocation2 + $0xa8] sm:$0xff] %v2595_v41  ;;  %v2119_v36 = vadd.f32 %v2118_v2, %v6494_v60  ;;  %v2407_v11 = vpop.f32.mrb[172].mxu1  ;;  %v2120_v49 = vpop.f32.mrb[173].mxu0 }
 0x392   : > { %v2409_v16 = vpop.f32.mrb[173].mxu1  ;;  %v2121_v14 = vpop.f32.mrb[174].mxu0  ;;  %v998_v49 = vld [vmem:[#allocation2 + $0xe0] sm:$0xff] }
 0x393   : > { %v2408_v51 = vadd.f32 %v2407_v11, %v2119_v36  ;;  %v2122_v46 = vadd.f32 %v2121_v14, %v6496_v9  ;;  %v2410_v10 = vpop.f32.mrb[174].mxu1  ;;  %v2123_v12 = vpop.f32.mrb[175].mxu0 }
 0x394   : > { %v2412_v24 = vpop.f32.mrb[175].mxu1 }
 0x395   : > { %v2596_v59 = vadd.f32 %v2408_v51, %v992_v39  ;;  %v2411_v47 = vadd.f32 %v2410_v10, %v2122_v46  ;;  %v999_v10 = vld [vmem:[#allocation2 + $0xe8] sm:$0xff] }
 0x397   : > { %2660 = vst [vmem:[#allocation2 + $0xb0] sm:$0xff] %v2596_v59  ;;  %v2597_v37 = vadd.f32 %v2411_v47, %v993_v63 }
 0x398   : > { %v2126_v8 = vpop.f32.mrb[176].mxu0 }
 0x399   : > { %2661 = vst [vmem:[#allocation2 + $0xb8] sm:$0xff] %v2597_v37  ;;  %v2127_v60 = vadd.f32 %v2126_v8, %v6500_v20  ;;  %v2415_v58 = vpop.f32.mrb[176].mxu1  ;;  %v2128_v55 = vpop.f32.mrb[177].mxu0 }
 0x39a   : > { %v2417_v6 = vpop.f32.mrb[177].mxu1  ;;  %v2129_v21 = vpop.f32.mrb[178].mxu0 }
 0x39b   : > { %v2416_v48 = vadd.f32 %v2415_v58, %v2127_v60  ;;  %v2130_v9 = vadd.f32 %v2129_v21, %v6502_v33  ;;  %v2418_v31 = vpop.f32.mrb[178].mxu1  ;;  %v2131_v29 = vpop.f32.mrb[179].mxu0  ;;  %v1000_v60 = vld [vmem:[#allocation2 + $0xf0] sm:$0xff] }
 0x39c   : > { %v2420_v13 = vpop.f32.mrb[179].mxu1 }
 0x39d   : > { %v2598_v44 = vadd.f32 %v2416_v48, %v994_v1  ;;  %v2419_v30 = vadd.f32 %v2418_v31, %v2130_v9  ;;  %v1001_v48 = vld [vmem:[#allocation2 + $0xf8] sm:$0xff] }
 0x39f   : > { %2662 = vst [vmem:[#allocation2 + $0xc0] sm:$0xff] %v2598_v44  ;;  %v2599_v17 = vadd.f32 %v2419_v30, %v995_v19 }
 0x3a0   : > { %v2134_v52 = vpop.f32.mrb[180].mxu0 }
 0x3a1   : > { %2663 = vst [vmem:[#allocation2 + $0xc8] sm:$0xff] %v2599_v17  ;;  %v2135_v20 = vadd.f32 %v2134_v52, %v6506_v43  ;;  %v2423_v54 = vpop.f32.mrb[180].mxu1  ;;  %v2136_v57 = vpop.f32.mrb[181].mxu0  ;;  %v1002_v17 = vld [vmem:[#allocation2 + $0x100] sm:$0xff] }
 0x3a2   : > { %v2425_v53 = vpop.f32.mrb[181].mxu1  ;;  %v2137_v42 = vpop.f32.mrb[182].mxu0 }
 0x3a3   : > { %v2424_v27 = vadd.f32 %v2423_v54, %v2135_v20  ;;  %v2138_v33 = vadd.f32 %v2137_v42, %v6508_v56  ;;  %v2426_v26 = vpop.f32.mrb[182].mxu1  ;;  %v2139_v5 = vpop.f32.mrb[183].mxu0  ;;  %v1003_v53 = vld [vmem:[#allocation2 + $0x108] sm:$0xff] }
 0x3a4   : > { %v2428_v32 = vpop.f32.mrb[183].mxu1 }
 0x3a5   : > { %v2600_v28 = vadd.f32 %v2424_v27, %v996_v62  ;;  %v2427_v35 = vadd.f32 %v2426_v26, %v2138_v33 }
 0x3a7   : > { %2664 = vst [vmem:[#allocation2 + $0xd0] sm:$0xff] %v2600_v28  ;;  %v2601_v41 = vadd.f32 %v2427_v35, %v997_v38  ;;  %v1004_v28 = vld [vmem:[#allocation2 + $0x110] sm:$0xff] }
 0x3a8   : > { %v2142_v2 = vpop.f32.mrb[184].mxu0 }
 0x3a9   : > { %2665 = vst [vmem:[#allocation2 + $0xd8] sm:$0xff] %v2601_v41  ;;  %v2143_v43 = vadd.f32 %v2142_v2, %v6512_v7  ;;  %v2431_v36 = vpop.f32.mrb[184].mxu1  ;;  %v2144_v11 = vpop.f32.mrb[185].mxu0 }
 0x3aa   : > { %v2433_v39 = vpop.f32.mrb[185].mxu1  ;;  %v2145_v16 = vpop.f32.mrb[186].mxu0  ;;  %v1005_v11 = vld [vmem:[#allocation2 + $0x118] sm:$0xff] }
 0x3ab   : > { %v2432_v14 = vadd.f32 %v2431_v36, %v2143_v43  ;;  %v2146_v56 = vadd.f32 %v2145_v16, %v6514_v22  ;;  %v2434_v51 = vpop.f32.mrb[186].mxu1  ;;  %v2147_v46 = vpop.f32.mrb[187].mxu0 }
 0x3ac   : > { %v2436_v12 = vpop.f32.mrb[187].mxu1 }
 0x3ad   : > { %v2602_v63 = vadd.f32 %v2432_v14, %v998_v49  ;;  %v2435_v24 = vadd.f32 %v2434_v51, %v2146_v56 }
 0x3af   : > { %2666 = vst [vmem:[#allocation2 + $0xe0] sm:$0xff] %v2602_v63  ;;  %v2603_v59 = vadd.f32 %v2435_v24, %v999_v10  ;;  %v1006_v10 = vld [vmem:[#allocation2 + $0x120] sm:$0xff] }
 0x3b0   : > { %v2150_v47 = vpop.f32.mrb[188].mxu0 }
 0x3b1   : > { %2667 = vst [vmem:[#allocation2 + $0xe8] sm:$0xff] %v2603_v59  ;;  %v2151_v7 = vadd.f32 %v2150_v47, %v6518_v34  ;;  %v2439_v37 = vpop.f32.mrb[188].mxu1  ;;  %v2152_v8 = vpop.f32.mrb[189].mxu0 }
 0x3b2   : > { %v2441_v58 = vpop.f32.mrb[189].mxu1  ;;  %v2153_v55 = vpop.f32.mrb[190].mxu0 }
 0x3b3   : > { %v2440_v1 = vadd.f32 %v2439_v37, %v2151_v7  ;;  %v2154_v22 = vadd.f32 %v2153_v55, %v6520_v50  ;;  %v2442_v6 = vpop.f32.mrb[190].mxu1  ;;  %v2155_v21 = vpop.f32.mrb[191].mxu0  ;;  %v1007_v7 = vld [vmem:[#allocation2 + $0x128] sm:$0xff] }
 0x3b4   : > { %v2444_v9 = vpop.f32.mrb[191].mxu1 }
 0x3b5   : > { %v2604_v31 = vadd.f32 %v2440_v1, %v1000_v60  ;;  %v2443_v29 = vadd.f32 %v2442_v6, %v2154_v22  ;;  %v1008_v6 = vld [vmem:[#allocation2 + $0x130] sm:$0xff] }
 0x3b7   : > { %2668 = vst [vmem:[#allocation2 + $0xf0] sm:$0xff] %v2604_v31  ;;  %v2605_v19 = vadd.f32 %v2443_v29, %v1001_v48 }
 0x3b8   : > { %v2158_v13 = vpop.f32.mrb[192].mxu0 }
 0x3b9   : > { %2669 = vst [vmem:[#allocation2 + $0xf8] sm:$0xff] %v2605_v19  ;;  %v2159_v34 = vadd.f32 %v2158_v13, %v6524_v4  ;;  %v2447_v44 = vpop.f32.mrb[192].mxu1  ;;  %v2160_v30 = vpop.f32.mrb[193].mxu0  ;;  %v1009_v19 = vld [vmem:[#allocation2 + $0x138] sm:$0xff] }
 0x3ba   : > { %v2449_v52 = vpop.f32.mrb[193].mxu1  ;;  %v2161_v20 = vpop.f32.mrb[194].mxu0 }
 0x3bb   : > { %v2448_v54 = vadd.f32 %v2447_v44, %v2159_v34  ;;  %v2162_v50 = vadd.f32 %v2161_v20, %v6526_v15  ;;  %v2450_v57 = vpop.f32.mrb[194].mxu1  ;;  %v2163_v62 = vpop.f32.mrb[195].mxu0 }
 0x3bc   : > { %v2452_v42 = vpop.f32.mrb[195].mxu1 }
 0x3bd   : > { %v2606_v27 = vadd.f32 %v2448_v54, %v1002_v17  ;;  %v2451_v33 = vadd.f32 %v2450_v57, %v2162_v50  ;;  %v1010_v54 = vld [vmem:[#allocation2 + $0x140] sm:$0xff] }
 0x3bf   : > { %2670 = vst [vmem:[#allocation2 + $0x100] sm:$0xff] %v2606_v27  ;;  %v2607_v26 = vadd.f32 %v2451_v33, %v1003_v53  ;;  %v1011_v27 = vld [vmem:[#allocation2 + $0x148] sm:$0xff] }
 0x3c0   : > { %v2166_v5 = vpop.f32.mrb[196].mxu0 }
 0x3c1   : > { %2671 = vst [vmem:[#allocation2 + $0x108] sm:$0xff] %v2607_v26  ;;  %v2167_v4 = vadd.f32 %v2166_v5, %v6530_v3  ;;  %v2455_v38 = vpop.f32.mrb[196].mxu1  ;;  %v2168_v32 = vpop.f32.mrb[197].mxu0 }
 0x3c2   : > { %v2457_v35 = vpop.f32.mrb[197].mxu1  ;;  %v2169_v41 = vpop.f32.mrb[198].mxu0  ;;  %v7415_v32 = vld [vmem:[#allocation29_spill] sm:$0xff] }
 0x3c3   : > { %v2456_v2 = vadd.f32 %v2455_v38, %v2167_v4  ;;  %v2170_v15 = vadd.f32 %v2169_v41, %v6532_v45  ;;  %v2458_v43 = vpop.f32.mrb[198].mxu1  ;;  %v2171_v36 = vpop.f32.mrb[199].mxu0  ;;  %v1012_v41 = vld [vmem:[#allocation2 + $0x150] sm:$0xff] }
 0x3c4   : > { %v2460_v49 = vpop.f32.mrb[199].mxu1  ;;  %v7416_v36 = vld [vmem:[#allocation30_spill] sm:$0xff] }
 0x3c5   : > { %v2608_v39 = vadd.f32 %v2456_v2, %v1004_v28  ;;  %v2459_v16 = vadd.f32 %v2458_v43, %v2170_v15 }
 0x3c7   : > { %2672 = vst [vmem:[#allocation2 + $0x110] sm:$0xff] %v2608_v39  ;;  %v2609_v14 = vadd.f32 %v2459_v16, %v1005_v11  ;;  %v1013_v39 = vld [vmem:[#allocation2 + $0x158] sm:$0xff] }
 0x3c8   : > { %v2174_v56 = vpop.f32.mrb[200].mxu0 }
 0x3c9   : > { %2673 = vst [vmem:[#allocation2 + $0x118] sm:$0xff] %v2609_v14  ;;  %v2175_v3 = vadd.f32 %v2174_v56, %v6536_v0  ;;  %v2463_v51 = vpop.f32.mrb[200].mxu1  ;;  %v2176_v46 = vpop.f32.mrb[201].mxu0 }
 0x3ca   : > { %v2465_v12 = vpop.f32.mrb[201].mxu1  ;;  %v2177_v63 = vpop.f32.mrb[202].mxu0  ;;  %v7417_v46 = vld [vmem:[#allocation31_spill] sm:$0xff] }
 0x3cb   : > { %v2464_v24 = vadd.f32 %v2463_v51, %v2175_v3  ;;  %v2178_v45 = vadd.f32 %v2177_v63, %v6538_v25  ;;  %v2466_v59 = vpop.f32.mrb[202].mxu1  ;;  %v2179_v47 = vpop.f32.mrb[203].mxu0 }
 0x3cc   : > { %v2468_v37 = vpop.f32.mrb[203].mxu1 }
 0x3cd   : > { %v2610_v8 = vadd.f32 %v2464_v24, %v1006_v10  ;;  %v2467_v60 = vadd.f32 %v2466_v59, %v2178_v45  ;;  %v1014_v24 = vld [vmem:[#allocation2 + $0x160] sm:$0xff] }
 0x3cf   : > { %2674 = vst [vmem:[#allocation2 + $0x120] sm:$0xff] %v2610_v8  ;;  %v2611_v58 = vadd.f32 %v2467_v60, %v1007_v7  ;;  %v7418_v7 = vld [vmem:[#allocation32_spill] sm:$0xff] }
 0x3d0   : > { %v2182_v55 = vpop.f32.mrb[204].mxu0 }
 0x3d1   : > { %2675 = vst [vmem:[#allocation2 + $0x128] sm:$0xff] %v2611_v58  ;;  %v2183_v0 = vadd.f32 %v2182_v55, %v6542_v40  ;;  %v2471_v1 = vpop.f32.mrb[204].mxu1  ;;  %v2184_v22 = vpop.f32.mrb[205].mxu0  ;;  %v1015_v58 = vld [vmem:[#allocation2 + $0x168] sm:$0xff] }
 0x3d2   : > { %v2473_v21 = vpop.f32.mrb[205].mxu1  ;;  %v2185_v48 = vpop.f32.mrb[206].mxu0 }
 0x3d3   : > { %v2472_v9 = vadd.f32 %v2471_v1, %v2183_v0  ;;  %v2186_v25 = vadd.f32 %v2185_v48, %v6544_v61  ;;  %v2474_v31 = vpop.f32.mrb[206].mxu1  ;;  %v2187_v29 = vpop.f32.mrb[207].mxu0  ;;  %v7419_v21 = vld [vmem:[#allocation33_spill] sm:$0xff] }
 0x3d4   : > { %v2476_v13 = vpop.f32.mrb[207].mxu1 }
 0x3d5   : > { %v2612_v34 = vadd.f32 %v2472_v9, %v1008_v6  ;;  %v2475_v44 = vadd.f32 %v2474_v31, %v2186_v25  ;;  %v1016_v31 = vld [vmem:[#allocation2 + $0x170] sm:$0xff] }
 0x3d7   : > { %2676 = vst [vmem:[#allocation2 + $0x130] sm:$0xff] %v2612_v34  ;;  %v2613_v30 = vadd.f32 %v2475_v44, %v1009_v19  ;;  %v7420_v34 = vld [vmem:[#allocation34_spill] sm:$0xff] }
 0x3d8   : > { %v2190_v17 = vpop.f32.mrb[208].mxu0 }
 0x3d9   : > { %2677 = vst [vmem:[#allocation2 + $0x138] sm:$0xff] %v2613_v30  ;;  %v2191_v40 = vadd.f32 %v2190_v17, %v6548_v18  ;;  %v2479_v52 = vpop.f32.mrb[208].mxu1  ;;  %v2192_v20 = vpop.f32.mrb[209].mxu0 }
 0x3da   : > { %v2481_v50 = vpop.f32.mrb[209].mxu1  ;;  %v2193_v57 = vpop.f32.mrb[210].mxu0 }
 0x3db   : > { %v2480_v62 = vadd.f32 %v2479_v52, %v2191_v40  ;;  %v2194_v61 = vadd.f32 %v2193_v57, %v6550_v23  ;;  %v2482_v53 = vpop.f32.mrb[210].mxu1  ;;  %v2195_v42 = vpop.f32.mrb[211].mxu0  ;;  %v1017_v40 = vld [vmem:[#allocation2 + $0x178] sm:$0xff] }
 0x3dc   : > { %v2484_v33 = vpop.f32.mrb[211].mxu1 }
 0x3dd   : > { %v2614_v26 = vadd.f32 %v2480_v62, %v1010_v54  ;;  %v2483_v5 = vadd.f32 %v2482_v53, %v2194_v61  ;;  %v7421_v62 = vld [vmem:[#allocation35_spill] sm:$0xff] }
 0x3df   : > { %2678 = vst [vmem:[#allocation2 + $0x140] sm:$0xff] %v2614_v26  ;;  %v2615_v4 = vadd.f32 %v2483_v5, %v1011_v27  ;;  %v1018_v27 = vld [vmem:[#allocation2 + $0x180] sm:$0xff] }
 0x3e0   : > { %v2198_v38 = vpop.f32.mrb[212].mxu0 }
 0x3e1   : > { %2679 = vst [vmem:[#allocation2 + $0x148] sm:$0xff] %v2615_v4  ;;  %v2199_v18 = vadd.f32 %v2198_v38, %v7415_v32  ;;  %v2487_v28 = vpop.f32.mrb[212].mxu1  ;;  %v2200_v35 = vpop.f32.mrb[213].mxu0  ;;  %v7422_v4 = vld [vmem:[#allocation36_spill] sm:$0xff] }
 0x3e2   : > { %v2489_v2 = vpop.f32.mrb[213].mxu1  ;;  %v2201_v15 = vpop.f32.mrb[214].mxu0 }
 0x3e3   : > { %v2488_v43 = vadd.f32 %v2487_v28, %v2199_v18  ;;  %v2202_v23 = vadd.f32 %v2201_v15, %v7416_v36  ;;  %v2490_v11 = vpop.f32.mrb[214].mxu1  ;;  %v2203_v49 = vpop.f32.mrb[215].mxu0  ;;  %v1019_v28 = vld [vmem:[#allocation2 + $0x188] sm:$0xff] }
 0x3e4   : > { %v2492_v16 = vpop.f32.mrb[215].mxu1  ;;  %v7423_v36 = vld [vmem:[#allocation37_spill] sm:$0xff] }
 0x3e5   : > { %v2616_v14 = vadd.f32 %v2488_v43, %v1012_v41  ;;  %v2491_v56 = vadd.f32 %v2490_v11, %v2202_v23 }
 0x3e7   : > { %2680 = vst [vmem:[#allocation2 + $0x150] sm:$0xff] %v2616_v14  ;;  %v2617_v3 = vadd.f32 %v2491_v56, %v1013_v39  ;;  %v1020_v39 = vld [vmem:[#allocation2 + $0x190] sm:$0xff] }
 0x3e8   : > { %v2206_v51 = vpop.f32.mrb[216].mxu0 }
 0x3e9   : > { %2681 = vst [vmem:[#allocation2 + $0x158] sm:$0xff] %v2617_v3  ;;  %v2207_v10 = vadd.f32 %v2206_v51, %v7417_v46  ;;  %v2495_v12 = vpop.f32.mrb[216].mxu1  ;;  %v2208_v63 = vpop.f32.mrb[217].mxu0  ;;  %v7424_v3 = vld [vmem:[#allocation38_spill] sm:$0xff] }
 0x3ea   : > { %v2497_v45 = vpop.f32.mrb[217].mxu1  ;;  %v2209_v59 = vpop.f32.mrb[218].mxu0 }
 0x3eb   : > { %v2496_v47 = vadd.f32 %v2495_v12, %v2207_v10  ;;  %v2210_v37 = vadd.f32 %v2209_v59, %v7418_v7  ;;  %v2498_v8 = vpop.f32.mrb[218].mxu1  ;;  %v2211_v60 = vpop.f32.mrb[219].mxu0  ;;  %v1021_v12 = vld [vmem:[#allocation2 + $0x198] sm:$0xff] }
 0x3ec   : > { %v2500_v55 = vpop.f32.mrb[219].mxu1  ;;  %v7425_v7 = vld [vmem:[#allocation39_spill] sm:$0xff] }
 0x3ed   : > { %v2618_v0 = vadd.f32 %v2496_v47, %v1014_v24  ;;  %v2499_v1 = vadd.f32 %v2498_v8, %v2210_v37 }
 0x3ef   : > { %2682 = vst [vmem:[#allocation2 + $0x160] sm:$0xff] %v2618_v0  ;;  %v2619_v22 = vadd.f32 %v2499_v1, %v1015_v58  ;;  %v1022_v58 = vld [vmem:[#allocation2 + $0x1a0] sm:$0xff] }
 0x3f0   : > { %v2214_v6 = vpop.f32.mrb[220].mxu0 }
 0x3f1   : > { %2683 = vst [vmem:[#allocation2 + $0x168] sm:$0xff] %v2619_v22  ;;  %v2215_v48 = vadd.f32 %v2214_v6, %v7419_v21  ;;  %v2503_v9 = vpop.f32.mrb[220].mxu1  ;;  %v2216_v25 = vpop.f32.mrb[221].mxu0  ;;  %v7426_v22 = vld [vmem:[#allocation40_spill] sm:$0xff] }
 0x3f2   : > { %v2505_v29 = vpop.f32.mrb[221].mxu1  ;;  %v2217_v19 = vpop.f32.mrb[222].mxu0 }
 0x3f3   : > { %v2504_v13 = vadd.f32 %v2503_v9, %v2215_v48  ;;  %v2218_v44 = vadd.f32 %v2217_v19, %v7420_v34  ;;  %v2506_v30 = vpop.f32.mrb[222].mxu1  ;;  %v2219_v17 = vpop.f32.mrb[223].mxu0  ;;  %v1023_v9 = vld [vmem:[#allocation2 + $0x1a8] sm:$0xff] }
 0x3f4   : > { %v2508_v52 = vpop.f32.mrb[223].mxu1  ;;  %v7427_v34 = vld [vmem:[#allocation41_spill] sm:$0xff] }
 0x3f5   : > { %v2620_v20 = vadd.f32 %v2504_v13, %v1016_v31  ;;  %v2507_v54 = vadd.f32 %v2506_v30, %v2218_v44 }
 0x3f7   : > { %2684 = vst [vmem:[#allocation2 + $0x170] sm:$0xff] %v2620_v20  ;;  %v2621_v50 = vadd.f32 %v2507_v54, %v1017_v40  ;;  %v1024_v40 = vld [vmem:[#allocation2 + $0x1b0] sm:$0xff] }
 0x3f8   : > { %v2222_v57 = vpop.f32.mrb[224].mxu0 }
 0x3f9   : > { %2685 = vst [vmem:[#allocation2 + $0x178] sm:$0xff] %v2621_v50  ;;  %v2223_v61 = vadd.f32 %v2222_v57, %v7421_v62  ;;  %v2511_v53 = vpop.f32.mrb[224].mxu1  ;;  %v2224_v42 = vpop.f32.mrb[225].mxu0  ;;  %v7428_v50 = vld [vmem:[#allocation42_spill] sm:$0xff] }
 0x3fa   : > { %v2513_v33 = vpop.f32.mrb[225].mxu1  ;;  %v2225_v26 = vpop.f32.mrb[226].mxu0 }
 0x3fb   : > { %v2512_v5 = vadd.f32 %v2511_v53, %v2223_v61  ;;  %v2226_v38 = vadd.f32 %v2225_v26, %v7422_v4  ;;  %v2514_v32 = vpop.f32.mrb[226].mxu1  ;;  %v2227_v18 = vpop.f32.mrb[227].mxu0  ;;  %v1025_v53 = vld [vmem:[#allocation2 + $0x1b8] sm:$0xff] }
 0x3fc   : > { %v2516_v35 = vpop.f32.mrb[227].mxu1  ;;  %v7429_v4 = vld [vmem:[#allocation43_spill] sm:$0xff] }
 0x3fd   : > { %v2622_v41 = vadd.f32 %v2512_v5, %v1018_v27  ;;  %v2515_v2 = vadd.f32 %v2514_v32, %v2226_v38 }
 0x3ff   : > { %2686 = vst [vmem:[#allocation2 + $0x180] sm:$0xff] %v2622_v41  ;;  %v2623_v15 = vadd.f32 %v2515_v2, %v1019_v28  ;;  %v1026_v28 = vld [vmem:[#allocation2 + $0x1c0] sm:$0xff] }
 0x400   : > { %v2230_v43 = vpop.f32.mrb[228].mxu0 }
 0x401   : > { %2687 = vst [vmem:[#allocation2 + $0x188] sm:$0xff] %v2623_v15  ;;  %v2231_v23 = vadd.f32 %v2230_v43, %v7423_v36  ;;  %v2519_v11 = vpop.f32.mrb[228].mxu1  ;;  %v2232_v49 = vpop.f32.mrb[229].mxu0  ;;  %v7430_v15 = vld [vmem:[#allocation44_spill] sm:$0xff] }
 0x402   : > { %v2521_v16 = vpop.f32.mrb[229].mxu1  ;;  %v2233_v14 = vpop.f32.mrb[230].mxu0 }
 0x403   : > { %v2520_v56 = vadd.f32 %v2519_v11, %v2231_v23  ;;  %v2234_v51 = vadd.f32 %v2233_v14, %v7424_v3  ;;  %v2522_v46 = vpop.f32.mrb[230].mxu1  ;;  %v2235_v10 = vpop.f32.mrb[231].mxu0  ;;  %v1027_v11 = vld [vmem:[#allocation2 + $0x1c8] sm:$0xff] }
 0x404   : > { %v2524_v63 = vpop.f32.mrb[231].mxu1  ;;  %v7431_v3 = vld [vmem:[#allocation45_spill] sm:$0xff] }
 0x405   : > { %v2624_v24 = vadd.f32 %v2520_v56, %v1020_v39  ;;  %v2523_v45 = vadd.f32 %v2522_v46, %v2234_v51 }
 0x407   : > { %2688 = vst [vmem:[#allocation2 + $0x190] sm:$0xff] %v2624_v24  ;;  %v2625_v59 = vadd.f32 %v2523_v45, %v1021_v12  ;;  %v1028_v12 = vld [vmem:[#allocation2 + $0x1d0] sm:$0xff] }
 0x408   : > { %v2238_v47 = vpop.f32.mrb[232].mxu0 }
 0x409   : > { %2689 = vst [vmem:[#allocation2 + $0x198] sm:$0xff] %v2625_v59  ;;  %v2239_v37 = vadd.f32 %v2238_v47, %v7425_v7  ;;  %v2527_v8 = vpop.f32.mrb[232].mxu1  ;;  %v2240_v60 = vpop.f32.mrb[233].mxu0  ;;  %v7432_v59 = vld [vmem:[#allocation46_spill] sm:$0xff] }
 0x40a   : > { %v2529_v55 = vpop.f32.mrb[233].mxu1  ;;  %v2241_v0 = vpop.f32.mrb[234].mxu0 }
 0x40b   : > { %v2528_v1 = vadd.f32 %v2527_v8, %v2239_v37  ;;  %v2242_v6 = vadd.f32 %v2241_v0, %v7426_v22  ;;  %v2530_v21 = vpop.f32.mrb[234].mxu1  ;;  %v2243_v48 = vpop.f32.mrb[235].mxu0  ;;  %v1029_v8 = vld [vmem:[#allocation2 + $0x1d8] sm:$0xff] }
 0x40c   : > { %v2532_v25 = vpop.f32.mrb[235].mxu1  ;;  %v7433_v22 = vld [vmem:[#allocation47_spill] sm:$0xff] }
 0x40d   : > { %v2626_v31 = vadd.f32 %v2528_v1, %v1022_v58  ;;  %v2531_v29 = vadd.f32 %v2530_v21, %v2242_v6 }
 0x40f   : > { %2690 = vst [vmem:[#allocation2 + $0x1a0] sm:$0xff] %v2626_v31  ;;  %v2627_v19 = vadd.f32 %v2531_v29, %v1023_v9  ;;  %v1030_v9 = vld [vmem:[#allocation2 + $0x1e0] sm:$0xff] }
 0x410   : > { %v2246_v13 = vpop.f32.mrb[236].mxu0 }
 0x411   : > { %2691 = vst [vmem:[#allocation2 + $0x1a8] sm:$0xff] %v2627_v19  ;;  %v2247_v44 = vadd.f32 %v2246_v13, %v7427_v34  ;;  %v2535_v30 = vpop.f32.mrb[236].mxu1  ;;  %v2248_v17 = vpop.f32.mrb[237].mxu0  ;;  %v7434_v19 = vld [vmem:[#allocation48_spill] sm:$0xff] }
 0x412   : > { %v2537_v52 = vpop.f32.mrb[237].mxu1  ;;  %v2249_v20 = vpop.f32.mrb[238].mxu0 }
 0x413   : > { %v2536_v54 = vadd.f32 %v2535_v30, %v2247_v44  ;;  %v2250_v57 = vadd.f32 %v2249_v20, %v7428_v50  ;;  %v2538_v62 = vpop.f32.mrb[238].mxu1  ;;  %v2251_v61 = vpop.f32.mrb[239].mxu0  ;;  %v1031_v30 = vld [vmem:[#allocation2 + $0x1e8] sm:$0xff] }
 0x414   : > { %v2540_v42 = vpop.f32.mrb[239].mxu1  ;;  %v7435_v50 = vld [vmem:[#allocation49_spill] sm:$0xff] }
 0x415   : > { %v2628_v27 = vadd.f32 %v2536_v54, %v1024_v40  ;;  %v2539_v33 = vadd.f32 %v2538_v62, %v2250_v57 }
 0x417   : > { %2692 = vst [vmem:[#allocation2 + $0x1b0] sm:$0xff] %v2628_v27  ;;  %v2629_v26 = vadd.f32 %v2539_v33, %v1025_v53  ;;  %v1032_v53 = vld [vmem:[#allocation2 + $0x1f0] sm:$0xff] }
 0x418   : > { %v2254_v5 = vpop.f32.mrb[240].mxu0 }
 0x419   : > { %2693 = vst [vmem:[#allocation2 + $0x1b8] sm:$0xff] %v2629_v26  ;;  %v2255_v38 = vadd.f32 %v2254_v5, %v7429_v4  ;;  %v2543_v32 = vpop.f32.mrb[240].mxu1  ;;  %v2256_v18 = vpop.f32.mrb[241].mxu0  ;;  %v7436_v26 = vld [vmem:[#allocation50_spill] sm:$0xff] }
 0x41a   : > { %v2545_v35 = vpop.f32.mrb[241].mxu1  ;;  %v2257_v41 = vpop.f32.mrb[242].mxu0 }
 0x41b   : > { %v2544_v2 = vadd.f32 %v2543_v32, %v2255_v38  ;;  %v2258_v43 = vadd.f32 %v2257_v41, %v7430_v15  ;;  %v2546_v36 = vpop.f32.mrb[242].mxu1  ;;  %v2259_v23 = vpop.f32.mrb[243].mxu0  ;;  %v1033_v32 = vld [vmem:[#allocation2 + $0x1f8] sm:$0xff] }
 0x41c   : > { %v2548_v49 = vpop.f32.mrb[243].mxu1 }
 0x41d   : > { %v2630_v39 = vadd.f32 %v2544_v2, %v1026_v28  ;;  %v2547_v16 = vadd.f32 %v2546_v36, %v2258_v43 }
 0x41f   : > { %2694 = vst [vmem:[#allocation2 + $0x1c0] sm:$0xff] %v2630_v39  ;;  %v2631_v14 = vadd.f32 %v2547_v16, %v1027_v11 }
 0x420   : > { %v2262_v56 = vpop.f32.mrb[244].mxu0 }
 0x421   : > { %2695 = vst [vmem:[#allocation2 + $0x1c8] sm:$0xff] %v2631_v14  ;;  %v2263_v51 = vadd.f32 %v2262_v56, %v7431_v3  ;;  %v2551_v46 = vpop.f32.mrb[244].mxu1  ;;  %v2264_v10 = vpop.f32.mrb[245].mxu0 }
 0x422   : > { %v2553_v63 = vpop.f32.mrb[245].mxu1  ;;  %v2265_v24 = vpop.f32.mrb[246].mxu0 }
 0x423   : > { %v2552_v45 = vadd.f32 %v2551_v46, %v2263_v51  ;;  %v2266_v47 = vadd.f32 %v2265_v24, %v7432_v59  ;;  %v2554_v7 = vpop.f32.mrb[246].mxu1  ;;  %v2267_v37 = vpop.f32.mrb[247].mxu0 }
 0x424   : > { %v2556_v60 = vpop.f32.mrb[247].mxu1 }
 0x425   : > { %v2632_v58 = vadd.f32 %v2552_v45, %v1028_v12  ;;  %v2555_v55 = vadd.f32 %v2554_v7, %v2266_v47 }
 0x427   : > { %2696 = vst [vmem:[#allocation2 + $0x1d0] sm:$0xff] %v2632_v58  ;;  %v2633_v0 = vadd.f32 %v2555_v55, %v1029_v8 }
 0x428   : > { %v2270_v1 = vpop.f32.mrb[248].mxu0 }
 0x429   : > { %2697 = vst [vmem:[#allocation2 + $0x1d8] sm:$0xff] %v2633_v0  ;;  %v2271_v6 = vadd.f32 %v2270_v1, %v7433_v22  ;;  %v2559_v21 = vpop.f32.mrb[248].mxu1  ;;  %v2272_v48 = vpop.f32.mrb[249].mxu0 }
 0x42a   : > { %v2561_v25 = vpop.f32.mrb[249].mxu1  ;;  %v2273_v31 = vpop.f32.mrb[250].mxu0 }
 0x42b   : > { %v2560_v29 = vadd.f32 %v2559_v21, %v2271_v6  ;;  %v2274_v13 = vadd.f32 %v2273_v31, %v7434_v19  ;;  %v2562_v34 = vpop.f32.mrb[250].mxu1  ;;  %v2275_v44 = vpop.f32.mrb[251].mxu0 }
 0x42c   : > { %v2564_v17 = vpop.f32.mrb[251].mxu1 }
 0x42d   : > { %v2634_v40 = vadd.f32 %v2560_v29, %v1030_v9  ;;  %v2563_v52 = vadd.f32 %v2562_v34, %v2274_v13 }
 0x42f   : > { %2698 = vst [vmem:[#allocation2 + $0x1e0] sm:$0xff] %v2634_v40  ;;  %v2635_v20 = vadd.f32 %v2563_v52, %v1031_v30 }
 0x430   : > { %v2278_v54 = vpop.f32.mrb[252].mxu0 }
 0x431   : > { %2699 = vst [vmem:[#allocation2 + $0x1e8] sm:$0xff] %v2635_v20  ;;  %v2279_v57 = vadd.f32 %v2278_v54, %v7435_v50  ;;  %v2567_v62 = vpop.f32.mrb[252].mxu1  ;;  %v2280_v61 = vpop.f32.mrb[253].mxu0 }
 0x432   : > { %v2569_v42 = vpop.f32.mrb[253].mxu1  ;;  %v2281_v27 = vpop.f32.mrb[254].mxu0 }
 0x433   : > { %v2568_v33 = vadd.f32 %v2567_v62, %v2279_v57  ;;  %v2282_v5 = vadd.f32 %v2281_v27, %v7436_v26  ;;  %v2570_v4 = vpop.f32.mrb[254].mxu1  ;;  %v2283_v38 = vpop.f32.mrb[255].mxu0  ;;  %2705 = sbr.rel (%p4663_p3) target bundleno = 1574 (0x626), region = 76 }
 0x434   : > { %v2572_v18 = vpop.f32.mrb[255].mxu1 }
 0x435   : > { %v2636_v28 = vadd.f32 %v2568_v33, %v1032_v53  ;;  %v2571_v35 = vadd.f32 %v2570_v4, %v2282_v5 }
 0x437   : > { %2700 = vst [vmem:[#allocation2 + $0x1f0] sm:$0xff] %v2636_v28  ;;  %v2637_v41 = vadd.f32 %v2571_v35, %v1033_v32 }
 0x439   : > { %2701 = vst [vmem:[#allocation2 + $0x1f8] sm:$0xff] %v2637_v41 }
 0x43a   : > { %v2708_v2 = vld [vmem:[#allocation2 + $0x10] sm:$0xff]  ;;  %v2706_v15 = vld [vmem:[#allocation2] sm:$0xff]  ;;  %v2709_v43 = vld [vmem:[#allocation2 + $0x18] sm:$0xff]  ;;  %v5763_v36 = vmov 16  }
 0x43b   : > { %5247 = vset.pattern.permute.xlu1 %v5763_v36  ;;  %5246 = vset.pattern.permute.xlu0 %v5763_v36  ;;  %v2772_v23 = vmax.f32 %v2708_v2, 1.0  ;;  %v2770_v11 = vmax.f32 %v2706_v15, 1.0  ;;  %v2773_v49 = vmax.f32 %v2709_v43, 1.0  ;;  %v2707_v39 = vld [vmem:[#allocation2 + $0x8] sm:$0xff]  ;;  %v2710_v56 = vld [vmem:[#allocation2 + $0x20] sm:$0xff]  ;;  %v2713_v46 = vld [vmem:[#allocation2 + $0x38] sm:$0xff] }
 0x43c   : > { %v2771_v16 = vmax.f32 %v2707_v39, 1.0  ;;  %v2711_v14 = vld [vmem:[#allocation2 + $0x28] sm:$0xff]  ;;  %v2774_v51 = vmax.f32 %v2710_v56, 1.0  ;;  %v2712_v10 = vld [vmem:[#allocation2 + $0x30] sm:$0xff]  ;;  %v2777_v12 = vmax.f32 %v2713_v46, 1.0  ;;  %v2714_v45 = vld [vmem:[#allocation2 + $0x40] sm:$0xff] }
 0x43d   : > { %5296 = vrcp.f32 %v2772_v23  ;;  %v2775_v3 = vmax.f32 %v2711_v14, 1.0  ;;  %v2776_v63 = vmax.f32 %v2712_v10, 1.0  ;;  %v2715_v24 = vld [vmem:[#allocation2 + $0x48] sm:$0xff]  ;;  %v2778_v37 = vmax.f32 %v2714_v45, 1.0  ;;  %v2717_v8 = vld [vmem:[#allocation2 + $0x58] sm:$0xff]  ;;  %v2716_v58 = vld [vmem:[#allocation2 + $0x50] sm:$0xff] }
 0x43e   : > { %5298 = vrcp.f32 %v2770_v11  ;;  %v2779_v47 = vmax.f32 %v2715_v24, 1.0  ;;  %v2781_v0 = vmax.f32 %v2717_v8, 1.0  ;;  %v2780_v1 = vmax.f32 %v2716_v58, 1.0  ;;  %v2719_v22 = vld [vmem:[#allocation2 + $0x68] sm:$0xff]  ;;  %v5248_v6 = vld [vmem:[#allocation9] sm:$0xff]   ;;  %v2721_v29 = vld [vmem:[#allocation2 + $0x78] sm:$0xff] }
 0x43f   : > { %5300 = vrcp.f32 %v2773_v49  ;;  %v2718_v48 = vld [vmem:[#allocation2 + $0x60] sm:$0xff]  ;;  %4881 = vmatprep.subr.bf16.mxu0 %v5248_v6  ;;  %v2783_v31 = vmax.f32 %v2719_v22, 1.0  ;;  %v5250_v19 = vld [vmem:[#allocation9 + $0x8] sm:$0xff]   ;;  %v6691_v34 = vld [vmem:[#allocation2 + $0x70] sm:$0xff]  ;;  %v2785_v52 = vmax.f32 %v2721_v29, 1.0 }
 0x440   : > { %5302 = vrcp.f32 %v2771_v16  ;;  %v5249_v25 = vld [vmem:[#allocation10] sm:$0xff]   ;;  %4882 = vmatpush3.bf16.msra.mxu0 %v5248_v6  ;;  %v2782_v13 = vmax.f32 %v2718_v48, 1.0  ;;  %v5251_v30 = vld [vmem:[#allocation10 + $0x8] sm:$0xff]   ;;  %v5252_v40 = vld [vmem:[#allocation9 + $0x10] sm:$0xff]   ;;  %v2784_v54 = vmax.f32 %v6691_v34, 1.0 }
 0x441   : > { %5304 = vrcp.f32 %v2775_v3  ;;  %4801 = vmatprep.subr.bf16.mxu1 %v5249_v25  ;;  %4883 = vmatprep.subr.bf16.mxu0 %v5250_v19  ;;  %v6693_v20 = vld [vmem:[#allocation2 + $0x88] sm:$0xff]  ;;  %v5253_v50 = vld [vmem:[#allocation10 + $0x10] sm:$0xff]   ;;  %v6696_v62 = vld [vmem:[#allocation2 + $0x80] sm:$0xff] }
 0x442   : > { %5306 = vrcp.f32 %v2774_v51  ;;  %4802 = vmatpush3.bf16.msra.mxu1 %v5249_v25  ;;  %v5254_v61 = vld [vmem:[#allocation9 + $0x18] sm:$0xff]   ;;  %v2787_v42 = vmax.f32 %v6693_v20, 1.0  ;;  %v2786_v33 = vmax.f32 %v6696_v62, 1.0  ;;  %v5256_v5 = vld [vmem:[#allocation9 + $0x20] sm:$0xff]   ;;  %v6702_v38 = vld [vmem:[#allocation2 + $0x90] sm:$0xff] }
 0x443   : > { %5308 = vrcp.f32 %v2777_v12  ;;  %4803 = vmatprep.subr.bf16.mxu1 %v5251_v30  ;;  %v5255_v27 = vld [vmem:[#allocation10 + $0x18] sm:$0xff]   ;;  %v5257_v18 = vld [vmem:[#allocation10 + $0x20] sm:$0xff]   ;;  %v6705_v35 = vld [vmem:[#allocation2 + $0xa8] sm:$0xff]  ;;  %v2788_v41 = vmax.f32 %v6702_v38, 1.0 }
 0x444   : > { %5310 = vrcp.f32 %v2776_v63  ;;  %4884 = vmatpush3.bf16.msra.mxu0 %v5250_v19  ;;  %v6700_v26 = vld [vmem:[#allocation2 + $0x98] sm:$0xff]  ;;  %v5258_v2 = vld [vmem:[#allocation9 + $0x28] sm:$0xff]   ;;  %v6708_v43 = vld [vmem:[#allocation2 + $0xa0] sm:$0xff]  ;;  %v2791_v49 = vmax.f32 %v6705_v35, 1.0 }
 0x445   : > { %5312 = vrcp.f32 %v2779_v47  ;;  %4885 = vmatprep.subr.bf16.mxu0 %v5252_v40  ;;  %v2789_v28 = vmax.f32 %v6700_v26, 1.0  ;;  %v6710_v23 = vld [vmem:[#allocation2 + $0xb8] sm:$0xff]  ;;  %v5259_v11 = vld [vmem:[#allocation10 + $0x28] sm:$0xff]   ;;  %v6713_v39 = vld [vmem:[#allocation2 + $0xb0] sm:$0xff]  ;;  %v2790_v16 = vmax.f32 %v6708_v43, 1.0 }
 0x446   : > { %5314 = vrcp.f32 %v2778_v37  ;;  %4804 = vmatpush3.bf16.msra.mxu1 %v5251_v30  ;;  %v5260_v14 = vld [vmem:[#allocation9 + $0x30] sm:$0xff]   ;;  %v6716_v46 = vld [vmem:[#allocation2 + $0xc8] sm:$0xff]  ;;  %v5264_v10 = vld [vmem:[%s6149_s0] sm:$0xff]   ;;  %v2793_v12 = vmax.f32 %v6710_v23, 1.0  ;;  %v2792_v24 = vmax.f32 %v6713_v39, 1.0 }
 0x447   : > { %v5297_v59 = vpop.eup %5296  ;;  %5316 = vrcp.f32 %v2781_v0  ;;  %4805 = vmatprep.subr.bf16.mxu1 %v5253_v50  ;;  %v5261_v3 = vld [vmem:[#allocation10 + $0x30] sm:$0xff]   ;;  %v6720_v63 = vld [vmem:[#allocation2 + $0xc0] sm:$0xff]  ;;  %v5262_v45 = vld [vmem:[#allocation9 + $0x38] sm:$0xff]   ;;  %4897 = vmatprep.mubr.bf16.mxu0 %v5264_v10  ;;  %v2795_v8 = vmax.f32 %v6716_v46, 1.0 }
 0x448   : > { %v5299_v7 = vpop.eup %5298  ;;  %2910 = vperm.xlu1 %5247, %v5297_v59   ;;  %5318 = vrcp.f32 %v2780_v1  ;;  %4886 = vmatpush3.bf16.msra.mxu0 %v5252_v40  ;;  %v6723_v47 = vld [vmem:[#allocation2 + $0xd8] sm:$0xff]  ;;  %v6728_v58 = vld [vmem:[#allocation2 + $0xe8] sm:$0xff]  ;;  %v6731_v0 = vld [vmem:[#allocation2 + $0xe0] sm:$0xff] }
 0x449   : > { %v5301_v60 = vpop.eup %5300  ;;  %2900 = vperm.xlu0 %5246, %v5299_v7   ;;  %5320 = vrcp.f32 %v2783_v31  ;;  %4887 = vmatprep.subr.bf16.mxu0 %v5254_v61  ;;  %v5263_v37 = vld [vmem:[#allocation10 + $0x38] sm:$0xff]   ;;  %v5265_v22 = vld [vmem:[%s6149_s0 + $0x8] sm:$0xff]   ;;  %v5266_v48 = vld [vmem:[%s6149_s0 + $0x10] sm:$0xff]   ;;  %v2799_v31 = vmax.f32 %v6728_v58, 1.0  ;;  %v2798_v19 = vmax.f32 %v6731_v0, 1.0 }
 0x44a   : > { %v5303_v55 = vpop.eup %5302  ;;  %5322 = vrcp.f32 %v2782_v13  ;;  %4806 = vmatpush3.bf16.msra.mxu1 %v5253_v50  ;;  %v6733_v1 = vld [vmem:[#allocation2 + $0xf8] sm:$0xff]  ;;  %v6742_v30 = vld [vmem:[#allocation2 + $0xf0] sm:$0xff]  ;;  %v6746_v40 = vld [vmem:[#allocation2 + $0x100] sm:$0xff] }
 0x44b   : > { %v5305_v21 = vpop.eup %5304  ;;  %5324 = vrcp.f32 %v2785_v52  ;;  %4807 = vmatprep.subr.bf16.mxu1 %v5255_v27  ;;  %v2801_v13 = vmax.f32 %v6733_v1, 1.0  ;;  %v5267_v52 = vld [vmem:[%s6149_s0 + $0x18] sm:$0xff]   ;;  %v5268_v50 = vld [vmem:[%s6149_s0 + $0x20] sm:$0xff]   ;;  %v6769_v10 = vld [vmem:[#allocation2 + $0x130] sm:$0xff] }
 0x44c   : > { %2915 = vperm.xlu1 %5247, %v5301_v60   ;;  %v5307_v9 = vpop.eup %5306  ;;  %5326 = vrcp.f32 %v2784_v54  ;;  %4888 = vmatpush3.bf16.msra.mxu0 %v5254_v61  ;;  %v6726_v60 = vld [vmem:[#allocation2 + $0xd0] sm:$0xff]  ;;  %v2800_v61 = vmax.f32 %v6742_v30, 1.0 }
 0x44d   : > { %2905 = vperm.xlu0 %5246, %v5303_v55   ;;  %v5309_v44 = vpop.eup %5308  ;;  %5328 = vrcp.f32 %v2787_v42  ;;  %4889 = vmatprep.subr.bf16.mxu0 %v5256_v5  ;;  %v2794_v55 = vmax.f32 %v6720_v63, 1.0  ;;  %v2796_v25 = vmax.f32 %v6726_v60, 1.0 }
 0x44e   : > { %v5311_v17 = vpop.eup %5310  ;;  %5330 = vrcp.f32 %v2786_v33  ;;  %4808 = vmatpush3.bf16.msra.mxu1 %v5255_v27  ;;  %v2802_v27 = vmax.f32 %v6746_v40, 1.0 }
 0x44f   : > { %v5313_v57 = vpop.eup %5312  ;;  %4809 = vmatprep.subr.bf16.mxu1 %v5257_v18  ;;  %5332 = vrcp.f32 %v2789_v28  ;;  %v5269_v28 = vld [vmem:[%s6149_s0 + $0x28] sm:$0xff]  }
 0x450   : > { %2925 = vperm.xlu1 %5247, %v5305_v21   ;;  %v5315_v53 = vpop.eup %5314  ;;  %4890 = vmatpush3.bf16.msra.mxu0 %v5256_v5  ;;  %5334 = vrcp.f32 %v2788_v41  ;;  %v2797_v21 = vmax.f32 %v6723_v47, 1.0  ;;  %v6753_v5 = vld [vmem:[#allocation2 + $0x118] sm:$0xff] }
 0x451   : > { %2920 = vperm.xlu0 %5246, %v5307_v9   ;;  %v5317_v4 = vpop.eup %5316  ;;  %4891 = vmatprep.subr.bf16.mxu0 %v5258_v2  ;;  %5336 = vrcp.f32 %v2791_v49  ;;  %v2805_v41 = vmax.f32 %v6753_v5, 1.0  ;;  %v6763_v49 = vld [vmem:[#allocation2 + $0x120] sm:$0xff] }
 0x452   : > { %v5319_v32 = vpop.eup %5318  ;;  %4810 = vmatpush3.bf16.msra.mxu1 %v5257_v18  ;;  %5338 = vrcp.f32 %v2790_v16 }
 0x453   : > { %v5321_v15 = vpop.eup %5320  ;;  %4811 = vmatprep.subr.bf16.mxu1 %v5259_v11  ;;  %5340 = vrcp.f32 %v2793_v12 }
 0x454   : > { %2935 = vperm.xlu1 %5247, %v5309_v44   ;;  %v5323_v36 = vpop.eup %5322  ;;  %4892 = vmatpush3.bf16.msra.mxu0 %v5258_v2  ;;  %5342 = vrcp.f32 %v2792_v24  ;;  %v5270_v2 = vld [vmem:[%s6149_s0 + $0x30] sm:$0xff]   ;;  %v5271_v24 = vld [vmem:[%s6149_s0 + $0x38] sm:$0xff]  }
 0x455   : > { %2930 = vperm.xlu0 %5246, %v5311_v17   ;;  %v5325_v56 = vpop.eup %5324  ;;  %4893 = vmatprep.subr.bf16.mxu0 %v5260_v14  ;;  %5344 = vrcp.f32 %v2795_v8  ;;  %v6744_v17 = vld [vmem:[#allocation2 + $0x108] sm:$0xff] }
 0x456   : > { %v5327_v51 = vpop.eup %5326  ;;  %4812 = vmatpush3.bf16.msra.mxu1 %v5259_v11  ;;  %5346 = vrcp.f32 %v2794_v55  ;;  %v2803_v42 = vmax.f32 %v6744_v17, 1.0  ;;  %v6777_v55 = vld [vmem:[#allocation2 + $0x140] sm:$0xff] }
 0x457   : > { %v5329_v59 = vpop.eup %5328  ;;  %4813 = vmatprep.subr.bf16.mxu1 %v5261_v3  ;;  %5348 = vrcp.f32 %v2797_v21  ;;  %v2810_v21 = vmax.f32 %v6777_v55, 1.0 }
 0x458   : > { %2945 = vperm.xlu1 %5247, %v5313_v57   ;;  %v5331_v7 = vpop.eup %5330  ;;  %4894 = vmatpush3.bf16.msra.mxu0 %v5260_v14  ;;  %5350 = vrcp.f32 %v2796_v25  ;;  %v6783_v25 = vld [vmem:[#allocation2 + $0x150] sm:$0xff] }
 0x459   : > { %2940 = vperm.xlu0 %5246, %v5315_v53   ;;  %4895 = vmatprep.subr.bf16.mxu0 %v5262_v45  ;;  %v5333_v6 = vpop.eup %5332  ;;  %5352 = vrcp.f32 %v2799_v31 }
 0x45a   : > { %4814 = vmatpush3.bf16.msra.mxu1 %v5261_v3  ;;  %v5335_v9 = vpop.eup %5334  ;;  %5354 = vrcp.f32 %v2798_v19  ;;  %v6767_v3 = vld [vmem:[#allocation2 + $0x138] sm:$0xff] }
 0x45b   : > { %4815 = vmatprep.subr.bf16.mxu1 %v5263_v37  ;;  %v5337_v29 = vpop.eup %5336  ;;  %5356 = vrcp.f32 %v2801_v13  ;;  %v5274_v13 = vld [vmem:[%s6149_s0 + $0x50] sm:$0xff]  }
 0x45c   : > { %2955 = vperm.xlu1 %5247, %v5317_v4   ;;  %4896 = vmatpush3.bf16.msra.mxu0 %v5262_v45  ;;  %v5339_v44 = vpop.eup %5338  ;;  %v6755_v4 = vld [vmem:[#allocation2 + $0x110] sm:$0xff]  ;;  %5358 = vrcp.f32 %v2800_v61  ;;  %v2809_v45 = vmax.f32 %v6767_v3, 1.0 }
 0x45d   : > { %2950 = vperm.xlu0 %5246, %v5319_v32   ;;  %v5341_v54 = vpop.eup %5340  ;;  %5360 = vrcp.f32 %v2803_v42  ;;  %v6795_v42 = vld [vmem:[#allocation2 + $0x178] sm:$0xff] }
 0x45e   : > { %4816 = vmatpush3.bf16.msra.mxu1 %v5263_v37  ;;  %v5343_v57 = vpop.eup %5342  ;;  %5362 = vrcp.f32 %v2802_v27  ;;  %v6775_v37 = vld [vmem:[#allocation2 + $0x148] sm:$0xff] }
 0x45f   : > { %4898 = vmatmul.mubr.bf16.vlgmr.msra.gmra.mrb[0].mxu0 %v5265_v22  ;;  %v5345_v53 = vpop.eup %5344  ;;  %5364 = vrcp.f32 %v2805_v41  ;;  %v5276_v41 = vld [vmem:[%s6149_s0 + $0x60] sm:$0xff]  }
 0x460   : > { %2965 = vperm.xlu1 %5247, %v5321_v15   ;;  %4901 = vmatprep.mubr.bf16.mxu0 %v5266_v48  ;;  %v5347_v33 = vpop.eup %5346  ;;  %v2804_v15 = vmax.f32 %v6755_v4, 1.0  ;;  %v6781_v48 = vld [vmem:[#allocation2 + $0x158] sm:$0xff] }
 0x461   : > { %2960 = vperm.xlu0 %5246, %v5323_v36   ;;  %v5349_v32 = vpop.eup %5348  ;;  %v6761_v36 = vld [vmem:[#allocation2 + $0x128] sm:$0xff]  ;;  %v2813_v19 = vmax.f32 %v6781_v48, 1.0 }
 0x462   : > { %v5351_v18 = vpop.eup %5350  ;;  %v2807_v14 = vmax.f32 %v6761_v36, 1.0  ;;  %5366 = vrcp.f32 %v2804_v15  ;;  %v6803_v15 = vld [vmem:[#allocation2 + $0x188] sm:$0xff] }
 0x463   : > { %v5353_v11 = vpop.eup %5352 }
 0x464   : > { %2975 = vperm.xlu1 %5247, %v5325_v56   ;;  %v5355_v16 = vpop.eup %5354  ;;  %v2806_v56 = vmax.f32 %v6763_v49, 1.0  ;;  %5368 = vrcp.f32 %v2807_v14 }
 0x465   : > { %2970 = vperm.xlu0 %5246, %v5327_v51   ;;  %v5357_v51 = vpop.eup %5356 }
 0x466   : > { %v5359_v12 = vpop.eup %5358  ;;  %5370 = vrcp.f32 %v2806_v56  ;;  %v2819_v56 = vmax.f32 %v6803_v15, 1.0 }
 0x467   : > { %4902 = vmatmul.mubr.bf16.gmra.mrb[4].mxu0 %v5267_v52  ;;  %v5361_v8 = vpop.eup %5360  ;;  %5372 = vrcp.f32 %v2809_v45  ;;  %v6789_v52 = vld [vmem:[#allocation2 + $0x168] sm:$0xff]  ;;  %v6811_v45 = vld [vmem:[#allocation2 + $0x190] sm:$0xff] }
 0x468   : > { %2985 = vperm.xlu1 %5247, %v5329_v59   ;;  %4905 = vmatprep.mubr.bf16.mxu0 %v5268_v50  ;;  %v5272_v59 = vld [vmem:[%s6149_s0 + $0x40] sm:$0xff]   ;;  %v5363_v22 = vpop.eup %5362  ;;  %v2815_v61 = vmax.f32 %v6789_v52, 1.0 }
 0x469   : > { %2980 = vperm.xlu0 %5246, %v5331_v7   ;;  %v2808_v7 = vmax.f32 %v6769_v10, 1.0  ;;  %v6791_v50 = vld [vmem:[#allocation2 + $0x160] sm:$0xff] }
 0x46b   : > { %5374 = vrcp.f32 %v2808_v7  ;;  %v5277_v7 = vld [vmem:[%s6149_s0 + $0x68] sm:$0xff]  }
 0x46c   : > { %2995 = vperm.xlu1 %5247, %v5333_v6   ;;  %v2811_v6 = vmax.f32 %v6775_v37, 1.0 }
 0x46d   : > { %2990 = vperm.xlu0 %5246, %v5335_v9   ;;  %v5365_v9 = vpop.eup %5364 }
 0x46e   : > { %v5367_v31 = vpop.eup %5366  ;;  %5376 = vrcp.f32 %v2811_v6  ;;  %v2820_v6 = vmax.f32 %v6811_v45, 1.0 }
 0x46f   : > { %4906 = vmatmul.mubr.bf16.gmra.mrb[8].mxu0 %v5269_v28  ;;  %5378 = vrcp.f32 %v2810_v21  ;;  %v2817_v28 = vmax.f32 %v6795_v42, 1.0  ;;  %v6817_v21 = vld [vmem:[#allocation2 + $0x1a8] sm:$0xff] }
 0x470   : > { %3005 = vperm.xlu1 %5247, %v5337_v29   ;;  %4909 = vmatprep.mubr.bf16.mxu0 %v5270_v2  ;;  %v5273_v29 = vld [vmem:[%s6149_s0 + $0x48] sm:$0xff]   ;;  %5380 = vrcp.f32 %v2813_v19  ;;  %v2823_v19 = vmax.f32 %v6817_v21, 1.0 }
 0x471   : > { %3000 = vperm.xlu0 %5246, %v5339_v44   ;;  %v2812_v44 = vmax.f32 %v6783_v25, 1.0 }
 0x473   : > { %5382 = vrcp.f32 %v2812_v44  ;;  %v6823_v44 = vld [vmem:[#allocation2 + $0x1b8] sm:$0xff] }
 0x474   : > { %3015 = vperm.xlu1 %5247, %v5341_v54   ;;  %v5369_v54 = vpop.eup %5368  ;;  %5384 = vrcp.f32 %v2815_v61 }
 0x475   : > { %3010 = vperm.xlu0 %5246, %v5343_v57   ;;  %v5371_v57 = vpop.eup %5370 }
 0x476   : > { %v5373_v27 = vpop.eup %5372 }
 0x477   : > { %4910 = vmatmul.mubr.bf16.gmra.mrb[12].mxu0 %v5271_v24 }
 0x478   : > { %3025 = vperm.xlu1 %5247, %v5345_v53   ;;  %4913 = vmatprep.mubr.bf16.mxu0 %v5272_v59  ;;  %v2814_v53 = vmax.f32 %v6791_v50, 1.0 }
 0x479   : > { %3020 = vperm.xlu0 %5246, %v5347_v33   ;;  %v6797_v33 = vld [vmem:[#allocation2 + $0x170] sm:$0xff] }
 0x47a   : > { %5386 = vrcp.f32 %v2814_v53  ;;  %v2816_v2 = vmax.f32 %v6797_v33, 1.0  ;;  %v5279_v53 = vld [vmem:[%s6149_s0 + $0x78] sm:$0xff]  }
 0x47b   : > { %5388 = vrcp.f32 %v2817_v28  ;;  %v6831_v28 = vld [vmem:[#allocation2 + $0x1c8] sm:$0xff] }
 0x47c   : > { %3035 = vperm.xlu1 %5247, %v5349_v32   ;;  %v5375_v32 = vpop.eup %5374  ;;  %5390 = vrcp.f32 %v2816_v2  ;;  %v6833_v2 = vld [vmem:[#allocation2 + $0x1c0] sm:$0xff] }
 0x47d   : > { %3030 = vperm.xlu0 %5246, %v5351_v18   ;;  %v5275_v18 = vld [vmem:[%s6149_s0 + $0x58] sm:$0xff]   ;;  %5392 = vrcp.f32 %v2819_v56  ;;  %7437 = vst [vmem:[#allocation51_spill] sm:$0xff] %v6833_v2  ;;  %v2826_v56 = vmax.f32 %v6833_v2, 1.0 }
 0x47f   : > { %4914 = vmatmul.mubr.bf16.gmra.mrb[16].mxu0 %v5273_v29 }
 0x480   : > { %3045 = vperm.xlu1 %5247, %v5353_v11   ;;  %4917 = vmatprep.mubr.bf16.mxu0 %v5274_v13  ;;  %v5377_v11 = vpop.eup %5376 }
 0x481   : > { %3040 = vperm.xlu0 %5246, %v5355_v16   ;;  %v6805_v16 = vld [vmem:[#allocation2 + $0x180] sm:$0xff]  ;;  %v5379_v14 = vpop.eup %5378 }
 0x482   : > { %v5381_v24 = vpop.eup %5380 }
 0x483   : > { %v5383_v59 = vpop.eup %5382 }
 0x484   : > { %3055 = vperm.xlu1 %5247, %v5357_v51   ;;  %v2818_v51 = vmax.f32 %v6805_v16, 1.0 }
 0x485   : > { %3050 = vperm.xlu0 %5246, %v5359_v12   ;;  %v6809_v12 = vld [vmem:[#allocation2 + $0x198] sm:$0xff] }
 0x486   : > { %5394 = vrcp.f32 %v2818_v51  ;;  %v6837_v51 = vld [vmem:[#allocation2 + $0x1d8] sm:$0xff] }
 0x487   : > { %4918 = vmatmul.mubr.bf16.gmra.mrb[20].mxu0 %v5275_v18  ;;  %7438 = vst [vmem:[#allocation52_spill] sm:$0xff] %v6837_v51 }
 0x488   : > { %3065 = vperm.xlu1 %5247, %v5361_v8   ;;  %4921 = vmatprep.mubr.bf16.mxu0 %v5276_v41  ;;  %v2821_v8 = vmax.f32 %v6809_v12, 1.0 }
 0x489   : > { %3060 = vperm.xlu0 %5246, %v5363_v22   ;;  %v5278_v22 = vld [vmem:[%s6149_s0 + $0x70] sm:$0xff]  }
 0x48a   : > { %5396 = vrcp.f32 %v2821_v8  ;;  %v5281_v8 = vld [vmem:[%s6149_s0 + $0x88] sm:$0xff]  }
 0x48b   : > { %5398 = vrcp.f32 %v2820_v6  ;;  %v5282_v6 = vld [vmem:[%s6149_s0 + $0x90] sm:$0xff]  }
 0x48c   : > { %3075 = vperm.xlu1 %5247, %v5365_v9   ;;  %v5385_v9 = vpop.eup %5384  ;;  %5400 = vrcp.f32 %v2823_v19 }
 0x48d   : > { %3070 = vperm.xlu0 %5246, %v5367_v31   ;;  %v6819_v31 = vld [vmem:[#allocation2 + $0x1a0] sm:$0xff]  ;;  %v5387_v29 = vpop.eup %5386 }
 0x48e   : > { %v2822_v13 = vmax.f32 %v6819_v31, 1.0 }
 0x48f   : > { %4922 = vmatmul.mubr.bf16.gmra.mrb[24].mxu0 %v5277_v7 }
 0x490   : > { %3085 = vperm.xlu1 %5247, %v5369_v54   ;;  %4925 = vmatprep.mubr.bf16.mxu0 %v5278_v22  ;;  %v5389_v54 = vpop.eup %5388  ;;  %5402 = vrcp.f32 %v2822_v13  ;;  %v2829_v22 = vmax.f32 %v6837_v51, 1.0  ;;  %v6847_v13 = vld [vmem:[#allocation2 + $0x1e0] sm:$0xff] }
 0x491   : > { %3080 = vperm.xlu0 %5246, %v5371_v57   ;;  %v6825_v57 = vld [vmem:[#allocation2 + $0x1b0] sm:$0xff]  ;;  %v5391_v61 = vpop.eup %5390  ;;  %7441 = vst [vmem:[#allocation55_spill] sm:$0xff] %v6847_v13  ;;  %v5429_v51 = vld [vmem:[#allocation2 + $0x20] sm:$0xff] }
 0x492   : > { %v2824_v18 = vmax.f32 %v6825_v57, 1.0  ;;  %v5393_v41 = vpop.eup %5392 }
 0x494   : > { %3095 = vperm.xlu1 %5247, %v5373_v27   ;;  %v2825_v27 = vmax.f32 %v6823_v44, 1.0 }
 0x495   : > { %3090 = vperm.xlu0 %5246, %v5375_v32   ;;  %v5280_v32 = vld [vmem:[%s6149_s0 + $0x80] sm:$0xff]  }
 0x496   : > { %5404 = vrcp.f32 %v2825_v27  ;;  %v6851_v27 = vld [vmem:[#allocation2 + $0x1f8] sm:$0xff] }
 0x497   : > { %4926 = vmatmul.mubr.bf16.gmra.mrb[28].mxu0 %v5279_v53  ;;  %5406 = vrcp.f32 %v2824_v18  ;;  %v2830_v53 = vmax.f32 %v6847_v13, 1.0  ;;  %7442 = vst [vmem:[#allocation56_spill] sm:$0xff] %v6851_v27  ;;  %v6853_v18 = vld [vmem:[#allocation2 + $0x1f0] sm:$0xff] }
 0x498   : > { %3105 = vperm.xlu1 %5247, %v5377_v11   ;;  %v5395_v11 = vpop.eup %5394  ;;  %4929 = vmatprep.mubr.bf16.mxu0 %v5280_v32  ;;  %7443 = vst [vmem:[#allocation57_spill] sm:$0xff] %v6853_v18 }
 0x499   : > { %3100 = vperm.xlu0 %5246, %v5379_v14   ;;  %v2827_v14 = vmax.f32 %v6831_v28, 1.0 }
 0x49b   : > { %5408 = vrcp.f32 %v2827_v14  ;;  %v2833_v14 = vmax.f32 %v6851_v27, 1.0  ;;  %v5427_v27 = vld [vmem:[#allocation2 + $0x8] sm:$0xff] }
 0x49c   : > { %3115 = vperm.xlu1 %5247, %v5381_v24   ;;  %v5397_v24 = vpop.eup %5396  ;;  %5410 = vrcp.f32 %v2826_v56  ;;  %v5284_v56 = vld [vmem:[%s6149_s0 + $0xa0] sm:$0xff]  }
 0x49d   : > { %3110 = vperm.xlu0 %5246, %v5383_v59   ;;  %v6839_v59 = vld [vmem:[#allocation2 + $0x1d0] sm:$0xff]  ;;  %v5399_v7 = vpop.eup %5398  ;;  %5412 = vrcp.f32 %v2829_v22 }
 0x49e   : > { %7439 = vst [vmem:[#allocation53_spill] sm:$0xff] %v6839_v59  ;;  %v5401_v19 = vpop.eup %5400 }
 0x49f   : > { %4930 = vmatmul.mubr.bf16.gmra.mrb[32].mxu0 %v5281_v8 }
 0x4a0   : > { %3125 = vperm.xlu1 %5247, %v5385_v9   ;;  %v2828_v9 = vmax.f32 %v6839_v59, 1.0  ;;  %4933 = vmatprep.mubr.bf16.mxu0 %v5282_v6 }
 0x4a1   : > { %3120 = vperm.xlu0 %5246, %v5387_v29   ;;  %v6845_v29 = vld [vmem:[#allocation2 + $0x1e8] sm:$0xff] }
 0x4a2   : > { %7440 = vst [vmem:[#allocation54_spill] sm:$0xff] %v6845_v29  ;;  %5414 = vrcp.f32 %v2828_v9  ;;  %v5285_v9 = vld [vmem:[%s6149_s0 + $0xa8] sm:$0xff]  }
 0x4a4   : > { %3135 = vperm.xlu1 %5247, %v5389_v54   ;;  %v5403_v54 = vpop.eup %5402 }
 0x4a5   : > { %3130 = vperm.xlu0 %5246, %v5391_v61   ;;  %v2831_v61 = vmax.f32 %v6845_v29, 1.0  ;;  %v5405_v32 = vpop.eup %5404 }
 0x4a7   : > { %5416 = vrcp.f32 %v2831_v61 }
 0x4a8   : > { %3145 = vperm.xlu1 %5247, %v5393_v41   ;;  %v5407_v41 = vpop.eup %5406  ;;  %5418 = vrcp.f32 %v2830_v53 }
 0x4a9   : > { %3140 = vperm.xlu0 %5246, %v5395_v11   ;;  %v5283_v11 = vld [vmem:[%s6149_s0 + $0x98] sm:$0xff]   ;;  %5420 = vrcp.f32 %v2833_v14 }
 0x4aa   : > { %4934 = vmatmul.mubr.bf16.gmra.mrb[36].mxu0 %v5283_v11  ;;  %v5288_v11 = vld [vmem:[%s6149_s0 + $0xc0] sm:$0xff]  }
 0x4ab   : > { %4937 = vmatprep.mubr.bf16.mxu0 %v5284_v56 }
 0x4ac   : > { %3155 = vperm.xlu1 %5247, %v5397_v24   ;;  %v2832_v24 = vmax.f32 %v6853_v18, 1.0 }
 0x4ad   : > { %3150 = vperm.xlu0 %5246, %v5399_v7   ;;  %v5409_v7 = vpop.eup %5408 }
 0x4ae   : > { %v5411_v8 = vpop.eup %5410  ;;  %5422 = vrcp.f32 %v2832_v24  ;;  %v5289_v24 = vld [vmem:[%s6149_s0 + $0xc8] sm:$0xff]  }
 0x4af   : > { %v5413_v22 = vpop.eup %5412 }
 0x4b0   : > { %3165 = vperm.xlu1 %5247, %v5401_v19   ;;  %v5415_v6 = vpop.eup %5414  ;;  %v5286_v19 = vld [vmem:[%s6149_s0 + $0xb0] sm:$0xff]  }
 0x4b1   : > { %3160 = vperm.xlu0 %5246, %v5403_v54   ;;  %v5417_v54 = vpop.eup %5416 }
 0x4b2   : > { %v5419_v61 = vpop.eup %5418  ;;  %4938 = vmatmul.mubr.bf16.gmra.mrb[40].mxu0 %v5285_v9  ;;  %v5425_v9 = vld [vmem:[#allocation2 + $0x18] sm:$0xff] }
 0x4b3   : > { %4941 = vmatprep.mubr.bf16.mxu0 %v5286_v19  ;;  %v5421_v53 = vpop.eup %5420 }
 0x4b4   : > { %3175 = vperm.xlu1 %5247, %v5405_v32  }
 0x4b5   : > { %3170 = vperm.xlu0 %5246, %v5407_v41   ;;  %v5287_v41 = vld [vmem:[%s6149_s0 + $0xb8] sm:$0xff]  }
 0x4b8   : > { %3185 = vperm.xlu1 %5247, %v5409_v7   ;;  %v5423_v32 = vpop.eup %5422 }
 0x4b9   : > { %3180 = vperm.xlu0 %5246, %v5411_v8   ;;  %v5290_v8 = vld [vmem:[%s6149_s0 + $0xd0] sm:$0xff]  }
 0x4ba   : > { %4942 = vmatmul.mubr.bf16.gmra.mrb[44].mxu0 %v5287_v41 }
 0x4bb   : > { %4945 = vmatprep.mubr.bf16.mxu0 %v5288_v11  ;;  %v5428_v11 = vld [vmem:[#allocation2 + $0x28] sm:$0xff] }
 0x4bc   : > { %3195 = vperm.xlu1 %5247, %v5413_v22   ;;  %v5424_v22 = vld [vmem:[#allocation2 + $0x10] sm:$0xff] }
 0x4bd   : > { %3190 = vperm.xlu0 %5246, %v5415_v6  }
 0x4c0   : > { %3205 = vperm.xlu1 %5247, %v5417_v54   ;;  %v5426_v54 = vld [vmem:[#allocation2] sm:$0xff] }
 0x4c1   : > { %3200 = vperm.xlu0 %5246, %v5419_v61  }
 0x4c2   : > { %4946 = vmatmul.mubr.bf16.gmra.mrb[48].mxu0 %v5289_v24 }
 0x4c3   : > { %4949 = vmatprep.mubr.bf16.mxu0 %v5290_v8 }
 0x4c4   : > { %3215 = vperm.xlu1 %5247, %v5421_v53  }
 0x4c5   : > { %3210 = vperm.xlu0 %5246, %v5423_v32  }
 0x4c7   : > { %v2911_v14 = vpop.permute.xlu1 %2910 }
 0x4c8   : > { %v2901_v56 = vpop.permute.xlu0 %2900  ;;  %v3220_v6 = vmul.f32 %v5424_v22, %v2911_v14  ;;  %v5291_v14 = vld [vmem:[%s6149_s0 + $0xd8] sm:$0xff]  }
 0x4c9   : > { %v3218_v61 = vmul.f32 %v5426_v54, %v2901_v56  ;;  %v5430_v56 = vld [vmem:[#allocation2 + $0x38] sm:$0xff]  ;;  %v5433_v54 = vld [vmem:[#allocation2 + $0x40] sm:$0xff] }
 0x4ca   : > { %4950 = vmatmul.mubr.bf16.gmra.mrb[52].mxu0 %v5291_v14 }
 0x4cb   : > { %v2916_v7 = vpop.permute.xlu1 %2915 }
 0x4cc   : > { %v3221_v18 = vmul.f32 %v5425_v9, %v2916_v7  ;;  %v2906_v19 = vpop.permute.xlu0 %2905  ;;  %v5292_v9 = vld [vmem:[%s6149_s0 + $0xe0] sm:$0xff]  }
 0x4cd   : > { %v3219_v13 = vmul.f32 %v5427_v27, %v2906_v19  ;;  %4953 = vmatprep.mubr.bf16.mxu0 %v5292_v9 }
 0x4ce   : > { %v3283_v53 = vpack.c.bf16 %v3221_v18, %v3220_v6  ;;  %v5431_v18 = vld [vmem:[#allocation2 + $0x30] sm:$0xff]  ;;  %v5432_v6 = vld [vmem:[#allocation2 + $0x48] sm:$0xff] }
 0x4cf   : > { %v2926_v32 = vpop.permute.xlu1 %2925  ;;  %v3282_v41 = vpack.c.bf16 %v3219_v13, %v3218_v61 }
 0x4d0   : > { %v3223_v29 = vmul.f32 %v5428_v11, %v2926_v32  ;;  %v2921_v59 = vpop.permute.xlu0 %2920  ;;  %v5294_v32 = vld [vmem:[%s6149_s0 + $0xf0] sm:$0xff]  }
 0x4d1   : > { %v3222_v2 = vmul.f32 %v5429_v51, %v2921_v59  ;;  %4817 = vmatprep.mubr.bf16.mxu1 %v3282_v41  ;;  %v5434_v41 = vld [vmem:[#allocation2 + $0x58] sm:$0xff] }
 0x4d2   : > { %4818 = vmatmul.mubr.bf16.vlgmr.msra.gmra.mrb[0].mxu1 %v3283_v53 }
 0x4d3   : > { %v3284_v7 = vpack.c.bf16 %v3223_v29, %v3222_v2  ;;  %v2936_v22 = vpop.permute.xlu1 %2935  ;;  %v5293_v2 = vld [vmem:[%s6149_s0 + $0xe8] sm:$0xff]  }
 0x4d4   : > { %v3225_v27 = vmul.f32 %v5430_v56, %v2936_v22  ;;  %v2931_v19 = vpop.permute.xlu0 %2930  ;;  %v5435_v56 = vld [vmem:[#allocation2 + $0x50] sm:$0xff]  ;;  %4954 = vmatmul.mubr.bf16.gmra.mrb[56].mxu0 %v5293_v2 }
 0x4d5   : > { %v3224_v24 = vmul.f32 %v5431_v18, %v2931_v19  ;;  %4821 = vmatprep.mubr.bf16.mxu1 %v3284_v7  ;;  %4957 = vmatprep.mubr.bf16.mxu0 %v5294_v32 }
 0x4d7   : > { %v3285_v13 = vpack.c.bf16 %v3225_v27, %v3224_v24  ;;  %v2946_v8 = vpop.permute.xlu1 %2945  ;;  %v5436_v27 = vld [vmem:[#allocation2 + $0x68] sm:$0xff]  ;;  %v5437_v24 = vld [vmem:[#allocation2 + $0x60] sm:$0xff] }
 0x4d8   : > { %v3227_v51 = vmul.f32 %v5432_v6, %v2946_v8  ;;  %v2941_v59 = vpop.permute.xlu0 %2940  ;;  %v5295_v8 = vld [vmem:[%s6149_s0 + $0xf8] sm:$0xff]  }
 0x4d9   : > { %v3226_v61 = vmul.f32 %v5433_v54, %v2941_v59  ;;  %v5438_v59 = vld [vmem:[#allocation2 + $0x78] sm:$0xff] }
 0x4da   : > { %4822 = vmatmul.mubr.bf16.gmra.mrb[4].mxu1 %v3285_v13 }
 0x4db   : > { %v3286_v29 = vpack.c.bf16 %v3227_v51, %v3226_v61  ;;  %v2956_v53 = vpop.permute.xlu1 %2955 }
 0x4dc   : > { %v3229_v11 = vmul.f32 %v5434_v41, %v2956_v53  ;;  %v2951_v22 = vpop.permute.xlu0 %2950  ;;  %4958 = vmatmul.mubr.bf16.gmra.mrb[60].mxu0 %v5295_v8 }
 0x4dd   : > { %v3228_v7 = vmul.f32 %v5435_v56, %v2951_v22  ;;  %4825 = vmatprep.mubr.bf16.mxu1 %v3286_v29 }
 0x4df   : > { %v3287_v14 = vpack.c.bf16 %v3229_v11, %v3228_v7  ;;  %v2966_v9 = vpop.permute.xlu1 %2965 }
 0x4e0   : > { %v3231_v19 = vmul.f32 %v5436_v27, %v2966_v9  ;;  %v2961_v18 = vpop.permute.xlu0 %2960 }
 0x4e1   : > { %v3230_v13 = vmul.f32 %v5437_v24, %v2961_v18 }
 0x4e2   : > { %4826 = vmatmul.mubr.bf16.gmra.mrb[8].mxu1 %v3287_v14 }
 0x4e3   : > { %v3288_v6 = vpack.c.bf16 %v3231_v19, %v3230_v13  ;;  %v2976_v51 = vpop.permute.xlu1 %2975 }
 0x4e4   : > { %v3233_v54 = vmul.f32 %v5438_v59, %v2976_v51  ;;  %v2971_v61 = vpop.permute.xlu0 %2970 }
 0x4e5   : > { %v3232_v53 = vmul.f32 %v2971_v61, %v6691_v34  ;;  %4829 = vmatprep.mubr.bf16.mxu1 %v3288_v6 }
 0x4e7   : > { %v3289_v2 = vpack.c.bf16 %v3233_v54, %v3232_v53  ;;  %v2986_v29 = vpop.permute.xlu1 %2985 }
 0x4e8   : > { %v3235_v32 = vmul.f32 %v2986_v29, %v6693_v20  ;;  %v2981_v41 = vpop.permute.xlu0 %2980 }
 0x4e9   : > { %v3234_v11 = vmul.f32 %v2981_v41, %v6696_v62 }
 0x4ea   : > { %4830 = vmatmul.mubr.bf16.gmra.mrb[12].mxu1 %v3289_v2 }
 0x4eb   : > { %v3290_v22 = vpack.c.bf16 %v3235_v32, %v3234_v11  ;;  %v2996_v56 = vpop.permute.xlu1 %2995 }
 0x4ec   : > { %v3237_v7 = vmul.f32 %v2996_v56, %v6700_v26  ;;  %v2991_v14 = vpop.permute.xlu0 %2990 }
 0x4ed   : > { %v3236_v9 = vmul.f32 %v2991_v14, %v6702_v38  ;;  %4833 = vmatprep.mubr.bf16.mxu1 %v3290_v22 }
 0x4ef   : > { %v3291_v27 = vpack.c.bf16 %v3237_v7, %v3236_v9  ;;  %v3006_v34 = vpop.permute.xlu1 %3005 }
 0x4f0   : > { %v3239_v19 = vmul.f32 %v3006_v34, %v6705_v35  ;;  %v3001_v18 = vpop.permute.xlu0 %3000 }
 0x4f1   : > { %v3238_v24 = vmul.f32 %v3001_v18, %v6708_v43 }
 0x4f2   : > { %4834 = vmatmul.mubr.bf16.gmra.mrb[16].mxu1 %v3291_v27 }
 0x4f3   : > { %v3292_v20 = vpack.c.bf16 %v3239_v19, %v3238_v24  ;;  %v3016_v13 = vpop.permute.xlu1 %3015 }
 0x4f4   : > { %v3241_v62 = vmul.f32 %v3016_v13, %v6710_v23  ;;  %v3011_v8 = vpop.permute.xlu0 %3010 }
 0x4f5   : > { %v3240_v6 = vmul.f32 %v3011_v8, %v6713_v39  ;;  %4837 = vmatprep.mubr.bf16.mxu1 %v3292_v20 }
 0x4f7   : > { %v3293_v26 = vpack.c.bf16 %v3241_v62, %v3240_v6  ;;  %v3026_v51 = vpop.permute.xlu1 %3025 }
 0x4f8   : > { %v3243_v38 = vmul.f32 %v3026_v51, %v6716_v46  ;;  %v3021_v59 = vpop.permute.xlu0 %3020 }
 0x4f9   : > { %v3242_v54 = vmul.f32 %v3021_v59, %v6720_v63 }
 0x4fa   : > { %4838 = vmatmul.mubr.bf16.gmra.mrb[20].mxu1 %v3293_v26 }
 0x4fb   : > { %v3294_v35 = vpack.c.bf16 %v3243_v38, %v3242_v54  ;;  %v3036_v61 = vpop.permute.xlu1 %3035 }
 0x4fc   : > { %v3245_v43 = vmul.f32 %v3036_v61, %v6723_v47  ;;  %v3031_v53 = vpop.permute.xlu0 %3030 }
 0x4fd   : > { %v3244_v2 = vmul.f32 %v3031_v53, %v6726_v60  ;;  %4841 = vmatprep.mubr.bf16.mxu1 %v3294_v35 }
 0x4ff   : > { %v3295_v23 = vpack.c.bf16 %v3245_v43, %v3244_v2  ;;  %v3046_v29 = vpop.permute.xlu1 %3045 }
 0x500   : > { %v3247_v39 = vmul.f32 %v3046_v29, %v6728_v58  ;;  %v3041_v32 = vpop.permute.xlu0 %3040 }
 0x501   : > { %v3246_v41 = vmul.f32 %v3041_v32, %v6731_v0 }
 0x502   : > { %4842 = vmatmul.mubr.bf16.gmra.mrb[24].mxu1 %v3295_v23 }
 0x503   : > { %v3296_v46 = vpack.c.bf16 %v3247_v39, %v3246_v41  ;;  %v3056_v11 = vpop.permute.xlu1 %3055 }
 0x504   : > { %v3249_v63 = vmul.f32 %v3056_v11, %v6733_v1  ;;  %v3051_v22 = vpop.permute.xlu0 %3050 }
 0x505   : > { %v3248_v56 = vmul.f32 %v3051_v22, %v6742_v30  ;;  %4845 = vmatprep.mubr.bf16.mxu1 %v3296_v46 }
 0x507   : > { %v3297_v47 = vpack.c.bf16 %v3249_v63, %v3248_v56  ;;  %v3066_v7 = vpop.permute.xlu1 %3065 }
 0x508   : > { %v3251_v60 = vmul.f32 %v3066_v7, %v6744_v17  ;;  %v3061_v14 = vpop.permute.xlu0 %3060 }
 0x509   : > { %v3250_v9 = vmul.f32 %v3061_v14, %v6746_v40 }
 0x50a   : > { %4846 = vmatmul.mubr.bf16.gmra.mrb[28].mxu1 %v3297_v47 }
 0x50b   : > { %v3298_v58 = vpack.c.bf16 %v3251_v60, %v3250_v9  ;;  %v3076_v27 = vpop.permute.xlu1 %3075 }
 0x50c   : > { %v3253_v0 = vmul.f32 %v3076_v27, %v6753_v5  ;;  %v3071_v34 = vpop.permute.xlu0 %3070 }
 0x50d   : > { %v3252_v19 = vmul.f32 %v3071_v34, %v6755_v4  ;;  %4849 = vmatprep.mubr.bf16.mxu1 %v3298_v58  ;;  %v7444_v58 = vld [vmem:[#allocation51_spill] sm:$0xff] }
 0x50f   : > { %v3299_v1 = vpack.c.bf16 %v3253_v0, %v3252_v19  ;;  %v3086_v18 = vpop.permute.xlu1 %3085 }
 0x510   : > { %v3255_v30 = vmul.f32 %v3086_v18, %v6761_v36  ;;  %v3081_v24 = vpop.permute.xlu0 %3080 }
 0x511   : > { %v3254_v20 = vmul.f32 %v3081_v24, %v6763_v49 }
 0x512   : > { %4850 = vmatmul.mubr.bf16.gmra.mrb[32].mxu1 %v3299_v1  ;;  %v7446_v1 = vld [vmem:[#allocation53_spill] sm:$0xff] }
 0x513   : > { %v3300_v17 = vpack.c.bf16 %v3255_v30, %v3254_v20  ;;  %v3096_v13 = vpop.permute.xlu1 %3095 }
 0x514   : > { %v3257_v40 = vmul.f32 %v3096_v13, %v6767_v3  ;;  %v3091_v62 = vpop.permute.xlu0 %3090 }
 0x515   : > { %v3256_v8 = vmul.f32 %v3091_v62, %v6769_v10  ;;  %4853 = vmatprep.mubr.bf16.mxu1 %v3300_v17  ;;  %v7448_v17 = vld [vmem:[#allocation55_spill] sm:$0xff] }
 0x517   : > { %v3301_v5 = vpack.c.bf16 %v3257_v40, %v3256_v8  ;;  %v3106_v6 = vpop.permute.xlu1 %3105 }
 0x518   : > { %v3259_v4 = vmul.f32 %v3106_v6, %v6775_v37  ;;  %v3101_v26 = vpop.permute.xlu0 %3100  ;;  %v7449_v6 = vld [vmem:[#allocation56_spill] sm:$0xff] }
 0x519   : > { %v3258_v51 = vmul.f32 %v3101_v26, %v6777_v55 }
 0x51a   : > { %4854 = vmatmul.mubr.bf16.gmra.mrb[36].mxu1 %v3301_v5 }
 0x51b   : > { %v3302_v36 = vpack.c.bf16 %v3259_v4, %v3258_v51  ;;  %v3116_v38 = vpop.permute.xlu1 %3115 }
 0x51c   : > { %v3261_v49 = vmul.f32 %v3116_v38, %v6781_v48  ;;  %v3111_v59 = vpop.permute.xlu0 %3110 }
 0x51d   : > { %v3260_v54 = vmul.f32 %v3111_v59, %v6783_v25  ;;  %4857 = vmatprep.mubr.bf16.mxu1 %v3302_v36  ;;  %v7450_v36 = vld [vmem:[#allocation57_spill] sm:$0xff] }
 0x51f   : > { %v3303_v3 = vpack.c.bf16 %v3261_v49, %v3260_v54  ;;  %v3126_v35 = vpop.permute.xlu1 %3125 }
 0x520   : > { %v3263_v10 = vmul.f32 %v3126_v35, %v6789_v52  ;;  %v3121_v61 = vpop.permute.xlu0 %3120 }
 0x521   : > { %v3262_v43 = vmul.f32 %v3121_v61, %v6791_v50 }
 0x522   : > { %4858 = vmatmul.mubr.bf16.gmra.mrb[40].mxu1 %v3303_v3 }
 0x523   : > { %v3304_v37 = vpack.c.bf16 %v3263_v10, %v3262_v43  ;;  %v3136_v53 = vpop.permute.xlu1 %3135 }
 0x524   : > { %v3265_v55 = vmul.f32 %v3136_v53, %v6795_v42  ;;  %v3131_v2 = vpop.permute.xlu0 %3130 }
 0x525   : > { %v3264_v23 = vmul.f32 %v3131_v2, %v6797_v33  ;;  %4861 = vmatprep.mubr.bf16.mxu1 %v3304_v37 }
 0x527   : > { %v3305_v48 = vpack.c.bf16 %v3265_v55, %v3264_v23  ;;  %v3146_v29 = vpop.permute.xlu1 %3145 }
 0x528   : > { %v3267_v25 = vmul.f32 %v3146_v29, %v6803_v15  ;;  %v3141_v39 = vpop.permute.xlu0 %3140 }
 0x529   : > { %v3266_v32 = vmul.f32 %v3141_v39, %v6805_v16 }
 0x52a   : > { %4862 = vmatmul.mubr.bf16.gmra.mrb[44].mxu1 %v3305_v48 }
 0x52b   : > { %v3306_v52 = vpack.c.bf16 %v3267_v25, %v3266_v32  ;;  %v3156_v41 = vpop.permute.xlu1 %3155 }
 0x52c   : > { %v3269_v50 = vmul.f32 %v3156_v41, %v6809_v12  ;;  %v3151_v46 = vpop.permute.xlu0 %3150 }
 0x52d   : > { %v3268_v11 = vmul.f32 %v3151_v46, %v6811_v45  ;;  %4865 = vmatprep.mubr.bf16.mxu1 %v3306_v52 }
 0x52f   : > { %v3307_v42 = vpack.c.bf16 %v3269_v50, %v3268_v11  ;;  %v3166_v63 = vpop.permute.xlu1 %3165 }
 0x530   : > { %v3271_v33 = vmul.f32 %v3166_v63, %v6817_v21  ;;  %v3161_v22 = vpop.permute.xlu0 %3160 }
 0x531   : > { %v3270_v56 = vmul.f32 %v3161_v22, %v6819_v31  ;;  %v7445_v31 = vld [vmem:[#allocation52_spill] sm:$0xff] }
 0x532   : > { %4866 = vmatmul.mubr.bf16.gmra.mrb[48].mxu1 %v3307_v42 }
 0x533   : > { %v3308_v15 = vpack.c.bf16 %v3271_v33, %v3270_v56  ;;  %v3176_v47 = vpop.permute.xlu1 %3175 }
 0x534   : > { %v3273_v16 = vmul.f32 %v3176_v47, %v6823_v44  ;;  %v3171_v7 = vpop.permute.xlu0 %3170 }
 0x535   : > { %v3272_v60 = vmul.f32 %v3171_v7, %v6825_v57  ;;  %4869 = vmatprep.mubr.bf16.mxu1 %v3308_v15  ;;  %v7447_v57 = vld [vmem:[#allocation54_spill] sm:$0xff] }
 0x537   : > { %v3309_v12 = vpack.c.bf16 %v3273_v16, %v3272_v60  ;;  %v3186_v14 = vpop.permute.xlu1 %3185 }
 0x538   : > { %v3275_v45 = vmul.f32 %v3186_v14, %v6831_v28  ;;  %v3181_v9 = vpop.permute.xlu0 %3180  ;;  %v6917_v28 = vpop.f32.mrb[0].mxu0 }
 0x539   : > { %v3274_v27 = vmul.f32 %v3181_v9, %v7444_v58  ;;  %v6919_v40 = vpop.f32.mrb[1].mxu0 }
 0x53a   : > { %4870 = vmatmul.mubr.bf16.gmra.mrb[52].mxu1 %v3309_v12  ;;  %v6921_v5 = vpop.f32.mrb[2].mxu0 }
 0x53b   : > { %v3310_v21 = vpack.c.bf16 %v3275_v45, %v3274_v27  ;;  %v3196_v0 = vpop.permute.xlu1 %3195  ;;  %v6924_v51 = vpop.f32.mrb[3].mxu0 }
 0x53c   : > { %v3277_v34 = vmul.f32 %v3196_v0, %v7445_v31  ;;  %v3191_v19 = vpop.permute.xlu0 %3190  ;;  %v6927_v59 = vpop.f32.mrb[4].mxu0 }
 0x53d   : > { %v3276_v18 = vmul.f32 %v3191_v19, %v7446_v1  ;;  %4873 = vmatprep.mubr.bf16.mxu1 %v3310_v21  ;;  %v6929_v54 = vpop.f32.mrb[5].mxu0 }
 0x53e   : > { %v6931_v3 = vpop.f32.mrb[6].mxu0 }
 0x53f   : > { %v3311_v44 = vpack.c.bf16 %v3277_v34, %v3276_v18  ;;  %v3206_v30 = vpop.permute.xlu1 %3205  ;;  %v6933_v35 = vpop.f32.mrb[7].mxu0 }
 0x540   : > { %v3279_v24 = vmul.f32 %v3206_v30, %v7447_v57  ;;  %v3201_v20 = vpop.permute.xlu0 %3200 }
 0x541   : > { %v3278_v13 = vmul.f32 %v3201_v20, %v7448_v17  ;;  %v7023_v20 = vld [vmem:[#allocation12] ss:$0 sm:$0xff] }
 0x542   : > { %4874 = vmatmul.mubr.bf16.gmra.mrb[56].mxu1 %v3311_v44  ;;  %v6935_v10 = vpop.f32.mrb[8].mxu0 }
 0x543   : > { %v3312_v62 = vpack.c.bf16 %v3279_v24, %v3278_v13  ;;  %v3216_v8 = vpop.permute.xlu1 %3215  ;;  %v6937_v61 = vpop.f32.mrb[9].mxu0 }
 0x544   : > { %v3281_v4 = vmul.f32 %v3216_v8, %v7449_v6  ;;  %v3211_v26 = vpop.permute.xlu0 %3210  ;;  %v6939_v43 = vpop.f32.mrb[10].mxu0 }
 0x545   : > { %v3280_v38 = vmul.f32 %v3211_v26, %v7450_v36  ;;  %4877 = vmatprep.mubr.bf16.mxu1 %v3312_v62  ;;  %v6941_v37 = vpop.f32.mrb[11].mxu0 }
 0x547   : > { %v3313_v49 = vpack.c.bf16 %v3281_v4, %v3280_v38 }
 0x54a   : > { %4878 = vmatmul.mubr.bf16.gmra.mrb[60].mxu1 %v3313_v49  ;;  %v6943_v53 = vpop.f32.mrb[12].mxu0 }
 0x54b   : > { %v6945_v55 = vpop.f32.mrb[13].mxu0 }
 0x54c   : > { %v6947_v2 = vpop.f32.mrb[14].mxu0 }
 0x54d   : > { %v6949_v23 = vpop.f32.mrb[15].mxu0 }
 0x552   : > { %v6951_v48 = vpop.f32.mrb[16].mxu0 }
 0x553   : > { %v6953_v29 = vpop.f32.mrb[17].mxu0 }
 0x554   : > { %v6955_v25 = vpop.f32.mrb[18].mxu0 }
 0x555   : > { %v6957_v39 = vpop.f32.mrb[19].mxu0 }
 0x55a   : > { %v6959_v32 = vpop.f32.mrb[20].mxu0 }
 0x55b   : > { %v6961_v52 = vpop.f32.mrb[21].mxu0 }
 0x55c   : > { %v6963_v41 = vpop.f32.mrb[22].mxu0 }
 0x55d   : > { %v6965_v50 = vpop.f32.mrb[23].mxu0 }
 0x562   : > { %v6967_v46 = vpop.f32.mrb[24].mxu0 }
 0x563   : > { %v6969_v11 = vpop.f32.mrb[25].mxu0 }
 0x564   : > { %v6971_v42 = vpop.f32.mrb[26].mxu0 }
 0x565   : > { %v6973_v63 = vpop.f32.mrb[27].mxu0 }
 0x56a   : > { %v6975_v33 = vpop.f32.mrb[28].mxu0 }
 0x56b   : > { %v6977_v22 = vpop.f32.mrb[29].mxu0 }
 0x56c   : > { %v6979_v56 = vpop.f32.mrb[30].mxu0 }
 0x56d   : > { %v6981_v15 = vpop.f32.mrb[31].mxu0 }
 0x572   : > { %v6983_v47 = vpop.f32.mrb[32].mxu0 }
 0x573   : > { %v6985_v16 = vpop.f32.mrb[33].mxu0 }
 0x574   : > { %v6987_v7 = vpop.f32.mrb[34].mxu0 }
 0x575   : > { %v6989_v60 = vpop.f32.mrb[35].mxu0 }
 0x57d   : > { %v6991_v12 = vpop.f32.mrb[36].mxu0 }
 0x57e   : > { %v6993_v14 = vpop.f32.mrb[37].mxu0 }
 0x57f   : > { %v6995_v45 = vpop.f32.mrb[38].mxu0 }
 0x580   : > { %v6997_v9 = vpop.f32.mrb[39].mxu0 }
 0x585   : > { %v6999_v58 = vpop.f32.mrb[40].mxu0 }
 0x586   : > { %v7001_v27 = vpop.f32.mrb[41].mxu0 }
 0x587   : > { %v7003_v21 = vpop.f32.mrb[42].mxu0 }
 0x588   : > { %v7005_v0 = vpop.f32.mrb[43].mxu0 }
 0x58d   : > { %v7007_v31 = vpop.f32.mrb[44].mxu0 }
 0x58e   : > { %v7009_v34 = vpop.f32.mrb[45].mxu0 }
 0x58f   : > { %v7011_v19 = vpop.f32.mrb[46].mxu0 }
 0x590   : > { %v7013_v1 = vpop.f32.mrb[47].mxu0 }
 0x595   : > { %v7015_v18 = vpop.f32.mrb[48].mxu0 }
 0x596   : > { %v7017_v44 = vpop.f32.mrb[49].mxu0 }
 0x597   : > { %v7019_v30 = vpop.f32.mrb[50].mxu0 }
 0x598   : > { %v7021_v57 = vpop.f32.mrb[51].mxu0 }
 0x59d   : > { %v7031_v49 = vpop.f32.mrb[52].mxu0 }
 0x5a5   : > { %v4819_v24 = vpop.f32.mrb[0].mxu1 }
 0x5a6   : > { %v4030_v17 = vadd.f32 %v6917_v28, %v4819_v24  ;;  %v3492_v13 = vpop.f32.mrb[1].mxu1  ;;  %v7035_v24 = vpop.f32.mrb[53].mxu0 }
 0x5a7   : > { %v4022_v62 = vadd.f32 %v6919_v40, %v3492_v13  ;;  %v4820_v8 = vpop.f32.mrb[2].mxu1  ;;  %v7039_v13 = vpop.f32.mrb[54].mxu0 }
 0x5a8   : > { %v4285_v6 = vadd.f32 %v7023_v20, %v4030_v17  ;;  %v4033_v4 = vadd.f32 %v6921_v5, %v4820_v8  ;;  %v3495_v26 = vpop.f32.mrb[3].mxu1  ;;  %v7042_v5 = vpop.f32.mrb[55].mxu0 }
 0x5a9   : > { %v4283_v36 = vadd.f32 %v7023_v20, %v4022_v62  ;;  %v4025_v38 = vadd.f32 %v6924_v51, %v3495_v26  ;;  %7451 = vst [vmem:[#allocation51_spill] sm:$0xff] %v7042_v5  ;;  %v7051_v5 = vpop.f32.mrb[56].mxu0 }
 0x5aa   : > { %4349 = vst [vmem:[%s6164_s15 + $0x10] sm:$0xff] %v4285_v6  ;;  %v4286_v28 = vadd.f32 %v7023_v20, %v4033_v4 }
 0x5ab   : > { %4347 = vst [vmem:[%s6164_s15] sm:$0xff] %v4283_v36  ;;  %v4284_v40 = vadd.f32 %v7023_v20, %v4025_v38 }
 0x5ac   : > { %4350 = vst [vmem:[%s6164_s15 + $0x18] sm:$0xff] %v4286_v28 }
 0x5ad   : > { %4348 = vst [vmem:[%s6164_s15 + $0x8] sm:$0xff] %v4284_v40  ;;  %v4823_v17 = vpop.f32.mrb[4].mxu1  ;;  %v7055_v40 = vpop.f32.mrb[57].mxu0 }
 0x5ae   : > { %v4046_v51 = vadd.f32 %v6927_v59, %v4823_v17  ;;  %v3508_v62 = vpop.f32.mrb[5].mxu1  ;;  %v7059_v17 = vpop.f32.mrb[58].mxu0 }
 0x5af   : > { %v4038_v8 = vadd.f32 %v6929_v54, %v3508_v62  ;;  %v4824_v6 = vpop.f32.mrb[6].mxu1 }
 0x5b0   : > { %v4289_v4 = vadd.f32 %v7023_v20, %v4046_v51  ;;  %v4049_v26 = vadd.f32 %v6931_v3, %v4824_v6  ;;  %v3511_v36 = vpop.f32.mrb[7].mxu1  ;;  %v7062_v3 = vpop.f32.mrb[59].mxu0 }
 0x5b1   : > { %v4287_v38 = vadd.f32 %v7023_v20, %v4038_v8  ;;  %v4041_v28 = vadd.f32 %v6933_v35, %v3511_v36 }
 0x5b2   : > { %4353 = vst [vmem:[%s6164_s15 + $0x30] sm:$0xff] %v4289_v4  ;;  %v4290_v59 = vadd.f32 %v7023_v20, %v4049_v26 }
 0x5b3   : > { %4351 = vst [vmem:[%s6164_s15 + $0x20] sm:$0xff] %v4287_v38  ;;  %v4288_v54 = vadd.f32 %v7023_v20, %v4041_v28 }
 0x5b4   : > { %4354 = vst [vmem:[%s6164_s15 + $0x38] sm:$0xff] %v4290_v59  ;;  %v7071_v59 = vpop.f32.mrb[60].mxu0 }
 0x5b5   : > { %4352 = vst [vmem:[%s6164_s15 + $0x28] sm:$0xff] %v4288_v54  ;;  %v4827_v51 = vpop.f32.mrb[8].mxu1  ;;  %v7075_v54 = vpop.f32.mrb[61].mxu0 }
 0x5b6   : > { %v4062_v35 = vadd.f32 %v6935_v10, %v4827_v51  ;;  %v3524_v62 = vpop.f32.mrb[9].mxu1  ;;  %v7079_v51 = vpop.f32.mrb[62].mxu0 }
 0x5b7   : > { %v4054_v8 = vadd.f32 %v6937_v61, %v3524_v62  ;;  %v4828_v6 = vpop.f32.mrb[10].mxu1 }
 0x5b8   : > { %v4293_v4 = vadd.f32 %v7023_v20, %v4062_v35  ;;  %v4065_v26 = vadd.f32 %v6939_v43, %v4828_v6  ;;  %v3527_v36 = vpop.f32.mrb[11].mxu1  ;;  %v7082_v43 = vpop.f32.mrb[63].mxu0 }
 0x5b9   : > { %v4291_v38 = vadd.f32 %v7023_v20, %v4054_v8  ;;  %v4057_v28 = vadd.f32 %v6941_v37, %v3527_v36 }
 0x5ba   : > { %4357 = vst [vmem:[%s6164_s15 + $0x50] sm:$0xff] %v4293_v4  ;;  %v4294_v10 = vadd.f32 %v7023_v20, %v4065_v26 }
 0x5bb   : > { %4355 = vst [vmem:[%s6164_s15 + $0x40] sm:$0xff] %v4291_v38  ;;  %v4292_v61 = vadd.f32 %v7023_v20, %v4057_v28 }
 0x5bc   : > { %4358 = vst [vmem:[%s6164_s15 + $0x58] sm:$0xff] %v4294_v10 }
 0x5bd   : > { %4356 = vst [vmem:[%s6164_s15 + $0x48] sm:$0xff] %v4292_v61  ;;  %v4831_v37 = vpop.f32.mrb[12].mxu1 }
 0x5be   : > { %v4078_v35 = vadd.f32 %v6943_v53, %v4831_v37  ;;  %v3540_v62 = vpop.f32.mrb[13].mxu1 }
 0x5bf   : > { %v4070_v8 = vadd.f32 %v6945_v55, %v3540_v62  ;;  %v4832_v6 = vpop.f32.mrb[14].mxu1 }
 0x5c0   : > { %v4297_v4 = vadd.f32 %v7023_v20, %v4078_v35  ;;  %v4081_v26 = vadd.f32 %v6947_v2, %v4832_v6  ;;  %v3543_v36 = vpop.f32.mrb[15].mxu1 }
 0x5c1   : > { %v4295_v38 = vadd.f32 %v7023_v20, %v4070_v8  ;;  %v4073_v28 = vadd.f32 %v6949_v23, %v3543_v36 }
 0x5c2   : > { %4361 = vst [vmem:[%s6164_s15 + $0x70] sm:$0xff] %v4297_v4  ;;  %v4298_v10 = vadd.f32 %v7023_v20, %v4081_v26 }
 0x5c3   : > { %4359 = vst [vmem:[%s6164_s15 + $0x60] sm:$0xff] %v4295_v38  ;;  %v4296_v53 = vadd.f32 %v7023_v20, %v4073_v28 }
 0x5c4   : > { %4362 = vst [vmem:[%s6164_s15 + $0x78] sm:$0xff] %v4298_v10 }
 0x5c5   : > { %4360 = vst [vmem:[%s6164_s15 + $0x68] sm:$0xff] %v4296_v53  ;;  %v4835_v55 = vpop.f32.mrb[16].mxu1 }
 0x5c6   : > { %v4094_v2 = vadd.f32 %v6951_v48, %v4835_v55  ;;  %v3556_v61 = vpop.f32.mrb[17].mxu1 }
 0x5c7   : > { %v4086_v37 = vadd.f32 %v6953_v29, %v3556_v61  ;;  %v4836_v35 = vpop.f32.mrb[18].mxu1 }
 0x5c8   : > { %v4301_v23 = vadd.f32 %v7023_v20, %v4094_v2  ;;  %v4097_v62 = vadd.f32 %v6955_v25, %v4836_v35  ;;  %v3559_v8 = vpop.f32.mrb[19].mxu1 }
 0x5c9   : > { %v4299_v6 = vadd.f32 %v7023_v20, %v4086_v37  ;;  %v4089_v4 = vadd.f32 %v6957_v39, %v3559_v8 }
 0x5ca   : > { %4365 = vst [vmem:[%s6164_s15 + $0x90] sm:$0xff] %v4301_v23  ;;  %v4302_v26 = vadd.f32 %v7023_v20, %v4097_v62 }
 0x5cb   : > { %4363 = vst [vmem:[%s6164_s15 + $0x80] sm:$0xff] %v4299_v6  ;;  %v4300_v48 = vadd.f32 %v7023_v20, %v4089_v4 }
 0x5cc   : > { %4366 = vst [vmem:[%s6164_s15 + $0x98] sm:$0xff] %v4302_v26 }
 0x5cd   : > { %4364 = vst [vmem:[%s6164_s15 + $0x88] sm:$0xff] %v4300_v48  ;;  %v4839_v29 = vpop.f32.mrb[20].mxu1 }
 0x5ce   : > { %v4110_v25 = vadd.f32 %v6959_v32, %v4839_v29  ;;  %v3572_v36 = vpop.f32.mrb[21].mxu1 }
 0x5cf   : > { %v4102_v38 = vadd.f32 %v6961_v52, %v3572_v36  ;;  %v4840_v28 = vpop.f32.mrb[22].mxu1 }
 0x5d0   : > { %v4305_v39 = vadd.f32 %v7023_v20, %v4110_v25  ;;  %v4113_v10 = vadd.f32 %v6963_v41, %v4840_v28  ;;  %v3575_v53 = vpop.f32.mrb[23].mxu1 }
 0x5d1   : > { %v4303_v55 = vadd.f32 %v7023_v20, %v4102_v38  ;;  %v4105_v2 = vadd.f32 %v6965_v50, %v3575_v53 }
 0x5d2   : > { %4369 = vst [vmem:[%s6164_s15 + $0xb0] sm:$0xff] %v4305_v39  ;;  %v4306_v61 = vadd.f32 %v7023_v20, %v4113_v10 }
 0x5d3   : > { %4367 = vst [vmem:[%s6164_s15 + $0xa0] sm:$0xff] %v4303_v55  ;;  %v4304_v32 = vadd.f32 %v7023_v20, %v4105_v2 }
 0x5d4   : > { %4370 = vst [vmem:[%s6164_s15 + $0xb8] sm:$0xff] %v4306_v61 }
 0x5d5   : > { %4368 = vst [vmem:[%s6164_s15 + $0xa8] sm:$0xff] %v4304_v32  ;;  %v4843_v52 = vpop.f32.mrb[24].mxu1 }
 0x5d6   : > { %v4126_v41 = vadd.f32 %v6967_v46, %v4843_v52  ;;  %v3588_v37 = vpop.f32.mrb[25].mxu1 }
 0x5d7   : > { %v4118_v35 = vadd.f32 %v6969_v11, %v3588_v37  ;;  %v4844_v23 = vpop.f32.mrb[26].mxu1 }
 0x5d8   : > { %v4309_v50 = vadd.f32 %v7023_v20, %v4126_v41  ;;  %v4129_v62 = vadd.f32 %v6971_v42, %v4844_v23  ;;  %v3591_v8 = vpop.f32.mrb[27].mxu1 }
 0x5d9   : > { %v4307_v6 = vadd.f32 %v7023_v20, %v4118_v35  ;;  %v4121_v4 = vadd.f32 %v6973_v63, %v3591_v8 }
 0x5da   : > { %4373 = vst [vmem:[%s6164_s15 + $0xd0] sm:$0xff] %v4309_v50  ;;  %v4310_v26 = vadd.f32 %v7023_v20, %v4129_v62 }
 0x5db   : > { %4371 = vst [vmem:[%s6164_s15 + $0xc0] sm:$0xff] %v4307_v6  ;;  %v4308_v46 = vadd.f32 %v7023_v20, %v4121_v4 }
 0x5dc   : > { %4374 = vst [vmem:[%s6164_s15 + $0xd8] sm:$0xff] %v4310_v26 }
 0x5dd   : > { %4372 = vst [vmem:[%s6164_s15 + $0xc8] sm:$0xff] %v4308_v46  ;;  %v4847_v11 = vpop.f32.mrb[28].mxu1 }
 0x5de   : > { %v4142_v42 = vadd.f32 %v6975_v33, %v4847_v11  ;;  %v3604_v48 = vpop.f32.mrb[29].mxu1 }
 0x5df   : > { %v4134_v29 = vadd.f32 %v6977_v22, %v3604_v48  ;;  %v4848_v25 = vpop.f32.mrb[30].mxu1 }
 0x5e0   : > { %v4313_v63 = vadd.f32 %v7023_v20, %v4142_v42  ;;  %v4145_v36 = vadd.f32 %v6979_v56, %v4848_v25  ;;  %v3607_v38 = vpop.f32.mrb[31].mxu1 }
 0x5e1   : > { %v4311_v28 = vadd.f32 %v7023_v20, %v4134_v29  ;;  %v4137_v39 = vadd.f32 %v6981_v15, %v3607_v38 }
 0x5e2   : > { %4377 = vst [vmem:[%s6164_s15 + $0xf0] sm:$0xff] %v4313_v63  ;;  %v4314_v10 = vadd.f32 %v7023_v20, %v4145_v36 }
 0x5e3   : > { %4375 = vst [vmem:[%s6164_s15 + $0xe0] sm:$0xff] %v4311_v28  ;;  %v4312_v33 = vadd.f32 %v7023_v20, %v4137_v39 }
 0x5e4   : > { %4378 = vst [vmem:[%s6164_s15 + $0xf8] sm:$0xff] %v4314_v10 }
 0x5e5   : > { %4376 = vst [vmem:[%s6164_s15 + $0xe8] sm:$0xff] %v4312_v33  ;;  %v4851_v22 = vpop.f32.mrb[32].mxu1 }
 0x5e6   : > { %v4158_v56 = vadd.f32 %v6983_v47, %v4851_v22  ;;  %v3620_v53 = vpop.f32.mrb[33].mxu1 }
 0x5e7   : > { %v4150_v55 = vadd.f32 %v6985_v16, %v3620_v53  ;;  %v4852_v2 = vpop.f32.mrb[34].mxu1 }
 0x5e8   : > { %v4317_v15 = vadd.f32 %v7023_v20, %v4158_v56  ;;  %v4161_v61 = vadd.f32 %v6987_v7, %v4852_v2  ;;  %v3623_v32 = vpop.f32.mrb[35].mxu1 }
 0x5e9   : > { %v4315_v52 = vadd.f32 %v7023_v20, %v4150_v55  ;;  %v4153_v41 = vadd.f32 %v6989_v60, %v3623_v32 }
 0x5ea   : > { %4381 = vst [vmem:[%s6164_s15 + $0x110] sm:$0xff] %v4317_v15  ;;  %v4318_v37 = vadd.f32 %v7023_v20, %v4161_v61 }
 0x5eb   : > { %4379 = vst [vmem:[%s6164_s15 + $0x100] sm:$0xff] %v4315_v52  ;;  %v4316_v47 = vadd.f32 %v7023_v20, %v4153_v41 }
 0x5ec   : > { %4382 = vst [vmem:[%s6164_s15 + $0x118] sm:$0xff] %v4318_v37 }
 0x5ed   : > { %4380 = vst [vmem:[%s6164_s15 + $0x108] sm:$0xff] %v4316_v47  ;;  %v4855_v16 = vpop.f32.mrb[36].mxu1 }
 0x5ee   : > { %v4174_v7 = vadd.f32 %v6991_v12, %v4855_v16  ;;  %v3636_v35 = vpop.f32.mrb[37].mxu1 }
 0x5ef   : > { %v4166_v23 = vadd.f32 %v6993_v14, %v3636_v35  ;;  %v4856_v50 = vpop.f32.mrb[38].mxu1 }
 0x5f0   : > { %v4321_v60 = vadd.f32 %v7023_v20, %v4174_v7  ;;  %v4177_v62 = vadd.f32 %v6995_v45, %v4856_v50  ;;  %v3639_v8 = vpop.f32.mrb[39].mxu1 }
 0x5f1   : > { %v4319_v6 = vadd.f32 %v7023_v20, %v4166_v23  ;;  %v4169_v4 = vadd.f32 %v6997_v9, %v3639_v8 }
 0x5f2   : > { %4385 = vst [vmem:[%s6164_s15 + $0x130] sm:$0xff] %v4321_v60  ;;  %v4322_v26 = vadd.f32 %v7023_v20, %v4177_v62  ;;  %v7452_v60 = vld [vmem:[#allocation51_spill] sm:$0xff] }
 0x5f3   : > { %4383 = vst [vmem:[%s6164_s15 + $0x120] sm:$0xff] %v4319_v6  ;;  %v4320_v12 = vadd.f32 %v7023_v20, %v4169_v4 }
 0x5f4   : > { %4386 = vst [vmem:[%s6164_s15 + $0x138] sm:$0xff] %v4322_v26 }
 0x5f5   : > { %4384 = vst [vmem:[%s6164_s15 + $0x128] sm:$0xff] %v4320_v12  ;;  %v4859_v14 = vpop.f32.mrb[40].mxu1 }
 0x5f6   : > { %v4190_v45 = vadd.f32 %v6999_v58, %v4859_v14  ;;  %v3652_v46 = vpop.f32.mrb[41].mxu1 }
 0x5f7   : > { %v4182_v11 = vadd.f32 %v7001_v27, %v3652_v46  ;;  %v4860_v42 = vpop.f32.mrb[42].mxu1 }
 0x5f8   : > { %v4325_v9 = vadd.f32 %v7023_v20, %v4190_v45  ;;  %v4193_v48 = vadd.f32 %v7003_v21, %v4860_v42  ;;  %v3655_v29 = vpop.f32.mrb[43].mxu1 }
 0x5f9   : > { %v4323_v25 = vadd.f32 %v7023_v20, %v4182_v11  ;;  %v4185_v63 = vadd.f32 %v7005_v0, %v3655_v29 }
 0x5fa   : > { %4389 = vst [vmem:[%s6164_s15 + $0x150] sm:$0xff] %v4325_v9  ;;  %v4326_v36 = vadd.f32 %v7023_v20, %v4193_v48 }
 0x5fb   : > { %4387 = vst [vmem:[%s6164_s15 + $0x140] sm:$0xff] %v4323_v25  ;;  %v4324_v58 = vadd.f32 %v7023_v20, %v4185_v63 }
 0x5fc   : > { %4390 = vst [vmem:[%s6164_s15 + $0x158] sm:$0xff] %v4326_v36 }
 0x5fd   : > { %4388 = vst [vmem:[%s6164_s15 + $0x148] sm:$0xff] %v4324_v58  ;;  %v4863_v27 = vpop.f32.mrb[44].mxu1 }
 0x5fe   : > { %v4206_v21 = vadd.f32 %v7007_v31, %v4863_v27  ;;  %v3668_v38 = vpop.f32.mrb[45].mxu1 }
 0x5ff   : > { %v4198_v28 = vadd.f32 %v7009_v34, %v3668_v38  ;;  %v4864_v39 = vpop.f32.mrb[46].mxu1 }
 0x600   : > { %v4329_v0 = vadd.f32 %v7023_v20, %v4206_v21  ;;  %v4209_v10 = vadd.f32 %v7011_v19, %v4864_v39  ;;  %v3671_v33 = vpop.f32.mrb[47].mxu1 }
 0x601   : > { %v4327_v22 = vadd.f32 %v7023_v20, %v4198_v28  ;;  %v4201_v56 = vadd.f32 %v7013_v1, %v3671_v33 }
 0x602   : > { %4393 = vst [vmem:[%s6164_s15 + $0x170] sm:$0xff] %v4329_v0  ;;  %v4330_v53 = vadd.f32 %v7023_v20, %v4209_v10 }
 0x603   : > { %4391 = vst [vmem:[%s6164_s15 + $0x160] sm:$0xff] %v4327_v22  ;;  %v4328_v31 = vadd.f32 %v7023_v20, %v4201_v56 }
 0x604   : > { %4394 = vst [vmem:[%s6164_s15 + $0x178] sm:$0xff] %v4330_v53 }
 0x605   : > { %4392 = vst [vmem:[%s6164_s15 + $0x168] sm:$0xff] %v4328_v31  ;;  %v4867_v34 = vpop.f32.mrb[48].mxu1 }
 0x606   : > { %v4222_v19 = vadd.f32 %v7015_v18, %v4867_v34  ;;  %v3684_v55 = vpop.f32.mrb[49].mxu1 }
 0x607   : > { %v4214_v2 = vadd.f32 %v7017_v44, %v3684_v55  ;;  %v4868_v15 = vpop.f32.mrb[50].mxu1 }
 0x608   : > { %v4333_v1 = vadd.f32 %v7023_v20, %v4222_v19  ;;  %v4225_v61 = vadd.f32 %v7019_v30, %v4868_v15  ;;  %v3687_v32 = vpop.f32.mrb[51].mxu1 }
 0x609   : > { %v4331_v52 = vadd.f32 %v7023_v20, %v4214_v2  ;;  %v4217_v41 = vadd.f32 %v7021_v57, %v3687_v32 }
 0x60a   : > { %4397 = vst [vmem:[%s6164_s15 + $0x190] sm:$0xff] %v4333_v1  ;;  %v4334_v37 = vadd.f32 %v7023_v20, %v4225_v61 }
 0x60b   : > { %4395 = vst [vmem:[%s6164_s15 + $0x180] sm:$0xff] %v4331_v52  ;;  %v4332_v18 = vadd.f32 %v7023_v20, %v4217_v41 }
 0x60c   : > { %4398 = vst [vmem:[%s6164_s15 + $0x198] sm:$0xff] %v4334_v37 }
 0x60d   : > { %4396 = vst [vmem:[%s6164_s15 + $0x188] sm:$0xff] %v4332_v18  ;;  %v4871_v44 = vpop.f32.mrb[52].mxu1 }
 0x60e   : > { %v4238_v30 = vadd.f32 %v7031_v49, %v4871_v44  ;;  %v3700_v47 = vpop.f32.mrb[53].mxu1 }
 0x60f   : > { %v4230_v16 = vadd.f32 %v7035_v24, %v3700_v47  ;;  %v4872_v7 = vpop.f32.mrb[54].mxu1 }
 0x610   : > { %v4337_v57 = vadd.f32 %v7023_v20, %v4238_v30  ;;  %v4241_v35 = vadd.f32 %v7039_v13, %v4872_v7  ;;  %v3703_v23 = vpop.f32.mrb[55].mxu1 }
 0x611   : > { %v4335_v50 = vadd.f32 %v7023_v20, %v4230_v16  ;;  %v4233_v62 = vadd.f32 %v7452_v60, %v3703_v23 }
 0x612   : > { %4401 = vst [vmem:[%s6164_s15 + $0x1b0] sm:$0xff] %v4337_v57  ;;  %v4338_v8 = vadd.f32 %v7023_v20, %v4241_v35 }
 0x613   : > { %4399 = vst [vmem:[%s6164_s15 + $0x1a0] sm:$0xff] %v4335_v50  ;;  %v4336_v49 = vadd.f32 %v7023_v20, %v4233_v62 }
 0x614   : > { %4402 = vst [vmem:[%s6164_s15 + $0x1b8] sm:$0xff] %v4338_v8 }
 0x615   : > { %4400 = vst [vmem:[%s6164_s15 + $0x1a8] sm:$0xff] %v4336_v49  ;;  %v4875_v24 = vpop.f32.mrb[56].mxu1 }
 0x616   : > { %v4254_v13 = vadd.f32 %v7051_v5, %v4875_v24  ;;  %v3716_v6 = vpop.f32.mrb[57].mxu1 }
 0x617   : > { %v4246_v4 = vadd.f32 %v7055_v40, %v3716_v6  ;;  %v4876_v26 = vpop.f32.mrb[58].mxu1 }
 0x618   : > { %v4341_v12 = vadd.f32 %v7023_v20, %v4254_v13  ;;  %v4257_v14 = vadd.f32 %v7059_v17, %v4876_v26  ;;  %v3719_v45 = vpop.f32.mrb[59].mxu1 }
 0x619   : > { %v4339_v46 = vadd.f32 %v7023_v20, %v4246_v4  ;;  %v4249_v11 = vadd.f32 %v7062_v3, %v3719_v45 }
 0x61a   : > { %4405 = vst [vmem:[%s6164_s15 + $0x1d0] sm:$0xff] %v4341_v12  ;;  %v4342_v42 = vadd.f32 %v7023_v20, %v4257_v14 }
 0x61b   : > { %4403 = vst [vmem:[%s6164_s15 + $0x1c0] sm:$0xff] %v4339_v46  ;;  %v4340_v5 = vadd.f32 %v7023_v20, %v4249_v11 }
 0x61c   : > { %4406 = vst [vmem:[%s6164_s15 + $0x1d8] sm:$0xff] %v4342_v42 }
 0x61d   : > { %4404 = vst [vmem:[%s6164_s15 + $0x1c8] sm:$0xff] %v4340_v5  ;;  %v4879_v40 = vpop.f32.mrb[60].mxu1 }
 0x61e   : > { %v4270_v17 = vadd.f32 %v7071_v59, %v4879_v40  ;;  %v3732_v9 = vpop.f32.mrb[61].mxu1 }
 0x61f   : > { %v4262_v48 = vadd.f32 %v7075_v54, %v3732_v9  ;;  %v4880_v29 = vpop.f32.mrb[62].mxu1 }
 0x620   : > { %v4345_v3 = vadd.f32 %v7023_v20, %v4270_v17  ;;  %v4273_v25 = vadd.f32 %v7079_v51, %v4880_v29  ;;  %v3735_v63 = vpop.f32.mrb[63].mxu1 }
 0x621   : > { %v4343_v36 = vadd.f32 %v7023_v20, %v4262_v48  ;;  %v4265_v58 = vadd.f32 %v7082_v43, %v3735_v63 }
 0x622   : > { %4409 = vst [vmem:[%s6164_s15 + $0x1f0] sm:$0xff] %v4345_v3  ;;  %v4346_v27 = vadd.f32 %v7023_v20, %v4273_v25 }
 0x623   : > { %4407 = vst [vmem:[%s6164_s15 + $0x1e0] sm:$0xff] %v4343_v36  ;;  %v4344_v21 = vadd.f32 %v7023_v20, %v4265_v58 }
 0x624   : > { %4410 = vst [vmem:[%s6164_s15 + $0x1f8] sm:$0xff] %v4346_v27 }
 0x625   : > { %4408 = vst [vmem:[%s6164_s15 + $0x1e8] sm:$0xff] %v4344_v21 }
 0x626 PF: > { %s7453_s27 = sld [smem:[#allocation22_spill]]  ;;  %s7454_s6 = sld [smem:[#allocation61_spill]] }
 0x627   : > { %s4425_s14 = sshll.u32 %s6164_s15, 4  ;;  %s4412_s13 = scalar_lea.sflag [#allocation5], %s6146_s12  ;;  %s7248_s14 = int_to_ptr.vmem [resolvable:$true] %s4425_s14 }
 0x628   : > { %s5611_s11 = scalar_lea.vmem %s7248_s14, 8192  ;;  %s5764_s0 = smov [#allocation13]  }
 0x629   : > { %p5612_p7 = scmp.ne.s32.totalorder %s7248_s14, %s5611_s11  ;;  %s5615_s18 = sshll.u32 %s5764_s0, 4  ;;  %s5616_s18 = int_to_ptr.vmem [resolvable:$false] %s5615_s18 }
 0x62a   : > { %s5617_s17 = scalar_lea.vmem %s5616_s18, 16384  ;;  %p5618_p10 = scmp.lt.s32.totalorder %s7248_s14, %s5616_s18 }
 0x62b   : > { %p5613_p13 = pnand %p5612_p7, %p6084_p4  ;;  %p5619_p11 = scmp.lt.s32.totalorder %s5617_s17, %s5611_s11 }
 0x62c   : > { %s4720_s24 = sshll.u32 %s7453_s27, 13 }
 0x62d   : > { %s7245_s29 = scalar_lea.hbm %s7454_s6, %s4720_s24  ;;  %p5614_p2 = pneg %p5613_p13 }
 0x62e   : > { %p5620_p1 = por %p5619_p11, %p5618_p10 }
 0x630   : > { %p5621_p5 = pnand %p5620_p1, %p5614_p2 }
 0x632   : > { %5624 = shalt.err (!%p5621_p5)
}
 0x633   : > { %s5625_s15 = scalar_lea.hbm %s7245_s29, 8192  ;;  %s5629_s21 = scalar_lea.hbm %s7454_s6, 32768 }
 0x634   : > { %p5626_p12 = scmp.ne.s32.totalorder %s7245_s29, %s5625_s15  ;;  %p5630_p9 = scmp.lt.u32.totalorder %s7245_s29, %s7454_s6 }
 0x635   : > { %p5631_p6 = scmp.lt.u32.totalorder %s5629_s21, %s5625_s15  ;;  %p5633_p7 = scmp.lt.u32.totalorder %s5625_s15, %s7245_s29 }
 0x636   : > { %p5627_p0 = pnand %p5626_p12, %p6084_p4 }
 0x637   : > { %p5632_p3 = por %p5631_p6, %p5630_p9 }
 0x638   : > { %p5628_p8 = pneg %p5627_p0 }
 0x639   : > { %p5634_p13 = por %p5633_p7, %p5632_p3 }
 0x63b   : > { %p5635_p2 = pnand %p5634_p13, %p5628_p8 }
 0x63d   : > { %5638 = shalt.err (!%p5635_p2)
}
 0x63e   : > { %s5765_s27 = smov 128   ;;  %s5766_s24 = smov 8  }
 0x63f   : > { %5045 = dma.vmem_to_hbm [thread:$0]  (%p6084_p4), %s7248_s14, 8192, %s7245_s29, %s4412_s13, %s5765_s27, %s5765_s27, %s5766_s24  }
 0x640 PF: > { %s7455_s10 = sld [smem:[#allocation20_spill]]  ;;  %s7456_s1 = sld [smem:[#allocation26_spill]] }
 0x641   : > { %p5080_p10 = scmp.ge.s32.totalorder %s5749_s7, 2 }
 0x646   : > { %s4440_s11 = sand.u32 1, %s7455_s10   ;;  %p7457_p11 = scmp.ne.s32.totalorder %s7456_s1, 0 }
 0x647   : > { %s4441_s0 = scalar_lea.sflag [#allocation5], %s4440_s11 }
 0x648   : > { %p5068_p1 = pnand %p5080_p10, %p7457_p11 }
 0x64a   : > { %5704 = dma.done.wait (!%p5068_p1), %s4441_s0, 8192  }
 0x64b   : > { %5706 = vsyncadd (!%p5068_p1), %s4441_s0, 4294959104  ;;  %s24_s7 = sadd.s32 1, %s5749_s7   ;;  %s7458_s27 = sld [smem:[#allocation23_spill]] }
 0x64c   : > { %p21_p5 = scmp.ge.s32.totalorder %s24_s7, 10   ;;  %s7459_s29 = sld [smem:[#allocation27_spill]] }
 0x64d   : > { %s7460_s12 = sld [smem:[#allocation28_spill]]  ;;  %s7461_s21 = smov %s5713_s22 }
 0x64e   : > { %s7462_s22 = smov %s5717_s23  ;;  %s7463_s23 = smov %s6080_s16 }
 0x64f   : > { %s7464_s24 = smov %s5725_s25  ;;  %s7465_s25 = smov %s5729_s26 }
 0x650   : > { %s7466_s26 = smov %s5979_s4  ;;  %s7467_s28 = smov %s5745_s30 }
 0x651   :  { %23 = sbr.rel (!%p21_p5) target bundleno = 16 (0x10), region = 125 }
 0x653   : > { %s7468_s30 = smov %s7460_s12 }
 0x658   :  { %4446 = vsyncpa [#allocation4], 1 }
 0x659   :  { %4448 = vsyncpa [#allocation4 + $0x1], 1 }
 0x65a   :  { %4449 = vsyncpa [#allocation7], 1 }
 0x65b   :  { %4450 = vsyncpa [#allocation11], 1 }
 0x65c   :  { %4451 = vsyncpa [#allocation5], 1 }
 0x65d   :  { %4453 = vsyncpa [#allocation5 + $0x1], 1 }

</bundles_post_ra>
